<compile_context>
chip_gen: v7x
topology: tpu7x:2x2x1
jax: 0.10.0
libtpu: 0.0.40
codegen_flags: <defaults>
</compile_context>

<pallas_src>
import functools

import jax
import jax.numpy as jnp
from jax.experimental import pallas as pl
from jax.experimental.pallas import tpu as pltpu


# ----------------------------------------------------------------------------
# Dense masked criss-cross attention for one image (runs twice per step)
# ----------------------------------------------------------------------------
def _criss_cross_dense(x_cn, wt, bt, mask_bias, C, C8):
    """x_cn: (C, N) f32. wt: (P, C), bt: (P, 1), mask_bias: (N, N) in {0,-1e30}.

    Returns out_H + out_W (un-scaled by gamma) as (C, N) f32.
    """
    # Fused v|q|k 1x1-conv projection: one channel-major MXU matmul.
    proj = jnp.dot(wt, x_cn, preferred_element_type=jnp.float32) + bt  # (P, N)
    v_cn = proj[:C, :]                     # (C,  N)  sublane offset 0
    q_cn = proj[C:C + C8, :]               # (C8, N)  sublane offset C   (64)
    k_cn = proj[C + C8:C + 2 * C8, :]      # (C8, N)  sublane offset C+C8(72)

    # Transposed energies Et[p', p] = k_{p'} . q_p  (one tiny (C8,N) transpose).
    kt = k_cn.T                                                   # (N, C8)
    et = jnp.dot(kt, q_cn, preferred_element_type=jnp.float32)    # (N, N)
    eb = et + mask_bias        # criss-cross support bias (symmetric slab)

    # Joint softmax over the criss-cross support.  Reductions run over the
    # sublane axis (cheap cross-vreg VALU adds + one in-vreg reduce).
    m = jnp.max(eb, axis=0, keepdims=True)              # (1, N)
    p = jnp.exp(eb - m)                                  # (N, N)
    den = jnp.sum(p, axis=0, keepdims=True)              # (1, N)
    inv = pl.reciprocal(den, approx=True)                 # EUP slot

    # out[c, p] = sum_{p'} softmax[p, p'] * v[c, p']; fold 1/den in afterwards
    # so the normalization is a (C, N) multiply instead of an (N, N) one.
    out_u = jnp.dot(v_cn, p, preferred_element_type=jnp.float32)  # (C, N)
    return out_u * inv


# ----------------------------------------------------------------------------
# Fused kernel: both S_Modules + residual combine, one batch element per step
# ----------------------------------------------------------------------------
def _fused_feedback_kernel(x_ref, fb_ref, mask_ref, w1_ref, b1_ref,
                           w2_ref, b2_ref, scal_ref, o_ref, *, C, C8):
    x_cn = x_ref[...]          # (C, N)  lane-dense, channel-major
    fb_cn = fb_ref[...]        # (C, N)
    mask_bias = mask_ref[...]  # (N, N)  resident across grid steps

    att1 = _criss_cross_dense(x_cn, w1_ref[...], b1_ref[...], mask_bias, C, C8)
    att2 = _criss_cross_dense(fb_cn, w2_ref[...], b2_ref[...], mask_bias, C, C8)

    gs1 = scal_ref[0]   # S_Module(x) internal gamma
    gs2 = scal_ref[1]   # S_Module(fb) internal gamma
    g = scal_ref[2]     # FeedbackSpatialAttention.gamma
    g2 = scal_ref[3]    # FeedbackSpatialAttention.gamma2

    # out = x + g*(gs1*att1 + x) + g2*(gs2*att2 + fb)   -- stored channel-major,
    # no transpose on the store path (lane-dense vst).
    o_ref[...] = ((1.0 + g) * x_cn + g2 * fb_cn
                  + (g * gs1) * att1 + (g2 * gs2) * att2).astype(o_ref.dtype)


# ----------------------------------------------------------------------------
# Parameter fusion: one pre-transposed [wv | wq | wk] weight per S_Module
# ----------------------------------------------------------------------------
def _fuse_qkv_t(params):
    wq, bq, wk, bk, wv, bv, gamma_s = params
    w = jnp.concatenate([wv, wq, wk], axis=1)              # (C, P), P = C + 2*C/8
    b = jnp.concatenate([bv, bq, bk], axis=1)              # (1, P)
    return w.T, b.T, gamma_s                               # (P, C), (P, 1)


# ----------------------------------------------------------------------------
# FeedbackSpatialAttention forward (NCHW boundary like the torch module)
# ----------------------------------------------------------------------------
def feedback_forward(x_nchw, fb_nchw, p_x_att, p_fb_att, gamma, gamma2):
    B, C, H, W = x_nchw.shape
    N = H * W
    C8 = C // 8
    if N % 128 != 0:
        # TODO(synk): pad the spatial axis to a multiple of 128 for lane-dense
        # blocks instead of rejecting it.
        raise ValueError("H*W must be a multiple of 128 for lane-dense blocks")

    w1t, b1t, gs1 = _fuse_qkv_t(p_x_att)
    w2t, b2t, gs2 = _fuse_qkv_t(p_fb_att)
    P = w1t.shape[0]
    scal = jnp.concatenate([gs1.reshape(1), gs2.reshape(1),
                            gamma.reshape(1), gamma2.reshape(1)]
                           ).astype(jnp.float32)           # (4,) in SMEM

    # Criss-cross support bias (built once by XLA, resident in VMEM):
    # 0 where key shares the query's row OR column, -1e30 elsewhere.  The
    # self pixel is intentionally UNMASKED: it appears once here, matching the
    # original H-branch(-inf diag) + W-branch(finite) pair exactly.
    pos = jnp.arange(N, dtype=jnp.int32)
    row = pos // W
    col = pos % W
    allowed = (row[:, None] == row[None, :]) | (col[:, None] == col[None, :])
    mask_bias = jnp.where(allowed, 0.0, -1e30).astype(jnp.float32)  # (N, N)

    # Free reshapes only: NCHW -> (B, C, H*W) lane-dense slabs.
    x_cn = x_nchw.reshape(B, C, N)
    fb_cn = fb_nchw.reshape(B, C, N)

    kernel = functools.partial(_fused_feedback_kernel, C=C, C8=C8)

    img_spec = pl.BlockSpec((pl.Squeezed(), C, N), lambda b: (b, 0, 0))
    w_spec = pl.BlockSpec((P, C), lambda b: (0, 0))
    b_spec = pl.BlockSpec((P, 1), lambda b: (0, 0))
    mask_spec = pl.BlockSpec((N, N), lambda b: (0, 0))

    # Advisory cost estimate so XLA can overlap this short custom call.
    flops = int(B * (2 * (2 * P * C * N + 2 * N * C8 * N + 2 * C * N * N)
                     + 8 * C * N))
    transcendentals = int(B * 2 * N * N)
    bytes_accessed = int(4 * (3 * B * C * N + N * N + 2 * (P * C + P) + 4))

    out_cn = pl.pallas_call(
        kernel,
        out_shape=jax.ShapeDtypeStruct((B, C, N), x_nchw.dtype),
        grid=(B,),
        in_specs=[
            img_spec,                                       # x
            img_spec,                                       # fb
            mask_spec,                                      # criss-cross bias
            w_spec, b_spec,                                 # x_att  fused v|q|k
            w_spec, b_spec,                                 # fb_att fused v|q|k
            pl.BlockSpec(memory_space=pltpu.MemorySpace.SMEM),  # scalars
        ],
        out_specs=pl.BlockSpec((pl.Squeezed(), C, N), lambda b: (b, 0, 0)),
        compiler_params=pltpu.CompilerParams(
            dimension_semantics=("parallel",)),
        cost_estimate=pl.CostEstimate(flops=flops,
                                      transcendentals=transcendentals,
                                      bytes_accessed=bytes_accessed),
    )(x_cn, fb_cn, mask_bias, w1t, b1t, w2t, b2t, scal)

    return out_cn.reshape(B, C, H, W)


# ----------------------------------------------------------------------------
# Pure-JAX reference (mirrors the torch forward exactly, NCHW)
# ----------------------------------------------------------------------------
def s_module_ref(x, params):
    wq, bq, wk, bk, wv, bv, gamma = params
    B, C, H, W = x.shape
    q = jnp.einsum('bchw,cd->bdhw', x, wq) + bq.reshape(1, -1, 1, 1)
    k = jnp.einsum('bchw,cd->bdhw', x, wk) + bk.reshape(1, -1, 1, 1)
    v = jnp.einsum('bchw,cd->bdhw', x, wv) + bv.reshape(1, -1, 1, 1)
    e_h = jnp.einsum('bdhw,bdgw->bhwg', q, k)
    e_h = jnp.where(jnp.eye(H, dtype=bool)[:, None, :], -jnp.inf, e_h)
    e_w = jnp.einsum('bdhw,bdhv->bhwv', q, k)
    att = jax.nn.softmax(jnp.concatenate([e_h, e_w], axis=-1), axis=-1)
    a_h = att[..., :H]
    a_w = att[..., H:]
    out_h = jnp.einsum('bhwg,bcgw->bchw', a_h, v)
    out_w = jnp.einsum('bhwv,bchv->bchw', a_w, v)
    return float(gamma[0]) * (out_h + out_w) + x


def ref_forward(x, fb, p_x_att, p_fb_att, gamma, gamma2):
    x_att = float(gamma[0]) * s_module_ref(x, p_x_att)
    fb_att = s_module_ref(fb, p_fb_att)
    x_att = x_att + float(gamma2[0]) * fb_att
    return x + x_att


# ----------------------------------------------------------------------------
if __name__ == "__main__":
    B, C, H, W = 2, 64, 16, 16
    C8 = C // 8

    key = jax.random.PRNGKey(0)
    keys = jax.random.split(key, 16)

    def init_s(ks, g):
        wq = 0.1 * jax.random.normal(ks[0], (C, C8), jnp.float32)
        bq = 0.1 * jax.random.normal(ks[1], (1, C8), jnp.float32)
        wk = 0.1 * jax.random.normal(ks[2], (C, C8), jnp.float32)
        bk = 0.1 * jax.random.normal(ks[3], (1, C8), jnp.float32)
        wv = 0.1 * jax.random.normal(ks[4], (C, C), jnp.float32)
        bv = 0.1 * jax.random.normal(ks[5], (1, C), jnp.float32)
        gamma = jnp.array([g], jnp.float32)   # torch init is 0; nonzero here
        return (wq, bq, wk, bk, wv, bv, gamma)

    p_x_att = init_s(keys[0:6], 0.5)
    p_fb_att = init_s(keys[6:12], 0.4)
    gamma = jnp.array([0.7], jnp.float32)     # torch init is 0; nonzero here
    gamma2 = jnp.array([0.3], jnp.float32)

    x = jax.random.normal(keys[12], (B, C, H, W), jnp.float32)
    fb = jax.random.normal(keys[13], (B, C, H, W), jnp.float32)

    fwd = jax.jit(feedback_forward)
    out = fwd(x, fb, p_x_att, p_fb_att, gamma, gamma2)
    out = jax.block_until_ready(out)

    ref = ref_forward(x, fb, p_x_att, p_fb_att, gamma, gamma2)
    max_err = float(jnp.max(jnp.abs(out - ref)))
    assert out.shape == (B, C, H, W)
    if not bool(jnp.all(jnp.isfinite(out))) or max_err > 5e-3:
        raise SystemExit(f"MISMATCH max_err={max_err}")
    print("KERNEL_OK")
</pallas_src>

<mosaic_0001>
module attributes {stable_mosaic.version = 11 : i64} {
  func.func @_fused_feedback_kernel(%arg0: i32, %arg1: memref<1x64x256xf32, #tpu.memory_space<vmem>>, %arg2: memref<1x64x256xf32, #tpu.memory_space<vmem>>, %arg3: memref<256x256xf32, #tpu.memory_space<vmem>>, %arg4: memref<80x64xf32, #tpu.memory_space<vmem>>, %arg5: memref<80x1xf32, #tpu.memory_space<vmem>>, %arg6: memref<80x64xf32, #tpu.memory_space<vmem>>, %arg7: memref<80x1xf32, #tpu.memory_space<vmem>>, %arg8: memref<4xf32, #tpu.memory_space<smem>>, %arg9: memref<1x64x256xf32, #tpu.memory_space<vmem>>) attributes {dimension_semantics = [#tpu.dimension_semantics<parallel>], iteration_bounds = array<i64: 2>, scalar_prefetch = 0 : i64, scratch_operands = 0 : i64, tpu.core_type = #tpu.core_type<tc>, window_params = [{transform_indices = @transform_0, window_bounds = array<i64: 1, 64, 256>}, {transform_indices = @transform_1, window_bounds = array<i64: 1, 64, 256>}, {pipeline_mode = #tpu.pipeline_mode<synchronous>, transform_indices = @transform_2, window_bounds = array<i64: 256, 256>}, {pipeline_mode = #tpu.pipeline_mode<synchronous>, transform_indices = @transform_3, window_bounds = array<i64: 80, 64>}, {pipeline_mode = #tpu.pipeline_mode<synchronous>, transform_indices = @transform_4, window_bounds = array<i64: 80, 1>}, {pipeline_mode = #tpu.pipeline_mode<synchronous>, transform_indices = @transform_5, window_bounds = array<i64: 80, 64>}, {pipeline_mode = #tpu.pipeline_mode<synchronous>, transform_indices = @transform_6, window_bounds = array<i64: 80, 1>}, {transform_indices = @transform_7, window_bounds = array<i64: 4>}, {transform_indices = @transform_8, window_bounds = array<i64: 1, 64, 256>}]} {
    %c0 = arith.constant 0 : index
    %c0_0 = arith.constant 0 : index
    %c0_1 = arith.constant 0 : index
    %0 = vector.load %arg1[%c0, %c0_0, %c0_1] : memref<1x64x256xf32, #tpu.memory_space<vmem>>, vector<1x64x256xf32>
    %1 = vector.shape_cast %0 : vector<1x64x256xf32> to vector<64x256xf32>
    %c0_2 = arith.constant 0 : index
    %c0_3 = arith.constant 0 : index
    %c0_4 = arith.constant 0 : index
    %2 = vector.load %arg2[%c0_2, %c0_3, %c0_4] : memref<1x64x256xf32, #tpu.memory_space<vmem>>, vector<1x64x256xf32>
    %3 = vector.shape_cast %2 : vector<1x64x256xf32> to vector<64x256xf32>
    %c0_5 = arith.constant 0 : index
    %c0_6 = arith.constant 0 : index
    %4 = vector.load %arg3[%c0_5, %c0_6] : memref<256x256xf32, #tpu.memory_space<vmem>>, vector<256x256xf32>
    %c0_7 = arith.constant 0 : index
    %c0_8 = arith.constant 0 : index
    %5 = vector.load %arg4[%c0_7, %c0_8] : memref<80x64xf32, #tpu.memory_space<vmem>>, vector<80x64xf32>
    %c0_9 = arith.constant 0 : index
    %c0_10 = arith.constant 0 : index
    %6 = vector.load %arg5[%c0_9, %c0_10] : memref<80x1xf32, #tpu.memory_space<vmem>>, vector<80x1xf32>
    %cst = arith.constant dense<0.000000e+00> : vector<80x256xf32>
    %7 = tpu.matmul %5, %1, %cst {dimension_numbers = #tpu.dot_dimension_numbers<[1], [0], [0], [1], [0, 0, 1, 1], [], []>} : vector<80x64xf32>, vector<64x256xf32>, vector<80x256xf32> -> vector<80x256xf32>
    %8 = vector.broadcast %6 : vector<80x1xf32> to vector<80x256xf32>
    %9 = arith.addf %7, %8 : vector<80x256xf32>
    %10 = vector.extract_strided_slice %9 {offsets = [0, 0], sizes = [64, 256], strides = [1, 1]} : vector<80x256xf32> to vector<64x256xf32>
    %11 = vector.extract_strided_slice %9 {offsets = [64, 0], sizes = [8, 256], strides = [1, 1]} : vector<80x256xf32> to vector<8x256xf32>
    %12 = vector.extract_strided_slice %9 {offsets = [72, 0], sizes = [8, 256], strides = [1, 1]} : vector<80x256xf32> to vector<8x256xf32>
    %13 = tpu.transpose %12, [1, 0] : vector<8x256xf32> -> vector<256x8xf32>
    %cst_11 = arith.constant dense<0.000000e+00> : vector<256x256xf32>
    %14 = tpu.matmul %13, %11, %cst_11 {dimension_numbers = #tpu.dot_dimension_numbers<[1], [0], [0], [1], [0, 0, 1, 1], [], []>} : vector<256x8xf32>, vector<8x256xf32>, vector<256x256xf32> -> vector<256x256xf32>
    %15 = arith.addf %14, %4 : vector<256x256xf32>
    %cst_12 = arith.constant dense<0xFF800000> : vector<256xf32>
    %16 = vector.multi_reduction <maximumf>, %15, %cst_12 [0] : vector<256x256xf32> to vector<256xf32>
    %17 = vector.shape_cast %16 : vector<256xf32> to vector<1x256xf32>
    %18 = vector.broadcast %17 : vector<1x256xf32> to vector<256x256xf32>
    %19 = arith.subf %15, %18 : vector<256x256xf32>
    %20 = math.exp %19 : vector<256x256xf32>
    %cst_13 = arith.constant dense<0.000000e+00> : vector<256xf32>
    %21 = vector.multi_reduction <add>, %20, %cst_13 [0] : vector<256x256xf32> to vector<256xf32>
    %22 = vector.shape_cast %21 : vector<256xf32> to vector<1x256xf32>
    %23 = tpu.reciprocal %22 {approx = true} : vector<1x256xf32> -> vector<1x256xf32>
    %cst_14 = arith.constant dense<0.000000e+00> : vector<64x256xf32>
    %24 = tpu.matmul %10, %20, %cst_14 {dimension_numbers = #tpu.dot_dimension_numbers<[1], [0], [0], [1], [0, 0, 1, 1], [], []>} : vector<64x256xf32>, vector<256x256xf32>, vector<64x256xf32> -> vector<64x256xf32>
    %25 = vector.broadcast %23 : vector<1x256xf32> to vector<64x256xf32>
    %26 = arith.mulf %24, %25 : vector<64x256xf32>
    %c0_15 = arith.constant 0 : index
    %c0_16 = arith.constant 0 : index
    %27 = vector.load %arg6[%c0_15, %c0_16] : memref<80x64xf32, #tpu.memory_space<vmem>>, vector<80x64xf32>
    %c0_17 = arith.constant 0 : index
    %c0_18 = arith.constant 0 : index
    %28 = vector.load %arg7[%c0_17, %c0_18] : memref<80x1xf32, #tpu.memory_space<vmem>>, vector<80x1xf32>
    %cst_19 = arith.constant dense<0.000000e+00> : vector<80x256xf32>
    %29 = tpu.matmul %27, %3, %cst_19 {dimension_numbers = #tpu.dot_dimension_numbers<[1], [0], [0], [1], [0, 0, 1, 1], [], []>} : vector<80x64xf32>, vector<64x256xf32>, vector<80x256xf32> -> vector<80x256xf32>
    %30 = vector.broadcast %28 : vector<80x1xf32> to vector<80x256xf32>
    %31 = arith.addf %29, %30 : vector<80x256xf32>
    %32 = vector.extract_strided_slice %31 {offsets = [0, 0], sizes = [64, 256], strides = [1, 1]} : vector<80x256xf32> to vector<64x256xf32>
    %33 = vector.extract_strided_slice %31 {offsets = [64, 0], sizes = [8, 256], strides = [1, 1]} : vector<80x256xf32> to vector<8x256xf32>
    %34 = vector.extract_strided_slice %31 {offsets = [72, 0], sizes = [8, 256], strides = [1, 1]} : vector<80x256xf32> to vector<8x256xf32>
    %35 = tpu.transpose %34, [1, 0] : vector<8x256xf32> -> vector<256x8xf32>
    %cst_20 = arith.constant dense<0.000000e+00> : vector<256x256xf32>
    %36 = tpu.matmul %35, %33, %cst_20 {dimension_numbers = #tpu.dot_dimension_numbers<[1], [0], [0], [1], [0, 0, 1, 1], [], []>} : vector<256x8xf32>, vector<8x256xf32>, vector<256x256xf32> -> vector<256x256xf32>
    %37 = arith.addf %36, %4 : vector<256x256xf32>
    %cst_21 = arith.constant dense<0xFF800000> : vector<256xf32>
    %38 = vector.multi_reduction <maximumf>, %37, %cst_21 [0] : vector<256x256xf32> to vector<256xf32>
    %39 = vector.shape_cast %38 : vector<256xf32> to vector<1x256xf32>
    %40 = vector.broadcast %39 : vector<1x256xf32> to vector<256x256xf32>
    %41 = arith.subf %37, %40 : vector<256x256xf32>
    %42 = math.exp %41 : vector<256x256xf32>
    %cst_22 = arith.constant dense<0.000000e+00> : vector<256xf32>
    %43 = vector.multi_reduction <add>, %42, %cst_22 [0] : vector<256x256xf32> to vector<256xf32>
    %44 = vector.shape_cast %43 : vector<256xf32> to vector<1x256xf32>
    %45 = tpu.reciprocal %44 {approx = true} : vector<1x256xf32> -> vector<1x256xf32>
    %cst_23 = arith.constant dense<0.000000e+00> : vector<64x256xf32>
    %46 = tpu.matmul %32, %42, %cst_23 {dimension_numbers = #tpu.dot_dimension_numbers<[1], [0], [0], [1], [0, 0, 1, 1], [], []>} : vector<64x256xf32>, vector<256x256xf32>, vector<64x256xf32> -> vector<64x256xf32>
    %47 = vector.broadcast %45 : vector<1x256xf32> to vector<64x256xf32>
    %48 = arith.mulf %46, %47 : vector<64x256xf32>
    %c0_24 = arith.constant 0 : index
    %49 = memref.load %arg8[%c0_24] : memref<4xf32, #tpu.memory_space<smem>>
    %c1 = arith.constant 1 : index
    %50 = memref.load %arg8[%c1] : memref<4xf32, #tpu.memory_space<smem>>
    %c2 = arith.constant 2 : index
    %51 = memref.load %arg8[%c2] : memref<4xf32, #tpu.memory_space<smem>>
    %c3 = arith.constant 3 : index
    %52 = memref.load %arg8[%c3] : memref<4xf32, #tpu.memory_space<smem>>
    %cst_25 = arith.constant 1.000000e+00 : f32
    %53 = arith.addf %cst_25, %51 : f32
    %54 = vector.broadcast %53 : f32 to vector<64x256xf32>
    %55 = arith.mulf %54, %1 : vector<64x256xf32>
    %56 = vector.broadcast %52 : f32 to vector<64x256xf32>
    %57 = arith.mulf %56, %3 : vector<64x256xf32>
    %58 = arith.addf %55, %57 : vector<64x256xf32>
    %59 = arith.mulf %51, %49 : f32
    %60 = vector.broadcast %59 : f32 to vector<64x256xf32>
    %61 = arith.mulf %60, %26 : vector<64x256xf32>
    %62 = arith.addf %58, %61 : vector<64x256xf32>
    %63 = arith.mulf %52, %50 : f32
    %64 = vector.broadcast %63 : f32 to vector<64x256xf32>
    %65 = arith.mulf %64, %48 : vector<64x256xf32>
    %66 = arith.addf %62, %65 : vector<64x256xf32>
    %c0_26 = arith.constant 0 : index
    %c0_27 = arith.constant 0 : index
    %c0_28 = arith.constant 0 : index
    %67 = vector.load %arg9[%c0_26, %c0_27, %c0_28] : memref<1x64x256xf32, #tpu.memory_space<vmem>>, vector<1x64x256xf32>
    %68 = vector.shape_cast %67 : vector<1x64x256xf32> to vector<64x256xf32>
    %69 = vector.shape_cast %66 : vector<64x256xf32> to vector<1x64x256xf32>
    tpu.vector_store %arg9[%c0_26, %c0_27, %c0_28], %69 {strides = array<i32>} : memref<1x64x256xf32, #tpu.memory_space<vmem>>, vector<1x64x256xf32>,
    return
  }
  func.func @transform_0(%arg0: i32) -> (i32, i32, i32) {
    %c0_i32 = arith.constant 0 : i32
    %c0_i32_0 = arith.constant 0 : i32
    %c0_i32_1 = arith.constant 0 : i32
    return %arg0, %c0_i32, %c0_i32_0 : i32, i32, i32
  }
  func.func @transform_1(%arg0: i32) -> (i32, i32, i32) {
    %c0_i32 = arith.constant 0 : i32
    %c0_i32_0 = arith.constant 0 : i32
    %c0_i32_1 = arith.constant 0 : i32
    return %arg0, %c0_i32, %c0_i32_0 : i32, i32, i32
  }
  func.func @transform_2(%arg0: i32) -> (i32, i32) {
    %c0_i32 = arith.constant 0 : i32
    %c0_i32_0 = arith.constant 0 : i32
    %c0_i32_1 = arith.constant 0 : i32
    return %c0_i32, %c0_i32_0 : i32, i32
  }
  func.func @transform_3(%arg0: i32) -> (i32, i32) {
    %c0_i32 = arith.constant 0 : i32
    %c0_i32_0 = arith.constant 0 : i32
    %c0_i32_1 = arith.constant 0 : i32
    return %c0_i32, %c0_i32_0 : i32, i32
  }
  func.func @transform_4(%arg0: i32) -> (i32, i32) {
    %c0_i32 = arith.constant 0 : i32
    %c0_i32_0 = arith.constant 0 : i32
    %c0_i32_1 = arith.constant 0 : i32
    return %c0_i32, %c0_i32_0 : i32, i32
  }
  func.func @transform_5(%arg0: i32) -> (i32, i32) {
    %c0_i32 = arith.constant 0 : i32
    %c0_i32_0 = arith.constant 0 : i32
    %c0_i32_1 = arith.constant 0 : i32
    return %c0_i32, %c0_i32_0 : i32, i32
  }
  func.func @transform_6(%arg0: i32) -> (i32, i32) {
    %c0_i32 = arith.constant 0 : i32
    %c0_i32_0 = arith.constant 0 : i32
    %c0_i32_1 = arith.constant 0 : i32
    return %c0_i32, %c0_i32_0 : i32, i32
  }
  func.func @transform_7(%arg0: i32) -> i32 {
    %c0_i32 = arith.constant 0 : i32
    %c0_i32_0 = arith.constant 0 : i32
    return %c0_i32 : i32
  }
  func.func @transform_8(%arg0: i32) -> (i32, i32, i32) {
    %c0_i32 = arith.constant 0 : i32
    %c0_i32_0 = arith.constant 0 : i32
    %c0_i32_1 = arith.constant 0 : i32
    return %arg0, %c0_i32, %c0_i32_0 : i32, i32, i32
  }
}

</mosaic_0001>

<bundles_post_ra>
// kernel: feedback_forward.1
= control target key start
LH: loop header
LB: loop body
LE: loop exit
PB: predicated region body
PF: predicated region fallthrough
CT: control target
= control target key end

     0   :  { %13 = vsyncpa [#allocation3], 0  ;;  %s3589_s27 = smov 0   ;;  %s5984_s0 = inlined_call_operand.vmem [shape: f32[2,64,256], index: 0, kind: input, shape index: {}]   ;;  %s5985_s1 = inlined_call_operand.vmem [shape: f32[2,64,256], index: 1, kind: input, shape index: {}]   ;;  %s5986_s2 = inlined_call_operand.vmem [shape: f32[256,256], index: 2, kind: input, shape index: {}]   ;;  %s5987_s3 = inlined_call_operand.vmem [shape: f32[80,64], index: 3, kind: input, shape index: {}]   ;;  %s5988_s4 = inlined_call_operand.vmem [shape: f32[80,1], index: 4, kind: input, shape index: {}]   ;;  %s5989_s5 = inlined_call_operand.vmem [shape: f32[80,64], index: 5, kind: input, shape index: {}]   ;;  %s5990_s6 = inlined_call_operand.vmem [shape: f32[80,1], index: 6, kind: input, shape index: {}]   ;;  %s5991_s7 = inlined_call_operand.vmem [shape: f32[4], index: 7, kind: input, shape index: {}]   ;;  %s5992_s8 = inlined_call_operand.vmem [shape: f32[2,64,256], index: 8, kind: output, shape index: {}]  }
   0x1 LB: > { %s2882_s28 = sadd.s32 4294967295, %s3539_s27   ;;  %p2884_p0 = scmp.ge.s32.totalorder %s3539_s27, 1  ;;  %s3539_s27 = sphi %s3589_s27, %s19_s27  }
   0x2   : > { %p228_p1 = scmp.lt.s32.totalorder %s3539_s27, 3  ;;  %s256_s9 = sshll.u32 %s5991_s7, 4  ;;  %s257_s9 = int_to_ptr.vmem [resolvable:$true] %s256_s9 }
   0x3   : > { %p3155_p3 = scmp.eq.s32.totalorder %s2882_s28, 0  ;;  %s3514_s11 = scalar_lea.vmem %s257_s9, 16 }
   0x4   : > { %p3600_p2 = pnand %p2884_p0, %p228_p1  ;;  %p3515_p6 = scmp.ne.s32.totalorder %s257_s9, %s3514_s11 }
   0x5   : > { %p3522_p10 = scmp.lt.s32.totalorder %s257_s9, %s257_s9  ;;  %p3523_p11 = scmp.lt.s32.totalorder %s3514_s11, %s3514_s11 }
   0x6   : > { %p3151_p4 = pneg %p3600_p2 }
   0x7   : > { %p3524_p12 = por %p3523_p11, %p3522_p10 }
   0x8   : > { %p3152_p5 = pnand %p3155_p3, %p3151_p4 }
   0xa   : > { %p3516_p7 = pneg %p3152_p5 }
   0xc   : > { %p3517_p8 = pnand %p3516_p7, %p3515_p6 }
   0xe   : > { %p3518_p9 = pneg %p3517_p8 }
  0x10   : > { %p3525_p13 = pnand %p3524_p12, %p3518_p9 }
  0x12   : > { %3528 = shalt.err (!%p3525_p13)
}
  0x13   : > { %s3541_s12 = smov [#allocation2]   ;;  %285 = sbr.rel (%p3600_p2) target bundleno = 2035 (0x7f3), region = 52 }
  0x14   : > { %3154 = dma.vmem_to_smem (!%p3152_p5), %s257_s9, 16, %s3541_s12, [#allocation3]  }
  0x1a   : > { %3534 = dma.done.wait (%p3155_p3), [#allocation3], 16  }
  0x1b   : > { %3536 = vsyncadd (%p3155_p3), [#allocation3], 4294967280 }
  0x1c   : > { %291 = sfence }
  0x1d   : > { %p325_p0 = scmp.lt.s32.totalorder %s2882_s28, 1  ;;  %v5994_v0 = vmov 0.0   ;;  %v5993_v1 = vmov 0   ;;  %v455_v2 = vld [vmem:[%s5988_s4 + $0x48] sm:$0xff]  ;;  %v454_v10 = vld [vmem:[%s5988_s4 + $0x40] sm:$0xff]  ;;  %v448_v30 = vld [vmem:[%s5988_s4 + $0x10] sm:$0xff] }
  0x1e   : > { %601 = vmatprep.mubr.f32.mxu0 %v5994_v0  ;;  %887 = vmatprep.mubr.f32.mxu1 %v5994_v0  ;;  %v446_v23 = vld [vmem:[%s5988_s4] sm:$0xff]  ;;  %v447_v28 = vld [vmem:[%s5988_s4 + $0x8] sm:$0xff]  ;;  %vm506_vm0 = vcmask 523264   ;;  %v449_v32 = vld [vmem:[%s5988_s4 + $0x18] sm:$0xff]  ;;  %vm726_vm1 = vcmask 64512   ;;  %s4777_s22 = sld [smem:[#allocation2 + $0x2]] }
  0x1f   : > { %s6353_s28 = smov (!%p325_p0, %s2882_s28), 1  ;;  %3168 = vset.pattern.permute.xlu0 %v5993_v1  ;;  %v436_v31 = vld [vmem:[%s5987_s3] sm:$0xff]  ;;  %v437_v33 = vld [vmem:[%s5987_s3 + $0x8] sm:$0xff]  ;;  %v438_v35 = vld [vmem:[%s5987_s3 + $0x10] sm:$0xff]  ;;  %s4779_s23 = sld [smem:[#allocation2 + $0x3]] }
  0x20   : > { %s3614_s13 = sshll.u32 %s6353_s28, 7  ;;  %503 = vperm.xlu0 %3168, %v455_v2   ;;  %v450_v34 = vld [vmem:[%s5988_s4 + $0x20] sm:$0xff]  ;;  %v451_v36 = vld [vmem:[%s5988_s4 + $0x28] sm:$0xff]  ;;  %v439_v37 = vld [vmem:[%s5987_s3 + $0x18] sm:$0xff]  ;;  %s2664_s25 = sld [smem:[#allocation2]] }
  0x21   : > { %s3623_s18 = scalar_lea.vmem %s5984_s0, %s3614_s13  ;;  %v452_v38 = vld [vmem:[%s5988_s4 + $0x30] sm:$0xff]  ;;  %v440_v39 = vld [vmem:[%s5987_s3 + $0x20] sm:$0xff]  ;;  %v453_v40 = vld [vmem:[%s5988_s4 + $0x38] sm:$0xff]  ;;  %s4634_s20 = scalar_lea.vmem %s5985_s1, %s3614_s13 }
  0x22   : > { %v341_v3 = vld [vmem:[%s3623_s18 + $0x8] sm:$0xff]  ;;  %v343_v4 = vld [vmem:[%s3623_s18 + $0x18] sm:$0xff]  ;;  %v340_v6 = vld [vmem:[%s3623_s18] sm:$0xff]  ;;  %s2979_s17 = sld [smem:[#allocation2 + $0x1]] }
  0x23   : > { %v2987_v5 = vpack.c.bf16 %v343_v4, %v341_v3  ;;  %v342_v7 = vld [vmem:[%s3623_s18 + $0x10] sm:$0xff]  ;;  %v345_v9 = vld [vmem:[%s3623_s18 + $0x28] sm:$0xff]  ;;  %v347_v11 = vld [vmem:[%s3623_s18 + $0x38] sm:$0xff] }
  0x24   : > { %v2989_v8 = vpack.c.bf16 %v342_v7, %v340_v6  ;;  %v344_v12 = vld [vmem:[%s3623_s18 + $0x20] sm:$0xff]  ;;  %v346_v13 = vld [vmem:[%s3623_s18 + $0x30] sm:$0xff]  ;;  %v2991_v14 = vpack.c.bf16 %v347_v11, %v345_v9  ;;  %v349_v15 = vld [vmem:[%s3623_s18 + $0x48] sm:$0xff]  ;;  %498 = vperm.xlu0 %3168, %v454_v10   ;;  %s2668_s24 = sadd.f32 1.0, %s4777_s22 }
  0x25   : > { %2988 = vmatprep.subr.bf16.mxu0 %v2987_v5  ;;  %v351_v16 = vld [vmem:[%s3623_s18 + $0x58] sm:$0xff]  ;;  %v2993_v17 = vpack.c.bf16 %v346_v13, %v344_v12  ;;  %v348_v18 = vld [vmem:[%s3623_s18 + $0x40] sm:$0xff]  ;;  %v350_v19 = vld [vmem:[%s3623_s18 + $0x50] sm:$0xff] }
  0x26   : > { %2990 = vmatpush1.bf16.msra.mxu0 %v2989_v8  ;;  %v353_v20 = vld [vmem:[%s3623_s18 + $0x68] sm:$0xff]  ;;  %v355_v21 = vld [vmem:[%s3623_s18 + $0x78] sm:$0xff]  ;;  %v2995_v22 = vpack.c.bf16 %v351_v16, %v349_v15  ;;  %v2997_v24 = vpack.c.bf16 %v350_v19, %v348_v18  ;;  %v352_v26 = vld [vmem:[%s3623_s18 + $0x60] sm:$0xff]  ;;  %s2719_s26 = smul.f32 %s4777_s22, %s2664_s25  ;;  %s5918_s22 = scalar_lea.vmem %s5992_s8, %s3614_s13 }
  0x27   : > { %2992 = vmatprep.subr.bf16.mxu0 %v2991_v14  ;;  %v2999_v25 = vpack.c.bf16 %v355_v21, %v353_v20  ;;  %v354_v27 = vld [vmem:[%s3623_s18 + $0x70] sm:$0xff]  ;;  %v441_v41 = vld [vmem:[%s5987_s3 + $0x28] sm:$0xff]  ;;  %v1569_v44 = vld [vmem:[%s5990_s6 + $0x40] sm:$0xff] }
  0x28   : > { %458 = vperm.xlu0 %3168, %v446_v23   ;;  %v3001_v29 = vpack.c.bf16 %v354_v27, %v352_v26  ;;  %v1570_v42 = vld [vmem:[%s5990_s6 + $0x48] sm:$0xff]  ;;  %v442_v43 = vld [vmem:[%s5987_s3 + $0x30] sm:$0xff]  ;;  %v443_v45 = vld [vmem:[%s5987_s3 + $0x38] sm:$0xff]  ;;  %s2753_s19 = smul.f32 %s4779_s23, %s2979_s17 }
  0x29   : > { %v444_v46 = vld [vmem:[%s5987_s3 + $0x40] sm:$0xff]  ;;  %v445_v47 = vld [vmem:[%s5987_s3 + $0x48] sm:$0xff] }
  0x2a   : > { %2994 = vmatpush1.bf16.msra.mxu0 %v2993_v17 }
  0x2b   : > { %2996 = vmatprep.subr.bf16.mxu0 %v2995_v22 }
  0x2c   : > { %463 = vperm.xlu0 %3168, %v447_v28  }
  0x2e   : > { %2998 = vmatpush1.bf16.msra.mxu0 %v2997_v24 }
  0x2f   : > { %3000 = vmatprep.subr.bf16.mxu0 %v2999_v25 }
  0x30   : > { %468 = vperm.xlu0 %3168, %v448_v30  }
  0x32   : > { %3002 = vmatpush1.bf16.msra.mxu0 %v3001_v29 }
  0x34   : > { %473 = vperm.xlu0 %3168, %v449_v32  }
  0x35   : > { %2895 = vmatmul.mubr.msk.f32.vlgmr.msra.gmra.mrb[0].mxu0 %vm506_vm0, %v436_v31 }
  0x36   : > { %607 = vmatprep.mubr.f32.mxu0 %v5994_v0 }
  0x38   : > { %478 = vperm.xlu0 %3168, %v450_v34  }
  0x39   : > { %2896 = vmatmul.mubr.msk.f32.gmra.mrb[2].mxu0 %vm506_vm0, %v437_v33 }
  0x3a   : > { %613 = vmatprep.mubr.f32.mxu0 %v5994_v0 }
  0x3c   : > { %483 = vperm.xlu0 %3168, %v451_v36  }
  0x3d   : > { %2897 = vmatmul.mubr.msk.f32.gmra.mrb[4].mxu0 %vm506_vm0, %v438_v35 }
  0x3e   : > { %619 = vmatprep.mubr.f32.mxu0 %v5994_v0 }
  0x40   : > { %488 = vperm.xlu0 %3168, %v452_v38  }
  0x41   : > { %2898 = vmatmul.mubr.msk.f32.gmra.mrb[6].mxu0 %vm506_vm0, %v439_v37 }
  0x42   : > { %625 = vmatprep.mubr.f32.mxu0 %v5994_v0 }
  0x44   : > { %493 = vperm.xlu0 %3168, %v453_v40  }
  0x45   : > { %2899 = vmatmul.mubr.msk.f32.gmra.mrb[8].mxu0 %vm506_vm0, %v440_v39 }
  0x46   : > { %631 = vmatprep.mubr.f32.mxu0 %v5994_v0 }
  0x48   : > { %1618 = vperm.xlu0 %3168, %v1570_v42  }
  0x49   : > { %2900 = vmatmul.mubr.msk.f32.gmra.mrb[10].mxu0 %vm506_vm0, %v441_v41 }
  0x4a   : > { %637 = vmatprep.mubr.f32.mxu0 %v5994_v0 }
  0x4c   : > { %1613 = vperm.xlu0 %3168, %v1569_v44  }
  0x4d   : > { %2901 = vmatmul.mubr.msk.f32.gmra.mrb[12].mxu0 %vm506_vm0, %v442_v43 }
  0x4e   : > { %643 = vmatprep.mubr.f32.mxu0 %v5994_v0 }
  0x51   : > { %2902 = vmatmul.mubr.msk.f32.gmra.mrb[14].mxu0 %vm506_vm0, %v443_v45 }
  0x52   : > { %649 = vmatprep.mubr.f32.mxu0 %v5994_v0 }
  0x55   : > { %2903 = vmatmul.mubr.msk.f32.gmra.mrb[16].mxu0 %vm506_vm0, %v444_v46 }
  0x56   : > { %655 = vmatprep.mubr.f32.mxu0 %v5994_v0 }
  0x59   : > { %2904 = vmatmul.mubr.msk.f32.gmra.mrb[18].mxu0 %vm506_vm0, %v445_v47 }
  0x9f   : > { %v504_v48 = vpop.permute.xlu0 %503 }
  0xa3   : > { %v499_v49 = vpop.permute.xlu0 %498 }
  0xa7   : > { %v3723_v50 = vpop.permute.xlu0 %458 }
  0xa8   : > { %6074 = vst [vmem:[#allocation5_spill] sm:$0xff] %v3723_v50 }
 0x108   : > { %v3725_v51 = vpop.f32.mrb[0].mxu0 }
 0x109   : > { %6075 = vst [vmem:[#allocation6_spill] sm:$0xff] %v3725_v51  ;;  %v605_v52 = vpop.f32.mrb[1].mxu0  ;;  %v419_v51 = vld [vmem:[%s5986_s2 + $0x178] sm:$0xff] }
 0x10a   : > { %v606_v53 = vadd.f32 %v605_v52, %v3723_v50  ;;  %v372_v52 = vld [vmem:[%s5986_s2] sm:$0xff] }
 0x10c   : > { %v3728_v54 = vpop.f32.mrb[2].mxu0  ;;  %1486 = vmatprep.mubr.f32.mxu0 %v606_v53  ;;  %v376_v53 = vld [vmem:[%s5986_s2 + $0x20] sm:$0xff] }
 0x10d   : > { %6076 = vst [vmem:[#allocation7_spill] sm:$0xff] %v3728_v54  ;;  %v3730_v55 = vpop.f32.mrb[3].mxu0 }
 0x10e   : > { %6077 = vst [vmem:[#allocation8_spill] sm:$0xff] %v3730_v55 }
 0x110   : > { %v3732_v56 = vpop.f32.mrb[4].mxu0 }
 0x111   : > { %6078 = vst [vmem:[#allocation9_spill] sm:$0xff] %v3732_v56  ;;  %v3734_v57 = vpop.f32.mrb[5].mxu0 }
 0x112   : > { %6079 = vst [vmem:[#allocation10_spill] sm:$0xff] %v3734_v57 }
 0x114   : > { %v3736_v58 = vpop.f32.mrb[6].mxu0 }
 0x115   : > { %6080 = vst [vmem:[#allocation11_spill] sm:$0xff] %v3736_v58  ;;  %v3738_v59 = vpop.f32.mrb[7].mxu0 }
 0x116   : > { %6081 = vst [vmem:[#allocation12_spill] sm:$0xff] %v3738_v59 }
 0x118   : > { %v3740_v60 = vpop.f32.mrb[8].mxu0 }
 0x119   : > { %6082 = vst [vmem:[#allocation13_spill] sm:$0xff] %v3740_v60  ;;  %v3742_v61 = vpop.f32.mrb[9].mxu0 }
 0x11a   : > { %6083 = vst [vmem:[#allocation14_spill] sm:$0xff] %v3742_v61 }
 0x11c   : > { %v3744_v62 = vpop.f32.mrb[10].mxu0 }
 0x11d   : > { %6084 = vst [vmem:[#allocation15_spill] sm:$0xff] %v3744_v62  ;;  %v3746_v63 = vpop.f32.mrb[11].mxu0 }
 0x11e   : > { %6085 = vst [vmem:[#allocation16_spill] sm:$0xff] %v3746_v63 }
 0x120   : > { %v3748_v2 = vpop.f32.mrb[12].mxu0 }
 0x121   : > { %6086 = vst [vmem:[#allocation17_spill] sm:$0xff] %v3748_v2  ;;  %v3750_v3 = vpop.f32.mrb[13].mxu0 }
 0x122   : > { %6087 = vst [vmem:[#allocation18_spill] sm:$0xff] %v3750_v3 }
 0x124   : > { %v3752_v4 = vpop.f32.mrb[14].mxu0 }
 0x125   : > { %6088 = vst [vmem:[#allocation19_spill] sm:$0xff] %v3752_v4  ;;  %v3754_v5 = vpop.f32.mrb[15].mxu0 }
 0x126   : > { %6089 = vst [vmem:[#allocation20_spill] sm:$0xff] %v3754_v5 }
 0x128   : > { %v651_v6 = vpop.f32.mrb[16].mxu0 }
 0x129   : > { %v653_v7 = vpop.f32.mrb[17].mxu0  ;;  %v652_v9 = vadd.f32 %v651_v6, %v499_v49  ;;  %v373_v6 = vld [vmem:[%s5986_s2 + $0x8] sm:$0xff] }
 0x12a   : > { %v654_v8 = vadd.f32 %v653_v7, %v499_v49  ;;  %v377_v7 = vld [vmem:[%s5986_s2 + $0x28] sm:$0xff] }
 0x12c   : > { %v657_v10 = vpop.f32.mrb[18].mxu0  ;;  %823 = vmatprep.subr.mxu1 %v654_v8 }
 0x12d   : > { %v659_v11 = vpop.f32.mrb[19].mxu0  ;;  %824 = vmatpush1.msra.mxu1 %v652_v9  ;;  %v658_v12 = vadd.f32 %v657_v10, %v504_v48 }
 0x12e   : > { %v660_v13 = vadd.f32 %v659_v11, %v504_v48 }
 0x12f   : > { %662 = vxpose.xlu1.b32.start.end [1/1] (short) %v658_v12, 128 }
 0x16c   : > { %694 = vxpose.xlu1.b32.start.end [1/1] (short) %v660_v13, 128  ;;  %v374_v13 = vld [vmem:[%s5986_s2 + $0x10] sm:$0xff] }
 0x1af   : > { %v678_v14 = vpop.trf.xlu1 }
 0x1b0   : > { %2905 = vmatmul.mubr.msk.f32.vlgmr.msra.gmra.mrb[0].mxu1 %vm726_vm1, %v678_v14 }
 0x1b1   : > { %893 = vmatprep.mubr.f32.mxu1 %v5994_v0 }
 0x1b3   : > { %v679_v15 = vpop.trf.xlu1 }
 0x1b4   : > { %2906 = vmatmul.mubr.msk.f32.gmra.mrb[2].mxu1 %vm726_vm1, %v679_v15  ;;  %v378_v15 = vld [vmem:[%s5986_s2 + $0x30] sm:$0xff] }
 0x1b5   : > { %899 = vmatprep.mubr.f32.mxu1 %v5994_v0 }
 0x1b7   : > { %v680_v16 = vpop.trf.xlu1 }
 0x1b8   : > { %2907 = vmatmul.mubr.msk.f32.gmra.mrb[4].mxu1 %vm726_vm1, %v680_v16  ;;  %v375_v16 = vld [vmem:[%s5986_s2 + $0x18] sm:$0xff] }
 0x1b9   : > { %905 = vmatprep.mubr.f32.mxu1 %v5994_v0 }
 0x1bb   : > { %v681_v17 = vpop.trf.xlu1 }
 0x1bc   : > { %2908 = vmatmul.mubr.msk.f32.gmra.mrb[6].mxu1 %vm726_vm1, %v681_v17 }
 0x1bd   : > { %911 = vmatprep.mubr.f32.mxu1 %v5994_v0 }
 0x1bf   : > { %v682_v18 = vpop.trf.xlu1 }
 0x1c0   : > { %2909 = vmatmul.mubr.msk.f32.gmra.mrb[8].mxu1 %vm726_vm1, %v682_v18  ;;  %v379_v18 = vld [vmem:[%s5986_s2 + $0x38] sm:$0xff] }
 0x1c1   : > { %917 = vmatprep.mubr.f32.mxu1 %v5994_v0 }
 0x1c3   : > { %v683_v19 = vpop.trf.xlu1 }
 0x1c4   : > { %2910 = vmatmul.mubr.msk.f32.gmra.mrb[10].mxu1 %vm726_vm1, %v683_v19 }
 0x1c5   : > { %923 = vmatprep.mubr.f32.mxu1 %v5994_v0 }
 0x1c7   : > { %v684_v20 = vpop.trf.xlu1 }
 0x1c8   : > { %2911 = vmatmul.mubr.msk.f32.gmra.mrb[12].mxu1 %vm726_vm1, %v684_v20 }
 0x1c9   : > { %929 = vmatprep.mubr.f32.mxu1 %v5994_v0 }
 0x1cb   : > { %v685_v21 = vpop.trf.xlu1 }
 0x1cc   : > { %2912 = vmatmul.mubr.msk.f32.gmra.mrb[14].mxu1 %vm726_vm1, %v685_v21 }
 0x1cd   : > { %935 = vmatprep.mubr.f32.mxu1 %v5994_v0 }
 0x1cf   : > { %v686_v22 = vpop.trf.xlu1 }
 0x1d0   : > { %2913 = vmatmul.mubr.msk.f32.gmra.mrb[16].mxu1 %vm726_vm1, %v686_v22 }
 0x1d1   : > { %941 = vmatprep.mubr.f32.mxu1 %v5994_v0 }
 0x1d3   : > { %v687_v23 = vpop.trf.xlu1 }
 0x1d4   : > { %2914 = vmatmul.mubr.msk.f32.gmra.mrb[18].mxu1 %vm726_vm1, %v687_v23 }
 0x1d5   : > { %947 = vmatprep.mubr.f32.mxu1 %v5994_v0 }
 0x1d7   : > { %v688_v24 = vpop.trf.xlu1 }
 0x1d8   : > { %2915 = vmatmul.mubr.msk.f32.gmra.mrb[20].mxu1 %vm726_vm1, %v688_v24 }
 0x1d9   : > { %953 = vmatprep.mubr.f32.mxu1 %v5994_v0 }
 0x1db   : > { %v689_v25 = vpop.trf.xlu1 }
 0x1dc   : > { %2916 = vmatmul.mubr.msk.f32.gmra.mrb[22].mxu1 %vm726_vm1, %v689_v25 }
 0x1dd   : > { %959 = vmatprep.mubr.f32.mxu1 %v5994_v0 }
 0x1df   : > { %v690_v26 = vpop.trf.xlu1 }
 0x1e0   : > { %2917 = vmatmul.mubr.msk.f32.gmra.mrb[24].mxu1 %vm726_vm1, %v690_v26  ;;  %v380_v26 = vld [vmem:[%s5986_s2 + $0x40] sm:$0xff] }
 0x1e1   : > { %965 = vmatprep.mubr.f32.mxu1 %v5994_v0 }
 0x1e3   : > { %v691_v27 = vpop.trf.xlu1 }
 0x1e4   : > { %2918 = vmatmul.mubr.msk.f32.gmra.mrb[26].mxu1 %vm726_vm1, %v691_v27 }
 0x1e5   : > { %971 = vmatprep.mubr.f32.mxu1 %v5994_v0 }
 0x1e7   : > { %v692_v28 = vpop.trf.xlu1 }
 0x1e8   : > { %2919 = vmatmul.mubr.msk.f32.gmra.mrb[28].mxu1 %vm726_vm1, %v692_v28  ;;  %v381_v28 = vld [vmem:[%s5986_s2 + $0x48] sm:$0xff] }
 0x1e9   : > { %977 = vmatprep.mubr.f32.mxu1 %v5994_v0 }
 0x1eb   : > { %v693_v29 = vpop.trf.xlu1 }
 0x1ec   : > { %2920 = vmatmul.mubr.msk.f32.gmra.mrb[30].mxu1 %vm726_vm1, %v693_v29 }
 0x1ed   : > { %983 = vmatprep.mubr.f32.mxu1 %v5994_v0 }
 0x1ef   : > { %v710_v30 = vpop.trf.xlu1 }
 0x1f0   : > { %2921 = vmatmul.mubr.msk.f32.gmra.mrb[32].mxu1 %vm726_vm1, %v710_v30 }
 0x1f1   : > { %989 = vmatprep.mubr.f32.mxu1 %v5994_v0 }
 0x1f3   : > { %v711_v31 = vpop.trf.xlu1 }
 0x1f4   : > { %2922 = vmatmul.mubr.msk.f32.gmra.mrb[34].mxu1 %vm726_vm1, %v711_v31 }
 0x1f5   : > { %995 = vmatprep.mubr.f32.mxu1 %v5994_v0 }
 0x1f7   : > { %v712_v32 = vpop.trf.xlu1 }
 0x1f8   : > { %2923 = vmatmul.mubr.msk.f32.gmra.mrb[36].mxu1 %vm726_vm1, %v712_v32 }
 0x1f9   : > { %1001 = vmatprep.mubr.f32.mxu1 %v5994_v0 }
 0x1fb   : > { %v713_v33 = vpop.trf.xlu1 }
 0x1fc   : > { %2924 = vmatmul.mubr.msk.f32.gmra.mrb[38].mxu1 %vm726_vm1, %v713_v33 }
 0x1fd   : > { %1007 = vmatprep.mubr.f32.mxu1 %v5994_v0 }
 0x1ff   : > { %v714_v34 = vpop.trf.xlu1 }
 0x200   : > { %2925 = vmatmul.mubr.msk.f32.gmra.mrb[40].mxu1 %vm726_vm1, %v714_v34  ;;  %v382_v34 = vld [vmem:[%s5986_s2 + $0x50] sm:$0xff] }
 0x201   : > { %1013 = vmatprep.mubr.f32.mxu1 %v5994_v0 }
 0x203   : > { %v715_v35 = vpop.trf.xlu1 }
 0x204   : > { %2926 = vmatmul.mubr.msk.f32.gmra.mrb[42].mxu1 %vm726_vm1, %v715_v35 }
 0x205   : > { %1019 = vmatprep.mubr.f32.mxu1 %v5994_v0 }
 0x207   : > { %v716_v36 = vpop.trf.xlu1 }
 0x208   : > { %2927 = vmatmul.mubr.msk.f32.gmra.mrb[44].mxu1 %vm726_vm1, %v716_v36  ;;  %v383_v36 = vld [vmem:[%s5986_s2 + $0x58] sm:$0xff] }
 0x209   : > { %1025 = vmatprep.mubr.f32.mxu1 %v5994_v0 }
 0x20b   : > { %v717_v37 = vpop.trf.xlu1 }
 0x20c   : > { %2928 = vmatmul.mubr.msk.f32.gmra.mrb[46].mxu1 %vm726_vm1, %v717_v37 }
 0x20d   : > { %1031 = vmatprep.mubr.f32.mxu1 %v5994_v0 }
 0x20f   : > { %v718_v38 = vpop.trf.xlu1 }
 0x210   : > { %2929 = vmatmul.mubr.msk.f32.gmra.mrb[48].mxu1 %vm726_vm1, %v718_v38 }
 0x211   : > { %1037 = vmatprep.mubr.f32.mxu1 %v5994_v0 }
 0x213   : > { %v719_v39 = vpop.trf.xlu1 }
 0x214   : > { %2930 = vmatmul.mubr.msk.f32.gmra.mrb[50].mxu1 %vm726_vm1, %v719_v39 }
 0x215   : > { %1043 = vmatprep.mubr.f32.mxu1 %v5994_v0 }
 0x217   : > { %v720_v40 = vpop.trf.xlu1 }
 0x218   : > { %2931 = vmatmul.mubr.msk.f32.gmra.mrb[52].mxu1 %vm726_vm1, %v720_v40 }
 0x219   : > { %1049 = vmatprep.mubr.f32.mxu1 %v5994_v0 }
 0x21b   : > { %v721_v41 = vpop.trf.xlu1 }
 0x21c   : > { %2932 = vmatmul.mubr.msk.f32.gmra.mrb[54].mxu1 %vm726_vm1, %v721_v41 }
 0x21d   : > { %1055 = vmatprep.mubr.f32.mxu1 %v5994_v0 }
 0x21f   : > { %v722_v42 = vpop.trf.xlu1 }
 0x220   : > { %2933 = vmatmul.mubr.msk.f32.gmra.mrb[56].mxu1 %vm726_vm1, %v722_v42  ;;  %v384_v42 = vld [vmem:[%s5986_s2 + $0x60] sm:$0xff] }
 0x221   : > { %1061 = vmatprep.mubr.f32.mxu1 %v5994_v0 }
 0x223   : > { %v723_v43 = vpop.trf.xlu1 }
 0x224   : > { %2934 = vmatmul.mubr.msk.f32.gmra.mrb[58].mxu1 %vm726_vm1, %v723_v43 }
 0x225   : > { %1067 = vmatprep.mubr.f32.mxu1 %v5994_v0 }
 0x227   : > { %v724_v44 = vpop.trf.xlu1 }
 0x228   : > { %2935 = vmatmul.mubr.msk.f32.gmra.mrb[60].mxu1 %vm726_vm1, %v724_v44  ;;  %v385_v44 = vld [vmem:[%s5986_s2 + $0x68] sm:$0xff] }
 0x229   : > { %1073 = vmatprep.mubr.f32.mxu1 %v5994_v0 }
 0x22b   : > { %v725_v45 = vpop.trf.xlu1 }
 0x22c   : > { %2936 = vmatmul.mubr.msk.f32.gmra.mrb[62].mxu1 %vm726_vm1, %v725_v45 }
 0x22d   : > { %2000 = vmatprep.mubr.f32.mxu1 %v5994_v0 }
 0x283   : > { %v889_v46 = vpop.f32.mrb[0].mxu1 }
 0x284   : > { %v891_v47 = vpop.f32.mrb[1].mxu1  ;;  %v3832_v9 = vadd.f32 %v889_v46, %v372_v52  ;;  %v386_v52 = vld [vmem:[%s5986_s2 + $0x70] sm:$0xff] }
 0x285   : > { %v3836_v12 = vadd.f32 %v891_v47, %v373_v6  ;;  %v387_v6 = vld [vmem:[%s5986_s2 + $0x78] sm:$0xff] }
 0x287   : > { %v895_v48 = vpop.f32.mrb[2].mxu1 }
 0x288   : > { %v897_v49 = vpop.f32.mrb[3].mxu1  ;;  %v3856_v21 = vadd.f32 %v895_v48, %v374_v13 }
 0x289   : > { %v3860_v24 = vadd.f32 %v897_v49, %v375_v16  ;;  %v388_v16 = vld [vmem:[%s5986_s2 + $0x80] sm:$0xff] }
 0x28b   : > { %v901_v8 = vpop.f32.mrb[4].mxu1 }
 0x28c   : > { %v3834_v10 = vadd.f32 %v901_v8, %v376_v53  ;;  %v903_v11 = vpop.f32.mrb[5].mxu1 }
 0x28d   : > { %v3841_v14 = vadd.f32 %v903_v11, %v377_v7 }
 0x28e   : > { %v1080_v17 = vmax.f32 %v3832_v9, %v3834_v10 }
 0x28f   : > { %v1117_v19 = vmax.f32 %v3836_v12, %v3841_v14  ;;  %v907_v20 = vpop.f32.mrb[6].mxu1 }
 0x290   : > { %v3858_v22 = vadd.f32 %v907_v20, %v378_v15  ;;  %v909_v23 = vpop.f32.mrb[7].mxu1 }
 0x291   : > { %v3862_v25 = vadd.f32 %v909_v23, %v379_v18  ;;  %v389_v18 = vld [vmem:[%s5986_s2 + $0x88] sm:$0xff] }
 0x292   : > { %v1081_v27 = vmax.f32 %v3856_v21, %v3858_v22 }
 0x293   : > { %v1118_v29 = vmax.f32 %v3860_v24, %v3862_v25  ;;  %v913_v30 = vpop.f32.mrb[8].mxu1 }
 0x294   : > { %v3874_v31 = vadd.f32 %v913_v30, %v380_v26  ;;  %v915_v32 = vpop.f32.mrb[9].mxu1  ;;  %v391_v30 = vld [vmem:[%s5986_s2 + $0x98] sm:$0xff] }
 0x295   : > { %v3876_v33 = vadd.f32 %v915_v32, %v381_v28  ;;  %v390_v28 = vld [vmem:[%s5986_s2 + $0x90] sm:$0xff] }
 0x296   : > { %v1082_v35 = vmax.f32 %v1080_v17, %v3874_v31 }
 0x297   : > { %v1119_v37 = vmax.f32 %v1117_v19, %v3876_v33  ;;  %v919_v38 = vpop.f32.mrb[10].mxu1 }
 0x298   : > { %v3886_v39 = vadd.f32 %v919_v38, %v382_v34  ;;  %v921_v40 = vpop.f32.mrb[11].mxu1  ;;  %v392_v38 = vld [vmem:[%s5986_s2 + $0xa0] sm:$0xff] }
 0x299   : > { %v3888_v41 = vadd.f32 %v921_v40, %v383_v36 }
 0x29a   : > { %v1083_v43 = vmax.f32 %v1081_v27, %v3886_v39 }
 0x29b   : > { %v1120_v45 = vmax.f32 %v1118_v29, %v3888_v41  ;;  %v925_v46 = vpop.f32.mrb[12].mxu1 }
 0x29c   : > { %v3898_v47 = vadd.f32 %v925_v46, %v384_v42  ;;  %v927_v48 = vpop.f32.mrb[13].mxu1  ;;  %v393_v42 = vld [vmem:[%s5986_s2 + $0xa8] sm:$0xff] }
 0x29d   : > { %v3900_v49 = vadd.f32 %v927_v48, %v385_v44 }
 0x29e   : > { %v1084_v53 = vmax.f32 %v1082_v35, %v3898_v47 }
 0x29f   : > { %v1121_v7 = vmax.f32 %v1119_v37, %v3900_v49  ;;  %v931_v8 = vpop.f32.mrb[14].mxu1 }
 0x2a0   : > { %v3910_v11 = vadd.f32 %v931_v8, %v386_v52  ;;  %v933_v13 = vpop.f32.mrb[15].mxu1  ;;  %v394_v52 = vld [vmem:[%s5986_s2 + $0xb0] sm:$0xff] }
 0x2a1   : > { %v3912_v15 = vadd.f32 %v933_v13, %v387_v6  ;;  %v395_v6 = vld [vmem:[%s5986_s2 + $0xb8] sm:$0xff] }
 0x2a2   : > { %v1085_v17 = vmax.f32 %v1083_v43, %v3910_v11 }
 0x2a3   : > { %v1122_v19 = vmax.f32 %v1120_v45, %v3912_v15  ;;  %v937_v20 = vpop.f32.mrb[16].mxu1 }
 0x2a4   : > { %v3922_v23 = vadd.f32 %v937_v20, %v388_v16  ;;  %v939_v26 = vpop.f32.mrb[17].mxu1  ;;  %v397_v20 = vld [vmem:[%s5986_s2 + $0xc8] sm:$0xff] }
 0x2a5   : > { %v3924_v27 = vadd.f32 %v939_v26, %v389_v18  ;;  %v396_v18 = vld [vmem:[%s5986_s2 + $0xc0] sm:$0xff] }
 0x2a6   : > { %v1086_v29 = vmax.f32 %v1084_v53, %v3922_v23 }
 0x2a7   : > { %v1123_v32 = vmax.f32 %v1121_v7, %v3924_v27  ;;  %v943_v34 = vpop.f32.mrb[18].mxu1 }
 0x2a8   : > { %v3934_v35 = vadd.f32 %v943_v34, %v390_v28  ;;  %v945_v36 = vpop.f32.mrb[19].mxu1  ;;  %v398_v34 = vld [vmem:[%s5986_s2 + $0xd0] sm:$0xff] }
 0x2a9   : > { %v3936_v37 = vadd.f32 %v945_v36, %v391_v30 }
 0x2aa   : > { %v1087_v40 = vmax.f32 %v1085_v17, %v3934_v35 }
 0x2ab   : > { %v1124_v43 = vmax.f32 %v1122_v19, %v3936_v37  ;;  %v949_v44 = vpop.f32.mrb[20].mxu1 }
 0x2ac   : > { %v3946_v45 = vadd.f32 %v949_v44, %v392_v38  ;;  %v951_v46 = vpop.f32.mrb[21].mxu1  ;;  %v399_v38 = vld [vmem:[%s5986_s2 + $0xd8] sm:$0xff] }
 0x2ad   : > { %v3948_v48 = vadd.f32 %v951_v46, %v393_v42 }
 0x2ae   : > { %v1088_v53 = vmax.f32 %v1086_v29, %v3946_v45 }
 0x2af   : > { %6090 = vst [vmem:[#allocation21_spill] sm:$0xff] %v3948_v48  ;;  %v1125_v7 = vmax.f32 %v1123_v32, %v3948_v48  ;;  %v955_v8 = vpop.f32.mrb[22].mxu1 }
 0x2b0   : > { %v3958_v13 = vadd.f32 %v955_v8, %v394_v52  ;;  %v957_v16 = vpop.f32.mrb[23].mxu1  ;;  %v400_v52 = vld [vmem:[%s5986_s2 + $0xe0] sm:$0xff] }
 0x2b1   : > { %v3960_v17 = vadd.f32 %v957_v16, %v395_v6 }
 0x2b2   : > { %v1089_v19 = vmax.f32 %v1087_v40, %v3958_v13 }
 0x2b3   : > { %6091 = vst [vmem:[#allocation22_spill] sm:$0xff] %v3960_v17  ;;  %v1126_v26 = vmax.f32 %v1124_v43, %v3960_v17  ;;  %v961_v28 = vpop.f32.mrb[24].mxu1 }
 0x2b4   : > { %v3970_v29 = vadd.f32 %v961_v28, %v396_v18  ;;  %v963_v30 = vpop.f32.mrb[25].mxu1  ;;  %v402_v28 = vld [vmem:[%s5986_s2 + $0xf0] sm:$0xff] }
 0x2b5   : > { %v3972_v32 = vadd.f32 %v963_v30, %v397_v20 }
 0x2b6   : > { %v1090_v36 = vmax.f32 %v1088_v53, %v3970_v29  ;;  %v401_v53 = vld [vmem:[%s5986_s2 + $0xe8] sm:$0xff] }
 0x2b7   : > { %6092 = vst [vmem:[#allocation23_spill] sm:$0xff] %v3972_v32  ;;  %v1127_v40 = vmax.f32 %v1125_v7, %v3972_v32  ;;  %v967_v42 = vpop.f32.mrb[26].mxu1 }
 0x2b8   : > { %v3982_v43 = vadd.f32 %v967_v42, %v398_v34  ;;  %v969_v44 = vpop.f32.mrb[27].mxu1 }
 0x2b9   : > { %v3984_v46 = vadd.f32 %v969_v44, %v399_v38 }
 0x2ba   : > { %v1091_v6 = vmax.f32 %v1089_v19, %v3982_v43  ;;  %v403_v19 = vld [vmem:[%s5986_s2 + $0xf8] sm:$0xff] }
 0x2bb   : > { %6093 = vst [vmem:[#allocation24_spill] sm:$0xff] %v3984_v46  ;;  %v1128_v8 = vmax.f32 %v1126_v26, %v3984_v46  ;;  %v973_v16 = vpop.f32.mrb[28].mxu1 }
 0x2bc   : > { %v3994_v7 = vadd.f32 %v973_v16, %v400_v52  ;;  %v975_v18 = vpop.f32.mrb[29].mxu1  ;;  %v404_v52 = vld [vmem:[%s5986_s2 + $0x100] sm:$0xff] }
 0x2bd   : > { %v3996_v20 = vadd.f32 %v975_v18, %v401_v53 }
 0x2be   : > { %v1092_v30 = vmax.f32 %v1090_v36, %v3994_v7  ;;  %v405_v36 = vld [vmem:[%s5986_s2 + $0x108] sm:$0xff] }
 0x2bf   : > { %6094 = vst [vmem:[#allocation25_spill] sm:$0xff] %v3996_v20  ;;  %v1129_v34 = vmax.f32 %v1127_v40, %v3996_v20  ;;  %v979_v38 = vpop.f32.mrb[30].mxu1 }
 0x2c0   : > { %v4006_v26 = vadd.f32 %v979_v38, %v402_v28  ;;  %v981_v42 = vpop.f32.mrb[31].mxu1 }
 0x2c1   : > { %v4008_v44 = vadd.f32 %v981_v42, %v403_v19  ;;  %v406_v19 = vld [vmem:[%s5986_s2 + $0x110] sm:$0xff] }
 0x2c2   : > { %v1093_v53 = vmax.f32 %v1091_v6, %v4006_v26  ;;  %v407_v6 = vld [vmem:[%s5986_s2 + $0x118] sm:$0xff] }
 0x2c3   : > { %6095 = vst [vmem:[#allocation26_spill] sm:$0xff] %v4008_v44  ;;  %v1130_v16 = vmax.f32 %v1128_v8, %v4008_v44  ;;  %v985_v18 = vpop.f32.mrb[32].mxu1 }
 0x2c4   : > { %v4018_v40 = vadd.f32 %v985_v18, %v404_v52  ;;  %v987_v28 = vpop.f32.mrb[33].mxu1 }
 0x2c5   : > { %v4020_v38 = vadd.f32 %v987_v28, %v405_v36  ;;  %v408_v36 = vld [vmem:[%s5986_s2 + $0x120] sm:$0xff] }
 0x2c6   : > { %v1094_v42 = vmax.f32 %v1092_v30, %v4018_v40  ;;  %v409_v30 = vld [vmem:[%s5986_s2 + $0x128] sm:$0xff] }
 0x2c7   : > { %6096 = vst [vmem:[#allocation27_spill] sm:$0xff] %v4020_v38  ;;  %v1131_v1 = vmax.f32 %v1129_v34, %v4020_v38  ;;  %v991_v0 = vpop.f32.mrb[34].mxu1 }
 0x2c8   : > { %v4030_v8 = vadd.f32 %v991_v0, %v406_v19  ;;  %v993_v52 = vpop.f32.mrb[35].mxu1 }
 0x2c9   : > { %v4032_v18 = vadd.f32 %v993_v52, %v407_v6  ;;  %v410_v6 = vld [vmem:[%s5986_s2 + $0x130] sm:$0xff] }
 0x2ca   : > { %v1095_v28 = vmax.f32 %v1093_v53, %v4030_v8  ;;  %v411_v53 = vld [vmem:[%s5986_s2 + $0x138] sm:$0xff] }
 0x2cb   : > { %6097 = vst [vmem:[#allocation28_spill] sm:$0xff] %v4032_v18  ;;  %v1132_v4 = vmax.f32 %v1130_v16, %v4032_v18  ;;  %v997_v5 = vpop.f32.mrb[36].mxu1  ;;  %v426_v18 = vld [vmem:[%s5986_s2 + $0x1b0] sm:$0xff] }
 0x2cc   : > { %v4042_v34 = vadd.f32 %v997_v5, %v408_v36  ;;  %v999_v0 = vpop.f32.mrb[37].mxu1 }
 0x2cd   : > { %v4044_v19 = vadd.f32 %v999_v0, %v409_v30  ;;  %v413_v0 = vld [vmem:[%s5986_s2 + $0x148] sm:$0xff] }
 0x2ce   : > { %v1096_v52 = vmax.f32 %v1094_v42, %v4042_v34 }
 0x2cf   : > { %6098 = vst [vmem:[#allocation29_spill] sm:$0xff] %v4044_v19  ;;  %v1133_v2 = vmax.f32 %v1131_v1, %v4044_v19  ;;  %v1003_v3 = vpop.f32.mrb[38].mxu1  ;;  %v412_v1 = vld [vmem:[%s5986_s2 + $0x140] sm:$0xff] }
 0x2d0   : > { %v4054_v16 = vadd.f32 %v1003_v3, %v410_v6  ;;  %v1005_v5 = vpop.f32.mrb[39].mxu1  ;;  %v414_v3 = vld [vmem:[%s5986_s2 + $0x150] sm:$0xff] }
 0x2d1   : > { %v4056_v36 = vadd.f32 %v1005_v5, %v411_v53 }
 0x2d2   : > { %v1097_v30 = vmax.f32 %v1095_v28, %v4054_v16  ;;  %v415_v28 = vld [vmem:[%s5986_s2 + $0x158] sm:$0xff] }
 0x2d3   : > { %6099 = vst [vmem:[#allocation30_spill] sm:$0xff] %v4056_v36  ;;  %v1134_v42 = vmax.f32 %v1132_v4, %v4056_v36  ;;  %v1009_v62 = vpop.f32.mrb[40].mxu1 }
 0x2d4   : > { %v1011_v63 = vpop.f32.mrb[41].mxu1  ;;  %v4075_v4 = vadd.f32 %v1009_v62, %v412_v1  ;;  %v418_v1 = vld [vmem:[%s5986_s2 + $0x170] sm:$0xff] }
 0x2d5   : > { %v4066_v60 = vadd.f32 %v1011_v63, %v413_v0  ;;  %v416_v63 = vld [vmem:[%s5986_s2 + $0x160] sm:$0xff] }
 0x2d6   : > { %v1098_v57 = vmax.f32 %v1096_v52, %v4075_v4 }
 0x2d7   : > { %6100 = vst [vmem:[#allocation31_spill] sm:$0xff] %v4066_v60  ;;  %v1135_v6 = vmax.f32 %v1133_v2, %v4066_v60  ;;  %v1015_v53 = vpop.f32.mrb[42].mxu1 }
 0x2d8   : > { %v4077_v5 = vadd.f32 %v1015_v53, %v414_v3  ;;  %v1017_v61 = vpop.f32.mrb[43].mxu1 }
 0x2d9   : > { %v4079_v58 = vadd.f32 %v1017_v61, %v415_v28 }
 0x2da   : > { %v1099_v0 = vmax.f32 %v1097_v30, %v4077_v5  ;;  %v420_v30 = vld [vmem:[%s5986_s2 + $0x180] sm:$0xff] }
 0x2db   : > { %6101 = vst [vmem:[#allocation32_spill] sm:$0xff] %v4079_v58  ;;  %v1136_v59 = vmax.f32 %v1134_v42, %v4079_v58  ;;  %v1021_v56 = vpop.f32.mrb[44].mxu1 }
 0x2dc   : > { %v4087_v2 = vadd.f32 %v1021_v56, %v416_v63  ;;  %v1023_v62 = vpop.f32.mrb[45].mxu1  ;;  %v417_v56 = vld [vmem:[%s5986_s2 + $0x168] sm:$0xff] }
 0x2dd   : > { %v4111_v55 = vadd.f32 %v1023_v62, %v417_v56  ;;  %v423_v62 = vld [vmem:[%s5986_s2 + $0x198] sm:$0xff]  ;;  %v425_v56 = vld [vmem:[%s5986_s2 + $0x1a8] sm:$0xff] }
 0x2de   : > { %v1100_v61 = vmax.f32 %v1098_v57, %v4087_v2  ;;  %v422_v57 = vld [vmem:[%s5986_s2 + $0x190] sm:$0xff] }
 0x2df   : > { %v1027_v3 = vpop.f32.mrb[46].mxu1  ;;  %6102 = vst [vmem:[#allocation33_spill] sm:$0xff] %v4111_v55 }
 0x2e0   : > { %v4093_v28 = vadd.f32 %v1027_v3, %v418_v1  ;;  %v1029_v53 = vpop.f32.mrb[47].mxu1  ;;  %v421_v3 = vld [vmem:[%s5986_s2 + $0x188] sm:$0xff] }
 0x2e2   : > { %v1101_v42 = vmax.f32 %v1099_v0, %v4093_v28 }
 0x2e3   : > { %v1033_v52 = vpop.f32.mrb[48].mxu1 }
 0x2e4   : > { %v4102_v63 = vadd.f32 %v1033_v52, %v420_v30  ;;  %v1035_v54 = vpop.f32.mrb[49].mxu1 }
 0x2e5   : > { %v4118_v50 = vadd.f32 %v1035_v54, %v421_v3 }
 0x2e6   : > { %v1102_v1 = vmax.f32 %v1100_v61, %v4102_v63  ;;  %v424_v61 = vld [vmem:[%s5986_s2 + $0x1a0] sm:$0xff] }
 0x2e7   : > { %v1039_v0 = vpop.f32.mrb[50].mxu1  ;;  %6103 = vst [vmem:[#allocation34_spill] sm:$0xff] %v4118_v50 }
 0x2e8   : > { %v4116_v30 = vadd.f32 %v1039_v0, %v422_v57  ;;  %v1041_v52 = vpop.f32.mrb[51].mxu1  ;;  %v1137_v57 = vmax.f32 %v1135_v6, %v4111_v55  ;;  %v4131_v0 = vadd.f32 %v1029_v53, %v419_v51  ;;  %v427_v51 = vld [vmem:[%s5986_s2 + $0x1b8] sm:$0xff] }
 0x2e9   : > { %v4136_v19 = vadd.f32 %v1041_v52, %v423_v62 }
 0x2ea   : > { %v1103_v58 = vmax.f32 %v1101_v42, %v4116_v30  ;;  %6104 = vst [vmem:[#allocation35_spill] sm:$0xff] %v4131_v0  ;;  %v1139_v36 = vmax.f32 %v1137_v57, %v4118_v50  ;;  %v1138_v6 = vmax.f32 %v1136_v59, %v4131_v0  ;;  %v429_v59 = vld [vmem:[%s5986_s2 + $0x1c8] sm:$0xff] }
 0x2eb   : > { %v1045_v54 = vpop.f32.mrb[52].mxu1  ;;  %6105 = vst [vmem:[#allocation36_spill] sm:$0xff] %v4136_v19 }
 0x2ec   : > { %v4133_v3 = vadd.f32 %v1045_v54, %v424_v61  ;;  %v1047_v60 = vpop.f32.mrb[53].mxu1 }
 0x2ed   : > { %v4138_v42 = vadd.f32 %v1047_v60, %v425_v56  ;;  %v1140_v60 = vmax.f32 %v1138_v6, %v4136_v19 }
 0x2ee   : > { %v1104_v38 = vmax.f32 %v1102_v1, %v4133_v3  ;;  %v428_v1 = vld [vmem:[%s5986_s2 + $0x1c0] sm:$0xff] }
 0x2ef   : > { %6106 = vst [vmem:[#allocation37_spill] sm:$0xff] %v4138_v42  ;;  %v1141_v53 = vmax.f32 %v1139_v36, %v4138_v42  ;;  %v1051_v61 = vpop.f32.mrb[54].mxu1 }
 0x2f0   : > { %v4149_v57 = vadd.f32 %v1051_v61, %v426_v18  ;;  %v1053_v52 = vpop.f32.mrb[55].mxu1 }
 0x2f1   : > { %v4152_v62 = vadd.f32 %v1053_v52, %v427_v51  ;;  %v430_v51 = vld [vmem:[%s5986_s2 + $0x1d0] sm:$0xff] }
 0x2f2   : > { %v1105_v56 = vmax.f32 %v1103_v58, %v4149_v57  ;;  %v431_v58 = vld [vmem:[%s5986_s2 + $0x1d8] sm:$0xff] }
 0x2f3   : > { %6107 = vst [vmem:[#allocation38_spill] sm:$0xff] %v4152_v62  ;;  %v1142_v36 = vmax.f32 %v1140_v60, %v4152_v62  ;;  %v1057_v54 = vpop.f32.mrb[56].mxu1 }
 0x2f4   : > { %v4162_v18 = vadd.f32 %v1057_v54, %v428_v1  ;;  %v1059_v61 = vpop.f32.mrb[57].mxu1 }
 0x2f5   : > { %v4164_v50 = vadd.f32 %v1059_v61, %v429_v59  ;;  %v432_v59 = vld [vmem:[%s5986_s2 + $0x1e0] sm:$0xff] }
 0x2f6   : > { %v1106_v6 = vmax.f32 %v1104_v38, %v4162_v18  ;;  %v433_v38 = vld [vmem:[%s5986_s2 + $0x1e8] sm:$0xff] }
 0x2f7   : > { %6108 = vst [vmem:[#allocation39_spill] sm:$0xff] %v4164_v50  ;;  %v1143_v52 = vmax.f32 %v1141_v53, %v4164_v50  ;;  %v1063_v19 = vpop.f32.mrb[58].mxu1 }
 0x2f8   : > { %v4174_v60 = vadd.f32 %v1063_v19, %v430_v51  ;;  %v1065_v1 = vpop.f32.mrb[59].mxu1 }
 0x2f9   : > { %v4176_v54 = vadd.f32 %v1065_v1, %v431_v58  ;;  %v434_v58 = vld [vmem:[%s5986_s2 + $0x1f0] sm:$0xff] }
 0x2fa   : > { %v1107_v61 = vmax.f32 %v1105_v56, %v4174_v60  ;;  %v435_v56 = vld [vmem:[%s5986_s2 + $0x1f8] sm:$0xff] }
 0x2fb   : > { %6109 = vst [vmem:[#allocation40_spill] sm:$0xff] %v4176_v54  ;;  %v1144_v0 = vmax.f32 %v1142_v36, %v4176_v54  ;;  %v1069_v55 = vpop.f32.mrb[60].mxu1 }
 0x2fc   : > { %v4186_v53 = vadd.f32 %v1069_v55, %v432_v59  ;;  %v1071_v19 = vpop.f32.mrb[61].mxu1 }
 0x2fd   : > { %v4188_v51 = vadd.f32 %v1071_v19, %v433_v38 }
 0x2fe   : > { %v1108_v1 = vmax.f32 %v1106_v6, %v4186_v53 }
 0x2ff   : > { %6110 = vst [vmem:[#allocation41_spill] sm:$0xff] %v4188_v51  ;;  %v1145_v50 = vmax.f32 %v1143_v52, %v4188_v51  ;;  %v1075_v62 = vpop.f32.mrb[62].mxu1 }
 0x300   : > { %v4198_v36 = vadd.f32 %v1075_v62, %v434_v58  ;;  %v1077_v55 = vpop.f32.mrb[63].mxu1 }
 0x301   : > { %v4200_v59 = vadd.f32 %v1077_v55, %v435_v56 }
 0x302   : > { %v1109_v38 = vmax.f32 %v1107_v61, %v4198_v36 }
 0x303   : > { %v1146_v19 = vmax.f32 %v1144_v0, %v4200_v59 }
 0x304   : > { %v1110_v54 = vmax.f32 %v1108_v1, %v1109_v38 }
 0x305   : > { %v1147_v42 = vmax.f32 %v1145_v50, %v1146_v19 }
 0x306   : > { %v1111_v44 = vrot.slane %v1110_v54, 4 }
 0x307   : > { %v1148_v6 = vrot.slane %v1147_v42, 4 }
 0x308   : > { %v1112_v20 = vmax.f32 %v1110_v54, %v1111_v44 }
 0x309   : > { %v1149_v46 = vmax.f32 %v1147_v42, %v1148_v6 }
 0x30a   : > { %v1113_v32 = vrot.slane %v1112_v20, 2 }
 0x30b   : > { %v1150_v17 = vrot.slane %v1149_v46, 2 }
 0x30c   : > { %v1114_v48 = vmax.f32 %v1112_v20, %v1113_v32 }
 0x30d   : > { %v1151_v52 = vmax.f32 %v1149_v46, %v1150_v17 }
 0x30e   : > { %v1115_v51 = vrot.slane %v1114_v48, 1 }
 0x30f   : > { %v1152_v62 = vrot.slane %v1151_v52, 1 }
 0x310   : > { %v4204_v58 = vmax.f32 %v1114_v48, %v1115_v51 }
 0x311   : > { %v4206_v56 = vmax.f32 %v1151_v52, %v1152_v62 }
 0x312   : > { %v1154_v61 = vsub.f32 %v3832_v9, %v4204_v58  ;;  %v1156_v50 = vsub.f32 %v3856_v21, %v4204_v58  ;;  %v1158_v44 = vsub.f32 %v3834_v10, %v4204_v58  ;;  %v1160_v0 = vsub.f32 %v3858_v22, %v4204_v58 }
 0x313   : > { %v1162_v17 = vsub.f32 %v3874_v31, %v4204_v58  ;;  %v1164_v48 = vsub.f32 %v3886_v39, %v4204_v58  ;;  %v1166_v32 = vsub.f32 %v3898_v47, %v4204_v58  ;;  %v1168_v9 = vsub.f32 %v3910_v11, %v4204_v58 }
 0x314   : > { %v1170_v21 = vsub.f32 %v3922_v23, %v4204_v58  ;;  %v1172_v10 = vsub.f32 %v3934_v35, %v4204_v58  ;;  %v1174_v22 = vsub.f32 %v3946_v45, %v4204_v58  ;;  %v1176_v31 = vsub.f32 %v3958_v13, %v4204_v58 }
 0x315   : > { %v1178_v39 = vsub.f32 %v3970_v29, %v4204_v58  ;;  %v1180_v47 = vsub.f32 %v3982_v43, %v4204_v58  ;;  %v1182_v11 = vsub.f32 %v3994_v7, %v4204_v58  ;;  %v1184_v23 = vsub.f32 %v4006_v26, %v4204_v58 }
 0x316   : > { %v1186_v35 = vsub.f32 %v4018_v40, %v4204_v58  ;;  %v1188_v45 = vsub.f32 %v4030_v8, %v4204_v58  ;;  %v1190_v13 = vsub.f32 %v4042_v34, %v4204_v58  ;;  %v1192_v29 = vsub.f32 %v4054_v16, %v4204_v58 }
 0x317   : > { %v1196_v43 = vsub.f32 %v4077_v5, %v4204_v58  ;;  %v1198_v46 = vsub.f32 %v4087_v2, %v4204_v58  ;;  %v1200_v7 = vsub.f32 %v4093_v28, %v4204_v58  ;;  %v1202_v20 = vsub.f32 %v4102_v63, %v4204_v58  ;;  %v6126_v28 = vld [vmem:[#allocation40_spill] sm:$0xff] }
 0x318   : > { %v1204_v26 = vsub.f32 %v4116_v30, %v4204_v58  ;;  %v1206_v40 = vsub.f32 %v4133_v3, %v4204_v58  ;;  %v1218_v51 = vmul.f32 1.442695, %v1154_v61  ;;  %v1222_v1 = vmul.f32 1.442695, %v1156_v50 }
 0x319   : > { %v1226_v55 = vmul.f32 1.442695, %v1158_v44  ;;  %v1230_v19 = vmul.f32 1.442695, %v1160_v0  ;;  %v1234_v52 = vmul.f32 1.442695, %v1162_v17  ;;  %v1194_v61 = vsub.f32 %v4075_v4, %v4204_v58 }
 0x31a   : > { %3170 = vpow2.f32 %v1218_v51  ;;  %v1238_v62 = vmul.f32 1.442695, %v1164_v48  ;;  %v1242_v16 = vmul.f32 1.442695, %v1166_v32  ;;  %v1246_v42 = vmul.f32 1.442695, %v1168_v9 }
 0x31b   : > { %3172 = vpow2.f32 %v1222_v1  ;;  %v1250_v50 = vmul.f32 1.442695, %v1170_v21  ;;  %v1254_v44 = vmul.f32 1.442695, %v1172_v10  ;;  %v1258_v38 = vmul.f32 1.442695, %v1174_v22 }
 0x31c   : > { %3174 = vpow2.f32 %v1226_v55  ;;  %v1262_v0 = vmul.f32 1.442695, %v1176_v31  ;;  %v1266_v54 = vmul.f32 1.442695, %v1178_v39  ;;  %v1270_v6 = vmul.f32 1.442695, %v1180_v47 }
 0x31d   : > { %3176 = vpow2.f32 %v1230_v19  ;;  %v1274_v51 = vmul.f32 1.442695, %v1182_v11  ;;  %v1278_v17 = vmul.f32 1.442695, %v1184_v23  ;;  %v1282_v48 = vmul.f32 1.442695, %v1186_v35 }
 0x31e   : > { %3178 = vpow2.f32 %v1234_v52  ;;  %v1286_v1 = vmul.f32 1.442695, %v1188_v45  ;;  %v1290_v32 = vmul.f32 1.442695, %v1190_v13  ;;  %v1294_v9 = vmul.f32 1.442695, %v1192_v29 }
 0x31f   : > { %3180 = vpow2.f32 %v1238_v62  ;;  %v6111_v45 = vld [vmem:[#allocation21_spill] sm:$0xff]  ;;  %v6112_v29 = vld [vmem:[#allocation22_spill] sm:$0xff]  ;;  %v6114_v52 = vld [vmem:[#allocation24_spill] sm:$0xff]  ;;  %v1306_v35 = vmul.f32 1.442695, %v1198_v46  ;;  %v6129_v30 = vsub.f32 %v4162_v18, %v4204_v58 }
 0x320   : > { %3182 = vpow2.f32 %v1242_v16  ;;  %v6116_v16 = vld [vmem:[#allocation26_spill] sm:$0xff]  ;;  %v6118_v47 = vld [vmem:[#allocation28_spill] sm:$0xff]  ;;  %v6119_v39 = vld [vmem:[#allocation29_spill] sm:$0xff] }
 0x321   : > { %3184 = vpow2.f32 %v1246_v42  ;;  %v6121_v10 = vld [vmem:[#allocation31_spill] sm:$0xff]  ;;  %v6122_v21 = vld [vmem:[#allocation32_spill] sm:$0xff] }
 0x322   : > { %3186 = vpow2.f32 %v1250_v50 }
 0x323   : > { %3188 = vpow2.f32 %v1254_v44  ;;  %v6115_v44 = vld [vmem:[#allocation25_spill] sm:$0xff] }
 0x324   : > { %v4284_v31 = vpop.eup %3170  ;;  %3190 = vpow2.f32 %v1258_v38  ;;  %v6113_v38 = vld [vmem:[#allocation23_spill] sm:$0xff] }
 0x325   : > { %v4292_v23 = vpop.eup %3172  ;;  %3192 = vpow2.f32 %v1262_v0  ;;  %v6120_v0 = vld [vmem:[#allocation30_spill] sm:$0xff] }
 0x326   : > { %v4300_v42 = vpop.eup %3174  ;;  %3194 = vpow2.f32 %v1266_v54  ;;  %v1346_v55 = vadd.f32 %v4292_v23, %v4284_v31  ;;  %v6117_v54 = vld [vmem:[#allocation27_spill] sm:$0xff] }
 0x327   : > { %v4308_v50 = vpop.eup %3176  ;;  %3196 = vpow2.f32 %v1270_v6  ;;  %v1302_v6 = vmul.f32 1.442695, %v1196_v43  ;;  %v6124_v43 = vld [vmem:[#allocation38_spill] sm:$0xff] }
 0x328   : > { %v4316_v11 = vpop.eup %3178  ;;  %3198 = vpow2.f32 %v1274_v51  ;;  %v1347_v19 = vadd.f32 %v4300_v42, %v1346_v55  ;;  %v1298_v55 = vmul.f32 1.442695, %v1194_v61  ;;  %v1310_v51 = vmul.f32 1.442695, %v1200_v7  ;;  %v6127_v7 = vld [vmem:[#allocation41_spill] sm:$0xff] }
 0x329   : > { %v4323_v22 = vpop.eup %3180  ;;  %3200 = vpow2.f32 %v1278_v17 }
 0x32a   : > { %v4331_v4 = vpop.eup %3182  ;;  %3202 = vpow2.f32 %v1282_v48  ;;  %v1348_v62 = vadd.f32 %v4308_v50, %v1347_v19  ;;  %v6123_v48 = vld [vmem:[#allocation37_spill] sm:$0xff] }
 0x32b   : > { %v4337_v17 = vpop.eup %3184  ;;  %3204 = vpow2.f32 %v1286_v1  ;;  %v6125_v1 = vld [vmem:[#allocation39_spill] sm:$0xff] }
 0x32c   : > { %v4347_v13 = vpop.eup %3186  ;;  %3206 = vpow2.f32 %v1290_v32  ;;  %v1349_v5 = vadd.f32 %v4316_v11, %v1348_v62  ;;  %v1314_v62 = vmul.f32 1.442695, %v1202_v20  ;;  %v6128_v20 = vsub.f32 %v4149_v57, %v4204_v58 }
 0x32d   : > { %v4354_v2 = vpop.eup %3188  ;;  %3208 = vpow2.f32 %v1294_v9  ;;  %v1318_v9 = vmul.f32 1.442695, %v1204_v26  ;;  %v1330_v26 = vmul.f32 1.442695, %v6129_v30  ;;  %v6131_v57 = vsub.f32 %v4186_v53, %v4204_v58 }
 0x32e   : > { %v4362_v8 = vpop.eup %3190  ;;  %3210 = vpow2.f32 %v1298_v55  ;;  %v1350_v34 = vadd.f32 %v4323_v22, %v1349_v5  ;;  %v1322_v55 = vmul.f32 1.442695, %v1206_v40  ;;  %v6130_v40 = vsub.f32 %v4174_v60, %v4204_v58 }
 0x32f   : > { %v4368_v19 = vpop.eup %3192  ;;  %3212 = vpow2.f32 %v1302_v6  ;;  %v1326_v6 = vmul.f32 1.442695, %v6128_v20 }
 0x330   : > { %v4373_v61 = vpop.eup %3194  ;;  %3214 = vpow2.f32 %v1306_v35  ;;  %v1351_v32 = vadd.f32 %v4331_v4, %v1350_v34  ;;  %v1334_v34 = vmul.f32 1.442695, %v6130_v40 }
 0x331   : > { %v4379_v63 = vpop.eup %3196  ;;  %3216 = vpow2.f32 %v1310_v51 }
 0x332   : > { %v4384_v5 = vpop.eup %3198  ;;  %3218 = vpow2.f32 %v1314_v62  ;;  %v1352_v35 = vadd.f32 %v4337_v17, %v1351_v32  ;;  %v1338_v62 = vmul.f32 1.442695, %v6131_v57  ;;  %v6132_v32 = vsub.f32 %v4198_v36, %v4204_v58 }
 0x333   : > { %v4390_v3 = vpop.eup %3200  ;;  %3220 = vpow2.f32 %v1318_v9  ;;  %v6135_v36 = vsub.f32 %v3841_v14, %v4206_v56  ;;  %v6138_v14 = vsub.f32 %v3888_v41, %v4206_v56  ;;  %v6142_v41 = vsub.f32 %v3936_v37, %v4206_v56 }
 0x334   : > { %v4395_v51 = vpop.eup %3202  ;;  %3222 = vpow2.f32 %v1322_v55  ;;  %v1353_v20 = vadd.f32 %v4347_v13, %v1352_v35  ;;  %v1342_v9 = vmul.f32 1.442695, %v6132_v32  ;;  %v6133_v55 = vsub.f32 %v3836_v12, %v4206_v56 }
 0x335   : > { %v4401_v18 = vpop.eup %3204  ;;  %3224 = vpow2.f32 %v1326_v6  ;;  %v6134_v35 = vsub.f32 %v3860_v24, %v4206_v56  ;;  %v1228_v58 = vmul.f32 1.442695, %v6135_v36  ;;  %v6136_v12 = vsub.f32 %v3862_v25, %v4206_v56 }
 0x336   : > { %v4406_v30 = vpop.eup %3206  ;;  %3226 = vpow2.f32 %v1330_v26  ;;  %v1354_v60 = vadd.f32 %v4354_v2, %v1353_v20  ;;  %v1220_v40 = vmul.f32 1.442695, %v6133_v55  ;;  %v1240_v24 = vmul.f32 1.442695, %v6138_v14 }
 0x337   : > { %v4412_v53 = vpop.eup %3208  ;;  %3228 = vpow2.f32 %v1334_v34  ;;  %v1224_v6 = vmul.f32 1.442695, %v6134_v35  ;;  %v1232_v20 = vmul.f32 1.442695, %v6136_v12  ;;  %v6137_v34 = vsub.f32 %v3876_v33, %v4206_v56 }
 0x338   : > { %v4420_v57 = vpop.eup %3210  ;;  %3230 = vpow2.f32 %v1338_v62  ;;  %v1355_v26 = vadd.f32 %v4362_v8, %v1354_v60  ;;  %v6139_v62 = vsub.f32 %v3900_v49, %v4206_v56  ;;  %v6140_v60 = vsub.f32 %v3912_v15, %v4206_v56 }
 0x339   : > { %v1236_v32 = vmul.f32 1.442695, %v6137_v34  ;;  %v4429_v55 = vpop.eup %3212  ;;  %3232 = vpow2.f32 %v1342_v9  ;;  %v6141_v9 = vsub.f32 %v3924_v27, %v4206_v56  ;;  %v1256_v34 = vmul.f32 1.442695, %v6142_v41 }
 0x33a   : > { %v1244_v35 = vmul.f32 1.442695, %v6139_v62  ;;  %v1248_v25 = vmul.f32 1.442695, %v6140_v60  ;;  %v4440_v36 = vpop.eup %3214  ;;  %v1356_v33 = vadd.f32 %v4368_v19, %v1355_v26  ;;  %3234 = vpow2.f32 %v1220_v40 }
 0x33b   : > { %v1252_v12 = vmul.f32 1.442695, %v6141_v9  ;;  %v4449_v14 = vpop.eup %3216  ;;  %3236 = vpow2.f32 %v1224_v6  ;;  %v6144_v41 = vsub.f32 %v6112_v29, %v4206_v56 }
 0x33c   : > { %v4457_v26 = vpop.eup %3218  ;;  %v1357_v27 = vadd.f32 %v4373_v61, %v1356_v33  ;;  %3238 = vpow2.f32 %v1228_v58 }
 0x33d   : > { %v4464_v62 = vpop.eup %3220  ;;  %3240 = vpow2.f32 %v1232_v20  ;;  %v6143_v20 = vsub.f32 %v6111_v45, %v4206_v56  ;;  %v1264_v9 = vmul.f32 1.442695, %v6144_v41 }
 0x33e   : > { %v4472_v33 = vpop.eup %3222  ;;  %v1358_v58 = vadd.f32 %v4379_v63, %v1357_v27  ;;  %3242 = vpow2.f32 %v1236_v32 }
 0x33f   : > { %v4479_v37 = vpop.eup %3224  ;;  %3244 = vpow2.f32 %v1240_v24  ;;  %v1260_v6 = vmul.f32 1.442695, %v6143_v20 }
 0x340   : > { %v4487_v27 = vpop.eup %3226  ;;  %v1359_v32 = vadd.f32 %v4384_v5, %v1358_v58  ;;  %3246 = vpow2.f32 %v1244_v35  ;;  %v6145_v35 = vsub.f32 %v6113_v38, %v4206_v56  ;;  %v6150_v38 = vsub.f32 %v6118_v47, %v4206_v56 }
 0x341   : > { %v4495_v46 = vpop.eup %3228  ;;  %3248 = vpow2.f32 %v1248_v25  ;;  %v6146_v25 = vsub.f32 %v6114_v52, %v4206_v56  ;;  %v6149_v52 = vsub.f32 %v6117_v54, %v4206_v56  ;;  %v6153_v47 = vsub.f32 %v6121_v10, %v4206_v56 }
 0x342   : > { %v4500_v60 = vpop.eup %3230  ;;  %v1360_v40 = vadd.f32 %v4390_v3, %v1359_v32  ;;  %3250 = vpow2.f32 %v1252_v12  ;;  %v1268_v45 = vmul.f32 1.442695, %v6145_v35  ;;  %v6147_v12 = vsub.f32 %v6115_v44, %v4206_v56 }
 0x343   : > { %v4508_v20 = vpop.eup %3232  ;;  %3252 = vpow2.f32 %v1256_v34  ;;  %v1272_v29 = vmul.f32 1.442695, %v6146_v25  ;;  %v6148_v34 = vsub.f32 %v6116_v16, %v4206_v56  ;;  %v1284_v25 = vmul.f32 1.442695, %v6149_v52 }
 0x344   : > { %v3235_v41 = vpop.eup %3234  ;;  %v1361_v24 = vadd.f32 %v4395_v51, %v1360_v40  ;;  %3254 = vpow2.f32 %v1260_v6  ;;  %v1276_v32 = vmul.f32 1.442695, %v6147_v12  ;;  %v6151_v16 = vsub.f32 %v6119_v39, %v4206_v56 }
 0x345   : > { %v3237_v35 = vpop.eup %3236  ;;  %3256 = vpow2.f32 %v1264_v9  ;;  %v1280_v58 = vmul.f32 1.442695, %v6148_v34  ;;  %v1288_v9 = vmul.f32 1.442695, %v6150_v38  ;;  %v1300_v38 = vmul.f32 1.442695, %v6153_v47 }
 0x346   : > { %v3239_v15 = vpop.eup %3238  ;;  %v1362_v40 = vadd.f32 %v4401_v18, %v1361_v24  ;;  %3258 = vpow2.f32 %v1268_v45  ;;  %v1383_v6 = vadd.f32 %v3237_v35, %v3235_v41  ;;  %v3003_v44 = vpack.c.bf16 %v3237_v35, %v3235_v41 }
 0x347   : > { %v3241_v12 = vpop.eup %3240  ;;  %3260 = vpow2.f32 %v1272_v29  ;;  %v1292_v34 = vmul.f32 1.442695, %v6151_v16  ;;  %v6152_v29 = vsub.f32 %v6120_v0, %v4206_v56  ;;  %v6154_v39 = vpack.c.bf16 %v4292_v23, %v4284_v31 }
 0x348   : > { %v3243_v49 = vpop.eup %3242  ;;  %v1363_v54 = vadd.f32 %v4406_v30, %v1362_v40  ;;  %3262 = vpow2.f32 %v1276_v32  ;;  %v1384_v52 = vadd.f32 %v3239_v15, %v1383_v6  ;;  %3004 = vmatprep.subr.bf16.mxu0 %v3003_v44  ;;  %v3007_v24 = vpack.c.bf16 %v3241_v12, %v3239_v15 }
 0x349   : > { %v3245_v45 = vpop.eup %3244  ;;  %3264 = vpow2.f32 %v1280_v58  ;;  %v1296_v41 = vmul.f32 1.442695, %v6152_v29  ;;  %3006 = vmatpush1.bf16.msra.mxu0 %v6154_v39  ;;  %v6155_v0 = vsub.f32 %v6122_v21, %v4206_v56 }
 0x34a   : > { %v3247_v35 = vpop.eup %3246  ;;  %v1364_v32 = vadd.f32 %v4412_v53, %v1363_v54  ;;  %3266 = vpow2.f32 %v1284_v25  ;;  %v1385_v40 = vadd.f32 %v3241_v12, %v1384_v52  ;;  %3008 = vmatprep.subr.bf16.mxu0 %v3007_v24  ;;  %v3011_v15 = vpack.c.bf16 %v3245_v45, %v3243_v49 }
 0x34b   : > { %v3249_v58 = vpop.eup %3248  ;;  %3268 = vpow2.f32 %v1288_v9  ;;  %v1304_v6 = vmul.f32 1.442695, %v6155_v0  ;;  %v6156_v25 = vpack.c.bf16 %v4308_v50, %v4300_v42  ;;  %v6158_v50 = vsub.f32 %v6124_v43, %v4206_v56 }
 0x34c   : > { %v3251_v44 = vpop.eup %3250  ;;  %v1365_v10 = vadd.f32 %v4420_v57, %v1364_v32  ;;  %3270 = vpow2.f32 %v1292_v34  ;;  %v1386_v16 = vadd.f32 %v3243_v49, %v1385_v40  ;;  %v3015_v31 = vpack.c.bf16 %v3249_v58, %v3247_v35 }
 0x34d   : > { %v3253_v23 = vpop.eup %3252  ;;  %3272 = vpow2.f32 %v1296_v41  ;;  %3010 = vmatpush1.bf16.msra.mxu0 %v6156_v25  ;;  %v6157_v49 = vsub.f32 %v6123_v48, %v4206_v56  ;;  %v1328_v39 = vmul.f32 1.442695, %v6158_v50  ;;  %v6160_v40 = vsub.f32 %v6125_v1, %v4206_v56 }
 0x34e   : > { %v3255_v12 = vpop.eup %3254  ;;  %v1366_v54 = vadd.f32 %v4429_v55, %v1365_v10  ;;  %3274 = vpow2.f32 %v1300_v38  ;;  %v1387_v9 = vadd.f32 %v3245_v45, %v1386_v16  ;;  %3012 = vmatprep.subr.bf16.mxu0 %v3011_v15  ;;  %v3019_v21 = vpack.c.bf16 %v3253_v23, %v3251_v44 }
 0x34f   : > { %v3257_v52 = vpop.eup %3256  ;;  %3276 = vpow2.f32 %v1304_v6  ;;  %v1324_v29 = vmul.f32 1.442695, %v6157_v49  ;;  %v6159_v45 = vpack.c.bf16 %v4323_v22, %v4316_v11  ;;  %v1332_v48 = vmul.f32 1.442695, %v6160_v40  ;;  %v6167_v40 = vld [vmem:[#allocation35_spill] sm:$0xff] }
 0x350   : > { %v3259_v24 = vpop.eup %3258  ;;  %v1367_v34 = vadd.f32 %v4440_v36, %v1366_v54  ;;  %v1388_v41 = vadd.f32 %v3247_v35, %v1387_v9  ;;  %v3023_v47 = vpack.c.bf16 %v3257_v52, %v3255_v12  ;;  %v6161_v43 = vsub.f32 %v6126_v28, %v4206_v56 }
 0x351   : > { %v3261_v42 = vpop.eup %3260  ;;  %3014 = vmatpush1.bf16.msra.mxu0 %v6159_v45  ;;  %v6162_v22 = vsub.f32 %v6127_v7, %v4206_v56  ;;  %3278 = vpow2.f32 %v1324_v29  ;;  %v6164_v28 = vpack.c.bf16 %v4337_v17, %v4331_v4  ;;  %v6165_v4 = vpack.c.bf16 %v4354_v2, %v4347_v13 }
 0x352   : > { %v4561_v38 = vpop.eup %3262  ;;  %v1368_v32 = vadd.f32 %v4449_v14, %v1367_v34  ;;  %v1389_v15 = vadd.f32 %v3249_v58, %v1388_v41  ;;  %3016 = vmatprep.subr.bf16.mxu0 %v3015_v31  ;;  %v3027_v35 = vpack.c.bf16 %v3261_v42, %v3259_v24  ;;  %v1336_v6 = vmul.f32 1.442695, %v6161_v43  ;;  %v6168_v43 = vld [vmem:[#allocation34_spill] sm:$0xff] }
 0x353   : > { %v3265_v0 = vpop.eup %3264  ;;  %v1340_v11 = vmul.f32 1.442695, %v6162_v22  ;;  %3280 = vpow2.f32 %v1328_v39  ;;  %v6163_v31 = vsub.f32 %v4200_v59, %v4206_v56  ;;  %v6169_v13 = vpack.c.bf16 %v4368_v19, %v4362_v8 }
 0x354   : > { %v4573_v10 = vpop.eup %3266  ;;  %v1369_v16 = vadd.f32 %v4457_v26, %v1368_v32  ;;  %v1390_v25 = vadd.f32 %v3251_v44, %v1389_v15  ;;  %v3031_v1 = vpack.c.bf16 %v3265_v0, %v4561_v38  ;;  %3282 = vpow2.f32 %v1332_v48 }
 0x355   : > { %v3269_v58 = vpop.eup %3268  ;;  %v1344_v54 = vmul.f32 1.442695, %v6163_v31  ;;  %3018 = vmatpush1.bf16.msra.mxu0 %v6164_v28  ;;  %3284 = vpow2.f32 %v1336_v6  ;;  %v1201_v48 = vsub.f32 %v6167_v40, %v4206_v56  ;;  %v1203_v6 = vsub.f32 %v6168_v43, %v4206_v56  ;;  %v4649_v43 = vld [vmem:[%s4634_s20] sm:$0xff] }
 0x356   : > { %v3271_v7 = vpop.eup %3270  ;;  %v1370_v9 = vadd.f32 %v4464_v62, %v1369_v16  ;;  %v1391_v34 = vadd.f32 %v3253_v23, %v1390_v25  ;;  %3020 = vmatprep.subr.bf16.mxu0 %v3019_v21  ;;  %v3035_v44 = vpack.c.bf16 %v3269_v58, %v4573_v10  ;;  %3286 = vpow2.f32 %v1340_v11  ;;  %v6166_v23 = vld [vmem:[#allocation33_spill] sm:$0xff]  ;;  %v6170_v16 = vld [vmem:[#allocation36_spill] sm:$0xff] }
 0x357   : > { %v3273_v49 = vpop.eup %3272  ;;  %3288 = vpow2.f32 %v1344_v54  ;;  %v1199_v21 = vsub.f32 %v6166_v23, %v4206_v56  ;;  %v1205_v25 = vsub.f32 %v6170_v16, %v4206_v56  ;;  %v1312_v31 = vmul.f32 1.442695, %v1201_v48 }
 0x358   : > { %v3275_v29 = vpop.eup %3274  ;;  %v1371_v41 = vadd.f32 %v4472_v33, %v1370_v9  ;;  %v1392_v59 = vadd.f32 %v3255_v12, %v1391_v34  ;;  %v3039_v50 = vpack.c.bf16 %v3273_v49, %v3271_v7  ;;  %v1316_v8 = vmul.f32 1.442695, %v1203_v6  ;;  %v4652_v6 = vld [vmem:[%s4634_s20 + $0x10] sm:$0xff] }
 0x359   : > { %v3277_v39 = vpop.eup %3276  ;;  %3022 = vmatpush1.bf16.msra.mxu0 %v6165_v4  ;;  %v1308_v11 = vmul.f32 1.442695, %v1199_v21  ;;  %v6171_v19 = vpack.c.bf16 %v4379_v63, %v4373_v61  ;;  %v1320_v4 = vmul.f32 1.442695, %v1205_v25  ;;  %v6172_v23 = vpack.c.bf16 %v4390_v3, %v4384_v5  ;;  %v4674_v25 = vld [vmem:[%s4634_s20 + $0x20] sm:$0xff] }
 0x35a   : > { %v1372_v17 = vadd.f32 %v4479_v37, %v1371_v41  ;;  %v1393_v45 = vadd.f32 %v3257_v52, %v1392_v59  ;;  %3024 = vmatprep.subr.bf16.mxu0 %v3023_v47  ;;  %v3043_v32 = vpack.c.bf16 %v3277_v39, %v3275_v29 }
 0x35b   : > { %v3279_v2 = vpop.eup %3278  ;;  %3290 = vpow2.f32 %v1308_v11  ;;  %v6181_v11 = vld [vmem:[#allocation5_spill] sm:$0xff] }
 0x35c   : > { %v1373_v12 = vadd.f32 %v4487_v27, %v1372_v17  ;;  %v1394_v15 = vadd.f32 %v3259_v24, %v1393_v45  ;;  %3292 = vpow2.f32 %v1312_v31  ;;  %v4677_v31 = vld [vmem:[%s4634_s20 + $0x30] sm:$0xff] }
 0x35d   : > { %3026 = vmatpush1.bf16.msra.mxu0 %v6169_v13  ;;  %v3281_v47 = vpop.eup %3280  ;;  %3294 = vpow2.f32 %v1316_v8  ;;  %v4659_v13 = vld [vmem:[%s4634_s20 + $0x28] sm:$0xff] }
 0x35e   : > { %v1374_v22 = vadd.f32 %v4495_v46, %v1373_v12  ;;  %v1395_v52 = vadd.f32 %v3261_v42, %v1394_v15  ;;  %3028 = vmatprep.subr.bf16.mxu0 %v3027_v35  ;;  %v3283_v54 = vpop.eup %3282  ;;  %v3055_v9 = vpack.c.bf16 %v3281_v47, %v3279_v2  ;;  %3296 = vpow2.f32 %v1320_v4  ;;  %v4699_v4 = vld [vmem:[%s4634_s20 + $0x68] sm:$0xff] }
 0x35f   : > { %v3285_v34 = vpop.eup %3284  ;;  %v6179_v15 = vpack.c.bf16 %v4495_v46, %v4487_v27  ;;  %v6180_v46 = vpack.c.bf16 %v4508_v20, %v4500_v60  ;;  %v3069_v27 = vpack.c.bf16 %v4652_v6, %v4649_v43 }
 0x360   : > { %v1375_v24 = vadd.f32 %v4500_v60, %v1374_v22  ;;  %v1396_v28 = vadd.f32 %v4561_v38, %v1395_v52  ;;  %v3287_v41 = vpop.eup %3286  ;;  %v3059_v56 = vpack.c.bf16 %v3285_v34, %v3283_v54  ;;  %v6182_v52 = vld [vmem:[#allocation6_spill] sm:$0xff] }
 0x361   : > { %3030 = vmatpush1.bf16.msra.mxu0 %v6171_v19  ;;  %v3289_v59 = vpop.eup %3288 }
 0x362   : > { %v4609_v42 = vadd.f32 %v4508_v20, %v1375_v24  ;;  %v1397_v35 = vadd.f32 %v3265_v0, %v1396_v28  ;;  %3032 = vmatprep.subr.bf16.mxu0 %v3031_v1  ;;  %v3063_v17 = vpack.c.bf16 %v3289_v59, %v3287_v41  ;;  %v6173_v0 = vpack.c.bf16 %v4401_v18, %v4395_v51  ;;  %v4681_v20 = vld [vmem:[%s4634_s20 + $0x48] sm:$0xff]  ;;  %v4684_v24 = vld [vmem:[%s4634_s20 + $0x58] sm:$0xff] }
 0x363   : > { %v6175_v51 = vpack.c.bf16 %v4429_v55, %v4420_v57  ;;  %v6178_v55 = vpack.c.bf16 %v4479_v37, %v4472_v33  ;;  %v3073_v28 = vpack.c.bf16 %v4677_v31, %v4674_v25  ;;  %v3075_v19 = vpack.c.bf16 %v4684_v24, %v4681_v20 }
 0x364   : > { %v1398_v38 = vadd.f32 %v4573_v10, %v1397_v35  ;;  %v6174_v10 = vpack.c.bf16 %v4412_v53, %v4406_v30  ;;  %v464_v53 = vpop.permute.xlu0 %463  ;;  %v4695_v35 = vld [vmem:[%s4634_s20 + $0x50] sm:$0xff] }
 0x365   : > { %3034 = vmatpush1.bf16.msra.mxu0 %v6172_v23  ;;  %v3291_v21 = vpop.eup %3290  ;;  %v6186_v23 = vld [vmem:[#allocation9_spill] sm:$0xff] }
 0x366   : > { %v1399_v61 = vadd.f32 %v3269_v58, %v1398_v38  ;;  %3036 = vmatprep.subr.bf16.mxu0 %v3035_v44  ;;  %v3293_v40 = vpop.eup %3292  ;;  %v4702_v38 = vld [vmem:[%s4634_s20 + $0x78] sm:$0xff] }
 0x367   : > { %v3295_v3 = vpop.eup %3294  ;;  %v3047_v44 = vpack.c.bf16 %v3293_v40, %v3291_v21 }
 0x368   : > { %v1400_v63 = vadd.f32 %v3271_v7, %v1399_v61  ;;  %v3297_v7 = vpop.eup %3296 }
 0x369   : > { %3038 = vmatpush1.bf16.msra.mxu0 %v6173_v0  ;;  %v4710_v0 = vld [vmem:[%s4634_s20 + $0x60] sm:$0xff] }
 0x36a   : > { %v1401_v1 = vadd.f32 %v3273_v49, %v1400_v63  ;;  %3040 = vmatprep.subr.bf16.mxu0 %v3039_v50  ;;  %v6176_v50 = vpack.c.bf16 %v4449_v14, %v4440_v36  ;;  %v469_v36 = vpop.permute.xlu0 %468  ;;  %v3079_v63 = vpack.c.bf16 %v4702_v38, %v4699_v4 }
 0x36b   : > { %v616_v61 = vadd.f32 %v6186_v23, %v469_v36 }
 0x36c   : > { %v1402_v45 = vadd.f32 %v3275_v29, %v1401_v1  ;;  %v3051_v29 = vpack.c.bf16 %v3297_v7, %v3295_v3  ;;  %v4713_v1 = vld [vmem:[%s4634_s20 + $0x70] sm:$0xff] }
 0x36d   : > { %3042 = vmatpush1.bf16.msra.mxu0 %v6174_v10  ;;  %v3081_v10 = vpack.c.bf16 %v4713_v1, %v4710_v0 }
 0x36e   : > { %v1403_v5 = vadd.f32 %v3277_v39, %v1402_v45  ;;  %3044 = vmatprep.subr.bf16.mxu0 %v3043_v32  ;;  %v6177_v32 = vpack.c.bf16 %v4464_v62, %v4457_v26  ;;  %v4640_v26 = vld [vmem:[%s4634_s20 + $0x8] sm:$0xff]  ;;  %v4643_v62 = vld [vmem:[%s4634_s20 + $0x18] sm:$0xff]  ;;  %v474_v22 = vpop.permute.xlu0 %473 }
 0x36f   : > { %v3067_v33 = vpack.c.bf16 %v4643_v62, %v4640_v26 }
 0x370   : > { %v1404_v58 = vadd.f32 %v3291_v21, %v1403_v5  ;;  %v6187_v21 = vld [vmem:[#allocation12_spill] sm:$0xff]  ;;  %v6188_v5 = vld [vmem:[#allocation11_spill] sm:$0xff] }
 0x371   : > { %3046 = vmatpush1.bf16.msra.mxu0 %v6175_v51  ;;  %v624_v45 = vadd.f32 %v6187_v21, %v474_v22 }
 0x372   : > { %v1405_v18 = vadd.f32 %v3293_v40, %v1404_v58  ;;  %3048 = vmatprep.subr.bf16.mxu0 %v3047_v44  ;;  %v479_v8 = vpop.permute.xlu0 %478  ;;  %v6189_v58 = vld [vmem:[#allocation14_spill] sm:$0xff] }
 0x373   : > { %v630_v44 = vadd.f32 %v6189_v58, %v479_v8 }
 0x374   : > { %v1406_v49 = vadd.f32 %v3295_v3, %v1405_v18  ;;  %v622_v3 = vadd.f32 %v6188_v5, %v474_v22  ;;  %v1552_v22 = vld [vmem:[%s5989_s5 + $0x8] sm:$0xff] }
 0x375   : > { %3050 = vmatpush1.bf16.msra.mxu0 %v6176_v50  ;;  %v6192_v50 = vld [vmem:[#allocation15_spill] sm:$0xff] }
 0x376   : > { %v1407_v30 = vadd.f32 %v3297_v7, %v1406_v49  ;;  %3052 = vmatprep.subr.bf16.mxu0 %v3051_v29  ;;  %v484_v40 = vpop.permute.xlu0 %483  ;;  %v6190_v7 = vld [vmem:[#allocation13_spill] sm:$0xff]  ;;  %v6191_v49 = vld [vmem:[#allocation16_spill] sm:$0xff] }
 0x377   : > { %v628_v51 = vadd.f32 %v6190_v7, %v479_v8  ;;  %v636_v29 = vadd.f32 %v6191_v49, %v484_v40  ;;  %v3439_v7 = vld [vmem:[%s3623_s18 + $0x78] sm:$0xff] }
 0x378   : > { %v1408_v39 = vadd.f32 %v3279_v2, %v1407_v30  ;;  %v4662_v2 = vld [vmem:[%s4634_s20 + $0x38] sm:$0xff]  ;;  %v634_v30 = vadd.f32 %v6192_v50, %v484_v40 }
 0x379   : > { %3054 = vmatpush1.bf16.msra.mxu0 %v6177_v32  ;;  %v3071_v16 = vpack.c.bf16 %v4662_v2, %v4659_v13  ;;  %v3437_v40 = vld [vmem:[%s3623_s18 + $0x58] sm:$0xff] }
 0x37a   : > { %v1409_v48 = vadd.f32 %v3281_v47, %v1408_v39  ;;  %3056 = vmatprep.subr.bf16.mxu0 %v3055_v9  ;;  %v604_v47 = vadd.f32 %v6182_v52, %v6181_v11  ;;  %v6184_v9 = vld [vmem:[#allocation7_spill] sm:$0xff]  ;;  %v489_v18 = vpop.permute.xlu0 %488  ;;  %v1555_v11 = vld [vmem:[%s5989_s5 + $0x20] sm:$0xff]  ;;  %v1556_v52 = vld [vmem:[%s5989_s5 + $0x28] sm:$0xff] }
 0x37c   : > { %v1410_v57 = vadd.f32 %v3283_v54, %v1409_v48  ;;  %v6183_v54 = vld [vmem:[#allocation8_spill] sm:$0xff]  ;;  %v6194_v48 = vld [vmem:[#allocation17_spill] sm:$0xff] }
 0x37d   : > { %3058 = vmatpush1.bf16.msra.mxu0 %v6178_v55  ;;  %v612_v60 = vadd.f32 %v6183_v54, %v464_v53  ;;  %v6195_v55 = vld [vmem:[#allocation20_spill] sm:$0xff]  ;;  %v1559_v54 = vld [vmem:[%s5989_s5 + $0x40] sm:$0xff] }
 0x37e   : > { %v1411_v14 = vadd.f32 %v3285_v34, %v1410_v57  ;;  %3060 = vmatprep.subr.bf16.mxu0 %v3059_v56  ;;  %v610_v34 = vadd.f32 %v6184_v9, %v464_v53  ;;  %v6185_v56 = vld [vmem:[#allocation10_spill] sm:$0xff]  ;;  %v494_v32 = vpop.permute.xlu0 %493  ;;  %v640_v57 = vadd.f32 %v6194_v48, %v489_v18  ;;  %v4785_v9 = vstv %s4779_s23 }
 0x37f   : > { %v6193_v53 = vld [vmem:[#allocation18_spill] sm:$0xff]  ;;  %v2696_v21 = vmul.f32 %v4785_v9, %v4681_v20  ;;  %v2700_v58 = vmul.f32 %v4785_v9, %v4699_v4 }
 0x380   : > { %v1412_v12 = vadd.f32 %v3287_v41, %v1411_v14  ;;  %v4692_v41 = vld [vmem:[%s4634_s20 + $0x40] sm:$0xff]  ;;  %v642_v39 = vadd.f32 %v6193_v53, %v489_v18  ;;  %v6196_v14 = vld [vmem:[#allocation19_spill] sm:$0xff] }
 0x381   : > { %3062 = vmatpush1.bf16.msra.mxu0 %v6179_v15  ;;  %v6197_v15 = vmov 0.0  }
 0x382   : > { %v4654_v37 = vadd.f32 %v3289_v59, %v1412_v12  ;;  %3064 = vmatprep.subr.bf16.mxu0 %v3063_v17  ;;  %v618_v59 = vadd.f32 %v6185_v56, %v469_v36  ;;  %v3077_v17 = vpack.c.bf16 %v4695_v35, %v4692_v41  ;;  %v648_v36 = vadd.f32 %v6195_v55, %v494_v32  ;;  %v3435_v56 = vld [vmem:[%s3623_s18 + $0x38] sm:$0xff] }
 0x383   : > { %v646_v12 = vadd.f32 %v6196_v14, %v494_v32  ;;  %v3441_v14 = vld [vmem:[%s3623_s18 + $0x8] sm:$0xff] }
 0x385   : > { %3066 = vmatpush1.bf16.msra.mxu0 %v6180_v46  ;;  %v1553_v46 = vld [vmem:[%s5989_s5 + $0x10] sm:$0xff] }
 0x386   : > { %3068 = vmatprep.subr.bf16.mxu0 %v3067_v33  ;;  %v1551_v33 = vld [vmem:[%s5989_s5] sm:$0xff] }
 0x388   : > { %1487 = vmatmul.mubr.f32.vlgmr.msra.gmra.mrb[20].mxu0 %v604_v47  ;;  %v1557_v47 = vld [vmem:[%s5989_s5 + $0x30] sm:$0xff] }
 0x389   : > { %1492 = vmatprep.mubr.f32.mxu0 %v612_v60  ;;  %3070 = vmatpush1.bf16.msra.mxu0 %v3069_v27  ;;  %v1554_v27 = vld [vmem:[%s5989_s5 + $0x18] sm:$0xff]  ;;  %v1560_v60 = vld [vmem:[%s5989_s5 + $0x48] sm:$0xff] }
 0x38a   : > { %3072 = vmatprep.subr.bf16.mxu0 %v3071_v16  ;;  %v1558_v16 = vld [vmem:[%s5989_s5 + $0x38] sm:$0xff] }
 0x38c   : > { %1493 = vmatmul.mubr.f32.gmra.mrb[22].mxu0 %v610_v34  ;;  %v3434_v34 = vld [vmem:[%s3623_s18 + $0x28] sm:$0xff] }
 0x38d   : > { %1498 = vmatprep.mubr.f32.mxu0 %v618_v59  ;;  %3074 = vmatpush1.bf16.msra.mxu0 %v3073_v28  ;;  %v4782_v28 = vstv %s2668_s24 }
 0x38e   : > { %3076 = vmatprep.subr.bf16.mxu0 %v3075_v19  ;;  %v2675_v8 = vmul.f32 %v3434_v34, %v4782_v28  ;;  %v2692_v19 = vmul.f32 %v4785_v9, %v4659_v13  ;;  %v2677_v59 = vmul.f32 %v3435_v56, %v4782_v28  ;;  %v2681_v13 = vmul.f32 %v3437_v40, %v4782_v28  ;;  %v3443_v34 = vld [vmem:[%s3623_s18 + $0x18] sm:$0xff] }
 0x38f   : > { %v2685_v20 = vmul.f32 %v3439_v7, %v4782_v28 }
 0x390   : > { %1499 = vmatmul.mubr.f32.gmra.mrb[24].mxu0 %v616_v61  ;;  %v4795_v23 = vadd.f32 %v2692_v19, %v2675_v8  ;;  %v3436_v61 = vld [vmem:[%s3623_s18 + $0x48] sm:$0xff]  ;;  %v2690_v8 = vmul.f32 %v4785_v9, %v4643_v62  ;;  %v2691_v62 = vmul.f32 %v4785_v9, %v4674_v25 }
 0x391   : > { %1504 = vmatprep.mubr.f32.mxu0 %v624_v45  ;;  %3078 = vmatpush1.bf16.msra.mxu0 %v3077_v17  ;;  %v2694_v17 = vmul.f32 %v4785_v9, %v4662_v2 }
 0x392   : > { %3080 = vmatprep.subr.bf16.mxu0 %v3079_v63  ;;  %v2679_v63 = vmul.f32 %v3436_v61, %v4782_v28 }
 0x393   : > { %v4801_v45 = vadd.f32 %v2694_v17, %v2677_v59 }
 0x394   : > { %1505 = vmatmul.mubr.f32.gmra.mrb[26].mxu0 %v622_v3  ;;  %v4807_v5 = vadd.f32 %v2696_v21, %v2679_v63  ;;  %v3438_v3 = vld [vmem:[%s3623_s18 + $0x68] sm:$0xff]  ;;  %v3444_v63 = vld [vmem:[%s3623_s18 + $0x20] sm:$0xff] }
 0x395   : > { %1510 = vmatprep.mubr.f32.mxu0 %v630_v44  ;;  %3082 = vmatpush1.bf16.msra.mxu0 %v3081_v10  ;;  %v2698_v10 = vmul.f32 %v4785_v9, %v4684_v24  ;;  %v2683_v2 = vmul.f32 %v3438_v3, %v4782_v28  ;;  %v1377_v24 = vrot.slane %v4609_v42, 4  ;;  %v2674_v21 = vmul.f32 %v3444_v63, %v4782_v28 }
 0x397   : > { %v4813_v44 = vadd.f32 %v2698_v10, %v2681_v13  ;;  %v4819_v18 = vadd.f32 %v2700_v58, %v2683_v2  ;;  %v1378_v4 = vadd.f32 %v1377_v24, %v4609_v42 }
 0x398   : > { %1511 = vmatmul.mubr.f32.gmra.mrb[28].mxu0 %v628_v51  ;;  %v2702_v51 = vmul.f32 %v4785_v9, %v4702_v38 }
 0x399   : > { %1516 = vmatprep.mubr.f32.mxu0 %v636_v29  ;;  %v1414_v29 = vrot.slane %v4654_v37, 4 }
 0x39a   : > { %v4821_v49 = vadd.f32 %v2702_v51, %v2685_v20  ;;  %v3445_v20 = vld [vmem:[%s3623_s18 + $0x30] sm:$0xff] }
 0x39b   : > { %v1415_v50 = vadd.f32 %v1414_v29, %v4654_v37  ;;  %v2687_v37 = vmul.f32 %v4785_v9, %v4649_v43  ;;  %v2676_v51 = vmul.f32 %v3445_v20, %v4782_v28 }
 0x39c   : > { %1517 = vmatmul.mubr.f32.gmra.mrb[30].mxu0 %v634_v30  ;;  %v1379_v30 = vrot.slane %v1378_v4, 2 }
 0x39d   : > { %1522 = vmatprep.mubr.f32.mxu0 %v642_v39  ;;  %v1416_v53 = vrot.slane %v1415_v50, 2 }
 0x39e   : > { %v1380_v39 = vadd.f32 %v1379_v30, %v1378_v4  ;;  %v2707_v30 = vadd.f32 %v2691_v62, %v2674_v21 }
 0x39f   : > { %v1417_v32 = vadd.f32 %v1416_v53, %v1415_v50  ;;  %v2693_v53 = vmul.f32 %v4785_v9, %v4677_v31  ;;  %v2695_v31 = vmul.f32 %v4785_v9, %v4692_v41 }
 0x3a0   : > { %1523 = vmatmul.mubr.f32.gmra.mrb[32].mxu0 %v640_v57  ;;  %v1381_v38 = vrot.slane %v1380_v39, 1 }
 0x3a1   : > { %1528 = vmatprep.mubr.f32.mxu0 %v648_v36  ;;  %v1418_v48 = vrot.slane %v1417_v32, 1  ;;  %v3440_v36 = vld [vmem:[%s3623_s18] sm:$0xff] }
 0x3a2   : > { %v1382_v57 = vadd.f32 %v1381_v38, %v1380_v39  ;;  %v2670_v42 = vmul.f32 %v3440_v36, %v4782_v28 }
 0x3a3   : > { %v1419_v55 = vadd.f32 %v1418_v48, %v1417_v32  ;;  %v3446_v48 = vld [vmem:[%s3623_s18 + $0x40] sm:$0xff] }
 0x3a4   : > { %1529 = vmatmul.mubr.f32.gmra.mrb[34].mxu0 %v646_v12  ;;  %3298 = vrcp.f32 %v1382_v57  ;;  %v2671_v12 = vmul.f32 %v3441_v14, %v4782_v28  ;;  %v2703_v43 = vadd.f32 %v2687_v37, %v2670_v42  ;;  %v2678_v57 = vmul.f32 %v3446_v48, %v4782_v28 }
 0x3a5   : > { %1715 = vmatprep.mubr.f32.mxu0 %v6197_v15  ;;  %3300 = vrcp.f32 %v1419_v55  ;;  %v2709_v14 = vadd.f32 %v2693_v53, %v2676_v51 }
 0x3a8   : > { %2937 = vmatmul.mubr.msk.f32.vlgmr.msra.gmra.mrb[36].mxu0 %vm506_vm0, %v1551_v33  ;;  %v2688_v33 = vmul.f32 %v4785_v9, %v4640_v26  ;;  %v2673_v26 = vmul.f32 %v3443_v34, %v4782_v28 }
 0x3a9   : > { %1721 = vmatprep.mubr.f32.mxu0 %v6197_v15 }
 0x3aa   : > { %v2704_v19 = vadd.f32 %v2688_v33, %v2671_v12  ;;  %v2706_v3 = vadd.f32 %v2690_v8, %v2673_v26  ;;  %v2711_v26 = vadd.f32 %v2695_v31, %v2678_v57 }
 0x3ac   : > { %2938 = vmatmul.mubr.msk.f32.gmra.mrb[38].mxu0 %vm506_vm0, %v1552_v22 }
 0x3ad   : > { %1727 = vmatprep.mubr.f32.mxu0 %v6197_v15 }
 0x3ae   : > { %v4836_v22 = vpop.eup %3298 }
 0x3b0   : > { %2939 = vmatmul.mubr.msk.f32.gmra.mrb[40].mxu0 %vm506_vm0, %v1553_v46  ;;  %v3442_v46 = vld [vmem:[%s3623_s18 + $0x10] sm:$0xff] }
 0x3b1   : > { %1733 = vmatprep.mubr.f32.mxu0 %v6197_v15 }
 0x3b4   : > { %2940 = vmatmul.mubr.msk.f32.gmra.mrb[42].mxu0 %vm506_vm0, %v1554_v27  ;;  %v2672_v27 = vmul.f32 %v3442_v46, %v4782_v28 }
 0x3b5   : > { %1739 = vmatprep.mubr.f32.mxu0 %v6197_v15 }
 0x3b8   : > { %2941 = vmatmul.mubr.msk.f32.gmra.mrb[44].mxu0 %vm506_vm0, %v1555_v11  ;;  %v2689_v11 = vmul.f32 %v4785_v9, %v4652_v6 }
 0x3b9   : > { %1745 = vmatprep.mubr.f32.mxu0 %v6197_v15 }
 0x3ba   : > { %v2705_v59 = vadd.f32 %v2689_v11, %v2672_v27  ;;  %v3447_v11 = vld [vmem:[%s3623_s18 + $0x50] sm:$0xff] }
 0x3bc   : > { %2942 = vmatmul.mubr.msk.f32.gmra.mrb[46].mxu0 %vm506_vm0, %v1556_v52 }
 0x3bd   : > { %1751 = vmatprep.mubr.f32.mxu0 %v6197_v15 }
 0x3c0   : > { %2943 = vmatmul.mubr.msk.f32.gmra.mrb[48].mxu0 %vm506_vm0, %v1557_v47  ;;  %v4842_v47 = vstv %s2719_s26 }
 0x3c1   : > { %1757 = vmatprep.mubr.f32.mxu0 %v6197_v15 }
 0x3c4   : > { %2944 = vmatmul.mubr.msk.f32.gmra.mrb[50].mxu0 %vm506_vm0, %v1558_v16  ;;  %v4844_v16 = vpop.eup %3300 }
 0x3c5   : > { %1763 = vmatprep.mubr.f32.mxu0 %v6197_v15 }
 0x3c8   : > { %2945 = vmatmul.mubr.msk.f32.gmra.mrb[52].mxu0 %vm506_vm0, %v1559_v54 }
 0x3c9   : > { %1769 = vmatprep.mubr.f32.mxu0 %v6197_v15 }
 0x3cc   : > { %2946 = vmatmul.mubr.msk.f32.gmra.mrb[54].mxu0 %vm506_vm0, %v1560_v60 }
 0x45b   : > { %v1488_v52 = vpop.f32.mrb[20].mxu0 }
 0x45c   : > { %v1535_v54 = vmul.f32 %v4836_v22, %v1488_v52  ;;  %v1490_v60 = vpop.f32.mrb[21].mxu0  ;;  %v2680_v52 = vmul.f32 %v3447_v11, %v4782_v28 }
 0x45d   : > { %v1536_v6 = vmul.f32 %v4844_v16, %v1490_v60 }
 0x45e   : > { %v2721_v56 = vmul.f32 %v4842_v47, %v1535_v54 }
 0x45f   : > { %v2722_v17 = vmul.f32 %v4842_v47, %v1536_v6  ;;  %v1494_v61 = vpop.f32.mrb[22].mxu0 }
 0x460   : > { %v4856_v40 = vadd.f32 %v2721_v56, %v2703_v43  ;;  %v1537_v13 = vmul.f32 %v4836_v22, %v1494_v61  ;;  %v1496_v10 = vpop.f32.mrb[23].mxu0  ;;  %v3448_v56 = vld [vmem:[%s3623_s18 + $0x60] sm:$0xff] }
 0x461   : > { %v4861_v2 = vadd.f32 %v2722_v17, %v2704_v19  ;;  %v1538_v58 = vmul.f32 %v4844_v16, %v1496_v10 }
 0x462   : > { %6198 = vst [vmem:[#allocation21_spill] sm:$0xff] %v4856_v40  ;;  %v2723_v7 = vmul.f32 %v4842_v47, %v1537_v13 }
 0x463   : > { %6199 = vst [vmem:[#allocation22_spill] sm:$0xff] %v4861_v2  ;;  %v2724_v24 = vmul.f32 %v4842_v47, %v1538_v58  ;;  %v1500_v29 = vpop.f32.mrb[24].mxu0  ;;  %v3449_v58 = vld [vmem:[%s3623_s18 + $0x70] sm:$0xff] }
 0x464   : > { %v4868_v4 = vadd.f32 %v2723_v7, %v2705_v59  ;;  %v1539_v50 = vmul.f32 %v4836_v22, %v1500_v29  ;;  %v1502_v25 = vpop.f32.mrb[25].mxu0  ;;  %v2682_v59 = vmul.f32 %v3448_v56, %v4782_v28  ;;  %v2684_v7 = vmul.f32 %v3449_v58, %v4782_v28  ;;  %v1563_v58 = vld [vmem:[%s5990_s6 + $0x10] sm:$0xff] }
 0x465   : > { %v4873_v39 = vadd.f32 %v2724_v24, %v2706_v3  ;;  %v1540_v32 = vmul.f32 %v4844_v16, %v1502_v25 }
 0x466   : > { %6200 = vst [vmem:[#allocation23_spill] sm:$0xff] %v4868_v4  ;;  %v2725_v38 = vmul.f32 %v4842_v47, %v1539_v50 }
 0x467   : > { %6201 = vst [vmem:[#allocation24_spill] sm:$0xff] %v4873_v39  ;;  %v2726_v55 = vmul.f32 %v4842_v47, %v1540_v32  ;;  %v1506_v36 = vpop.f32.mrb[26].mxu0 }
 0x468   : > { %v4880_v42 = vadd.f32 %v2725_v38, %v2707_v30  ;;  %v1541_v37 = vmul.f32 %v4836_v22, %v1506_v36  ;;  %v1508_v12 = vpop.f32.mrb[27].mxu0 }
 0x469   : > { %v4886_v33 = vadd.f32 %v2726_v55, %v4795_v23  ;;  %v1542_v46 = vmul.f32 %v4844_v16, %v1508_v12  ;;  %v2697_v23 = vmul.f32 %v4785_v9, %v4695_v35 }
 0x46a   : > { %6202 = vst [vmem:[#allocation25_spill] sm:$0xff] %v4880_v42  ;;  %v2727_v27 = vmul.f32 %v4842_v47, %v1541_v37 }
 0x46b   : > { %6203 = vst [vmem:[#allocation26_spill] sm:$0xff] %v4886_v33  ;;  %v2728_v43 = vmul.f32 %v4842_v47, %v1542_v46  ;;  %v1512_v54 = vpop.f32.mrb[28].mxu0  ;;  %v2713_v13 = vadd.f32 %v2697_v23, %v2680_v52 }
 0x46c   : > { %v4893_v60 = vadd.f32 %v2727_v27, %v2709_v14  ;;  %v1543_v34 = vmul.f32 %v4836_v22, %v1512_v54  ;;  %v1514_v41 = vpop.f32.mrb[29].mxu0 }
 0x46d   : > { %v4899_v8 = vadd.f32 %v2728_v43, %v4801_v45  ;;  %v1544_v19 = vmul.f32 %v4844_v16, %v1514_v41  ;;  %v2699_v45 = vmul.f32 %v4785_v9, %v4710_v0  ;;  %v2701_v0 = vmul.f32 %v4785_v9, %v4713_v1 }
 0x46e   : > { %6204 = vst [vmem:[#allocation27_spill] sm:$0xff] %v4893_v60  ;;  %v2729_v6 = vmul.f32 %v4842_v47, %v1543_v34 }
 0x46f   : > { %6205 = vst [vmem:[#allocation28_spill] sm:$0xff] %v4899_v8  ;;  %v2730_v17 = vmul.f32 %v4842_v47, %v1544_v19  ;;  %v1518_v61 = vpop.f32.mrb[30].mxu0  ;;  %v2715_v50 = vadd.f32 %v2699_v45, %v2682_v59  ;;  %v2717_v57 = vadd.f32 %v2701_v0, %v2684_v7  ;;  %v6228_v45 = vmov 0   ;;  %v1564_v7 = vld [vmem:[%s5990_s6 + $0x18] sm:$0xff] }
 0x470   : > { %v4906_v63 = vadd.f32 %v2729_v6, %v2711_v26  ;;  %v1545_v21 = vmul.f32 %v4836_v22, %v1518_v61  ;;  %v1520_v35 = vpop.f32.mrb[31].mxu0  ;;  %v1619_v26 = vpop.permute.xlu0 %1618 }
 0x471   : > { %v4912_v10 = vadd.f32 %v2730_v17, %v4807_v5  ;;  %v1546_v62 = vmul.f32 %v4844_v16, %v1520_v35 }
 0x472   : > { %6206 = vst [vmem:[#allocation29_spill] sm:$0xff] %v4906_v63  ;;  %v2731_v3 = vmul.f32 %v4842_v47, %v1545_v21 }
 0x473   : > { %6207 = vst [vmem:[#allocation30_spill] sm:$0xff] %v4912_v10  ;;  %v2732_v20 = vmul.f32 %v4842_v47, %v1546_v62  ;;  %v1524_v51 = vpop.f32.mrb[32].mxu0  ;;  %v1562_v62 = vld [vmem:[%s5990_s6 + $0x8] sm:$0xff] }
 0x474   : > { %v4919_v24 = vadd.f32 %v2731_v3, %v2713_v13  ;;  %v1547_v29 = vmul.f32 %v4836_v22, %v1524_v51  ;;  %v1526_v30 = vpop.f32.mrb[33].mxu0  ;;  %v1614_v6 = vpop.permute.xlu0 %1613  ;;  %v1561_v3 = vld [vmem:[%s5990_s6] sm:$0xff]  ;;  %v1566_v51 = vld [vmem:[%s5990_s6 + $0x28] sm:$0xff] }
 0x475   : > { %v4925_v5 = vadd.f32 %v2732_v20, %v4813_v44  ;;  %v1548_v25 = vmul.f32 %v4844_v16, %v1526_v30  ;;  %v1565_v20 = vld [vmem:[%s5990_s6 + $0x20] sm:$0xff] }
 0x476   : > { %6208 = vst [vmem:[#allocation31_spill] sm:$0xff] %v4919_v24  ;;  %v2733_v53 = vmul.f32 %v4842_v47, %v1547_v29  ;;  %v1567_v29 = vld [vmem:[%s5990_s6 + $0x30] sm:$0xff] }
 0x477   : > { %6209 = vst [vmem:[#allocation32_spill] sm:$0xff] %v4925_v5  ;;  %v2734_v28 = vmul.f32 %v4842_v47, %v1548_v25  ;;  %v1530_v32 = vpop.f32.mrb[34].mxu0 }
 0x478   : > { %v4930_v38 = vadd.f32 %v2733_v53, %v2715_v50  ;;  %v1549_v48 = vmul.f32 %v4836_v22, %v1530_v32  ;;  %v1532_v55 = vpop.f32.mrb[35].mxu0  ;;  %v1568_v50 = vld [vmem:[%s5990_s6 + $0x38] sm:$0xff] }
 0x479   : > { %v4934_v36 = vadd.f32 %v2734_v28, %v4819_v18  ;;  %v1550_v1 = vmul.f32 %v4844_v16, %v1532_v55 }
 0x47a   : > { %6210 = vst [vmem:[#allocation37_spill] sm:$0xff] %v4930_v38  ;;  %v2735_v9 = vmul.f32 %v4842_v47, %v1549_v48 }
 0x47b   : > { %6211 = vst [vmem:[#allocation38_spill] sm:$0xff] %v4934_v36  ;;  %v2736_v44 = vmul.f32 %v4842_v47, %v1550_v1  ;;  %v4939_v37 = vpop.f32.mrb[36].mxu0 }
 0x47c   : > { %v4941_v14 = vadd.f32 %v2735_v9, %v2717_v57  ;;  %v4943_v12 = vpop.f32.mrb[37].mxu0 }
 0x47d   : > { %v4946_v31 = vadd.f32 %v2736_v44, %v4821_v49 }
 0x47e   : > { %6212 = vst [vmem:[#allocation39_spill] sm:$0xff] %v4941_v14 }
 0x47f   : > { %6213 = vst [vmem:[#allocation40_spill] sm:$0xff] %v4946_v31  ;;  %v4948_v22 = vpop.f32.mrb[38].mxu0 }
 0x480   : > { %6214 = vst [vmem:[#allocation41_spill] sm:$0xff] %v4948_v22  ;;  %v4950_v46 = vpop.f32.mrb[39].mxu0 }
 0x481   : > { %6215 = vst [vmem:[#allocation33_spill] sm:$0xff] %v4950_v46 }
 0x483   : > { %v4952_v18 = vpop.f32.mrb[40].mxu0 }
 0x484   : > { %6216 = vst [vmem:[#allocation35_spill] sm:$0xff] %v4952_v18  ;;  %v4954_v16 = vpop.f32.mrb[41].mxu0  ;;  %v3496_v18 = vld [vmem:[%s5986_s2 + $0x180] sm:$0xff] }
 0x485   : > { %6217 = vst [vmem:[#allocation34_spill] sm:$0xff] %v4954_v16  ;;  %v3497_v16 = vld [vmem:[%s5986_s2 + $0x168] sm:$0xff] }
 0x487   : > { %v4956_v27 = vpop.f32.mrb[42].mxu0 }
 0x488   : > { %6218 = vst [vmem:[#allocation36_spill] sm:$0xff] %v4956_v27  ;;  %v4958_v47 = vpop.f32.mrb[43].mxu0 }
 0x489   : > { %6219 = vst [vmem:[#allocation5_spill] sm:$0xff] %v4958_v47 }
 0x48b   : > { %v4960_v11 = vpop.f32.mrb[44].mxu0 }
 0x48c   : > { %6220 = vst [vmem:[#allocation6_spill] sm:$0xff] %v4960_v11  ;;  %v4962_v52 = vpop.f32.mrb[45].mxu0 }
 0x48d   : > { %6221 = vst [vmem:[#allocation8_spill] sm:$0xff] %v4962_v52 }
 0x48f   : > { %v4964_v43 = vpop.f32.mrb[46].mxu0 }
 0x490   : > { %6222 = vst [vmem:[#allocation7_spill] sm:$0xff] %v4964_v43  ;;  %v4966_v49 = vpop.f32.mrb[47].mxu0 }
 0x491   : > { %6223 = vst [vmem:[#allocation10_spill] sm:$0xff] %v4966_v49 }
 0x493   : > { %v4968_v54 = vpop.f32.mrb[48].mxu0 }
 0x494   : > { %6224 = vst [vmem:[#allocation9_spill] sm:$0xff] %v4968_v54  ;;  %v4970_v34 = vpop.f32.mrb[49].mxu0 }
 0x495   : > { %6225 = vst [vmem:[#allocation12_spill] sm:$0xff] %v4970_v34  ;;  %v3490_v34 = vld [vmem:[%s5986_s2 + $0x148] sm:$0xff] }
 0x497   : > { %v4972_v41 = vpop.f32.mrb[50].mxu0 }
 0x498   : > { %6226 = vst [vmem:[#allocation11_spill] sm:$0xff] %v4972_v41  ;;  %v4974_v23 = vpop.f32.mrb[51].mxu0 }
 0x499   : > { %6227 = vst [vmem:[#allocation14_spill] sm:$0xff] %v4974_v23 }
 0x49b   : > { %v1765_v19 = vpop.f32.mrb[52].mxu0 }
 0x49c   : > { %v1767_v56 = vpop.f32.mrb[53].mxu0  ;;  %v1766_v17 = vadd.f32 %v1765_v19, %v1614_v6 }
 0x49d   : > { %v1768_v59 = vadd.f32 %v1767_v56, %v1614_v6 }
 0x49f   : > { %v1771_v61 = vpop.f32.mrb[54].mxu0  ;;  %1936 = vmatprep.subr.mxu1 %v1768_v59 }
 0x4a0   : > { %v1772_v21 = vadd.f32 %v1771_v61, %v1619_v26  ;;  %v1773_v13 = vpop.f32.mrb[55].mxu0  ;;  %1937 = vmatpush1.msra.mxu1 %v1766_v17 }
 0x4a1   : > { %v1774_v35 = vadd.f32 %v1773_v13, %v1619_v26 }
 0x4a2   : > { %1776 = vxpose.xlu0.b32.start.end [1/1] (short) %v1772_v21, 128 }
 0x4a3   : > { %1808 = vxpose.xlu1.b32.start.end [1/1] (short) %v1774_v35, 128 }
 0x4c1   : > { %3169 = vset.pattern.permute.xlu1 %v6228_v45 }
 0x4fd   : > { %1578 = vperm.xlu1 %3169, %v1562_v62  }
 0x507   : > { %1573 = vperm.xlu0 %3168, %v1561_v3  }
 0x50b   : > { %1583 = vperm.xlu0 %3168, %v1563_v58  }
 0x50f   : > { %1588 = vperm.xlu0 %3168, %v1564_v7  }
 0x513   : > { %1593 = vperm.xlu0 %3168, %v1565_v20  }
 0x517   : > { %1598 = vperm.xlu0 %3168, %v1566_v51  }
 0x51b   : > { %1603 = vperm.xlu0 %3168, %v1567_v29  }
 0x51f   : > { %1608 = vperm.xlu0 %3168, %v1568_v50  }
 0x522   : > { %v1792_v30 = vpop.trf.xlu0 }
 0x523   : > { %2947 = vmatmul.mubr.msk.f32.vlgmr.msra.gmra.mrb[64].mxu1 %vm726_vm1, %v1792_v30  ;;  %v1824_v1 = vpop.trf.xlu1 }
 0x524   : > { %2006 = vmatprep.mubr.f32.mxu1 %v6197_v15 }
 0x526   : > { %v1793_v0 = vpop.trf.xlu0 }
 0x527   : > { %2948 = vmatmul.mubr.msk.f32.gmra.mrb[66].mxu1 %vm726_vm1, %v1793_v0  ;;  %v1825_v44 = vpop.trf.xlu1 }
 0x528   : > { %2012 = vmatprep.mubr.f32.mxu1 %v6197_v15 }
 0x52a   : > { %v1794_v25 = vpop.trf.xlu0 }
 0x52b   : > { %2949 = vmatmul.mubr.msk.f32.gmra.mrb[68].mxu1 %vm726_vm1, %v1794_v25  ;;  %v1826_v6 = vpop.trf.xlu1 }
 0x52c   : > { %2018 = vmatprep.mubr.f32.mxu1 %v6197_v15 }
 0x52e   : > { %v1795_v53 = vpop.trf.xlu0 }
 0x52f   : > { %2950 = vmatmul.mubr.msk.f32.gmra.mrb[70].mxu1 %vm726_vm1, %v1795_v53  ;;  %v1827_v59 = vpop.trf.xlu1 }
 0x530   : > { %2024 = vmatprep.mubr.f32.mxu1 %v6197_v15 }
 0x532   : > { %v1796_v28 = vpop.trf.xlu0 }
 0x533   : > { %2951 = vmatmul.mubr.msk.f32.gmra.mrb[72].mxu1 %vm726_vm1, %v1796_v28  ;;  %v1828_v21 = vpop.trf.xlu1 }
 0x534   : > { %2030 = vmatprep.mubr.f32.mxu1 %v6197_v15 }
 0x536   : > { %v1797_v32 = vpop.trf.xlu0 }
 0x537   : > { %2952 = vmatmul.mubr.msk.f32.gmra.mrb[74].mxu1 %vm726_vm1, %v1797_v32  ;;  %v1829_v35 = vpop.trf.xlu1 }
 0x538   : > { %2036 = vmatprep.mubr.f32.mxu1 %v6197_v15 }
 0x53a   : > { %v1798_v48 = vpop.trf.xlu0 }
 0x53b   : > { %2953 = vmatmul.mubr.msk.f32.gmra.mrb[76].mxu1 %vm726_vm1, %v1798_v48  ;;  %v1830_v45 = vpop.trf.xlu1 }
 0x53c   : > { %2042 = vmatprep.mubr.f32.mxu1 %v6197_v15 }
 0x53e   : > { %v1799_v57 = vpop.trf.xlu0 }
 0x53f   : > { %2954 = vmatmul.mubr.msk.f32.gmra.mrb[78].mxu1 %vm726_vm1, %v1799_v57  ;;  %v1831_v62 = vpop.trf.xlu1  ;;  %v3450_v57 = vld [vmem:[%s5986_s2] sm:$0xff] }
 0x540   : > { %2048 = vmatprep.mubr.f32.mxu1 %v6197_v15 }
 0x542   : > { %v1800_v55 = vpop.trf.xlu0 }
 0x543   : > { %2955 = vmatmul.mubr.msk.f32.gmra.mrb[80].mxu1 %vm726_vm1, %v1800_v55  ;;  %v1832_v3 = vpop.trf.xlu1 }
 0x544   : > { %2054 = vmatprep.mubr.f32.mxu1 %v6197_v15 }
 0x546   : > { %v1801_v9 = vpop.trf.xlu0 }
 0x547   : > { %2956 = vmatmul.mubr.msk.f32.gmra.mrb[82].mxu1 %vm726_vm1, %v1801_v9  ;;  %v1833_v58 = vpop.trf.xlu1 }
 0x548   : > { %2060 = vmatprep.mubr.f32.mxu1 %v6197_v15 }
 0x54a   : > { %v1802_v26 = vpop.trf.xlu0 }
 0x54b   : > { %2957 = vmatmul.mubr.msk.f32.gmra.mrb[84].mxu1 %vm726_vm1, %v1802_v26  ;;  %v1834_v7 = vpop.trf.xlu1 }
 0x54c   : > { %2066 = vmatprep.mubr.f32.mxu1 %v6197_v15 }
 0x54e   : > { %v1803_v19 = vpop.trf.xlu0 }
 0x54f   : > { %2958 = vmatmul.mubr.msk.f32.gmra.mrb[86].mxu1 %vm726_vm1, %v1803_v19  ;;  %v1835_v20 = vpop.trf.xlu1  ;;  %v3453_v19 = vld [vmem:[%s5986_s2 + $0x28] sm:$0xff] }
 0x550   : > { %2072 = vmatprep.mubr.f32.mxu1 %v6197_v15 }
 0x552   : > { %v1804_v56 = vpop.trf.xlu0 }
 0x553   : > { %2959 = vmatmul.mubr.msk.f32.gmra.mrb[88].mxu1 %vm726_vm1, %v1804_v56  ;;  %v1836_v30 = vpop.trf.xlu1 }
 0x554   : > { %2078 = vmatprep.mubr.f32.mxu1 %v6197_v15 }
 0x556   : > { %v1805_v17 = vpop.trf.xlu0 }
 0x557   : > { %2960 = vmatmul.mubr.msk.f32.gmra.mrb[90].mxu1 %vm726_vm1, %v1805_v17  ;;  %v1837_v0 = vpop.trf.xlu1 }
 0x558   : > { %2084 = vmatprep.mubr.f32.mxu1 %v6197_v15 }
 0x55a   : > { %v1806_v61 = vpop.trf.xlu0 }
 0x55b   : > { %2961 = vmatmul.mubr.msk.f32.gmra.mrb[92].mxu1 %vm726_vm1, %v1806_v61  ;;  %v3454_v61 = vld [vmem:[%s5986_s2 + $0x10] sm:$0xff] }
 0x55c   : > { %2090 = vmatprep.mubr.f32.mxu1 %v6197_v15 }
 0x55e   : > { %v1807_v13 = vpop.trf.xlu0 }
 0x55f   : > { %2962 = vmatmul.mubr.msk.f32.gmra.mrb[94].mxu1 %vm726_vm1, %v1807_v13  ;;  %v3455_v13 = vld [vmem:[%s5986_s2 + $0x30] sm:$0xff] }
 0x560   : > { %2096 = vmatprep.mubr.f32.mxu1 %v6197_v15 }
 0x563   : > { %2963 = vmatmul.mubr.msk.f32.gmra.mrb[96].mxu1 %vm726_vm1, %v1824_v1  ;;  %v3451_v1 = vld [vmem:[%s5986_s2 + $0x20] sm:$0xff] }
 0x564   : > { %2102 = vmatprep.mubr.f32.mxu1 %v6197_v15 }
 0x567   : > { %2964 = vmatmul.mubr.msk.f32.gmra.mrb[98].mxu1 %vm726_vm1, %v1825_v44  ;;  %v3452_v44 = vld [vmem:[%s5986_s2 + $0x8] sm:$0xff] }
 0x568   : > { %2108 = vmatprep.mubr.f32.mxu1 %v6197_v15 }
 0x56b   : > { %2965 = vmatmul.mubr.msk.f32.gmra.mrb[100].mxu1 %vm726_vm1, %v1826_v6 }
 0x56c   : > { %2114 = vmatprep.mubr.f32.mxu1 %v6197_v15 }
 0x56f   : > { %2966 = vmatmul.mubr.msk.f32.gmra.mrb[102].mxu1 %vm726_vm1, %v1827_v59 }
 0x570   : > { %2120 = vmatprep.mubr.f32.mxu1 %v6197_v15 }
 0x573   : > { %2967 = vmatmul.mubr.msk.f32.gmra.mrb[104].mxu1 %vm726_vm1, %v1828_v21 }
 0x574   : > { %2126 = vmatprep.mubr.f32.mxu1 %v6197_v15 }
 0x577   : > { %2968 = vmatmul.mubr.msk.f32.gmra.mrb[106].mxu1 %vm726_vm1, %v1829_v35 }
 0x578   : > { %2132 = vmatprep.mubr.f32.mxu1 %v6197_v15 }
 0x57b   : > { %2969 = vmatmul.mubr.msk.f32.gmra.mrb[108].mxu1 %vm726_vm1, %v1830_v45 }
 0x57c   : > { %2138 = vmatprep.mubr.f32.mxu1 %v6197_v15 }
 0x57f   : > { %2970 = vmatmul.mubr.msk.f32.gmra.mrb[110].mxu1 %vm726_vm1, %v1831_v62  ;;  %v3456_v62 = vld [vmem:[%s5986_s2 + $0x18] sm:$0xff] }
 0x580   : > { %2144 = vmatprep.mubr.f32.mxu1 %v6197_v15 }
 0x583   : > { %2971 = vmatmul.mubr.msk.f32.gmra.mrb[112].mxu1 %vm726_vm1, %v1832_v3 }
 0x584   : > { %2150 = vmatprep.mubr.f32.mxu1 %v6197_v15 }
 0x586   : > { %v1574_v51 = vpop.permute.xlu0 %1573 }
 0x587   : > { %v5052_v29 = vadd.f32 %v4939_v37, %v1574_v51  ;;  %v1720_v50 = vadd.f32 %v4943_v12, %v1574_v51  ;;  %2972 = vmatmul.mubr.msk.f32.gmra.mrb[114].mxu1 %vm726_vm1, %v1833_v58  ;;  %v1838_v37 = vpop.trf.xlu1  ;;  %v3457_v58 = vld [vmem:[%s5986_s2 + $0x38] sm:$0xff] }
 0x588   : > { %2156 = vmatprep.mubr.f32.mxu1 %v6197_v15 }
 0x589   : > { %6229 = vst [vmem:[#allocation13_spill] sm:$0xff] %v5052_v29  ;;  %2599 = vmatprep.mubr.f32.mxu0 %v1720_v50 }
 0x58b   : > { %2973 = vmatmul.mubr.msk.f32.gmra.mrb[116].mxu1 %vm726_vm1, %v1834_v7  ;;  %v1839_v12 = vpop.trf.xlu1 }
 0x58c   : > { %2162 = vmatprep.mubr.f32.mxu1 %v6197_v15 }
 0x58f   : > { %2974 = vmatmul.mubr.msk.f32.gmra.mrb[118].mxu1 %vm726_vm1, %v1835_v20 }
 0x590   : > { %2168 = vmatprep.mubr.f32.mxu1 %v6197_v15 }
 0x593   : > { %2975 = vmatmul.mubr.msk.f32.gmra.mrb[120].mxu1 %vm726_vm1, %v1836_v30  ;;  %v3458_v30 = vld [vmem:[%s5986_s2 + $0x40] sm:$0xff] }
 0x594   : > { %2174 = vmatprep.mubr.f32.mxu1 %v6197_v15 }
 0x597   : > { %2976 = vmatmul.mubr.msk.f32.gmra.mrb[122].mxu1 %vm726_vm1, %v1837_v0 }
 0x598   : > { %2180 = vmatprep.mubr.f32.mxu1 %v6197_v15 }
 0x59b   : > { %2977 = vmatmul.mubr.msk.f32.gmra.mrb[124].mxu1 %vm726_vm1, %v1838_v37 }
 0x59c   : > { %2186 = vmatprep.mubr.f32.mxu1 %v6197_v15 }
 0x59f   : > { %2978 = vmatmul.mubr.msk.f32.gmra.mrb[126].mxu1 %vm726_vm1, %v1839_v12  ;;  %v3459_v12 = vld [vmem:[%s5986_s2 + $0x48] sm:$0xff] }
 0x5f6   : > { %v2002_v25 = vpop.f32.mrb[64].mxu1 }
 0x5f7   : > { %v2004_v53 = vpop.f32.mrb[65].mxu1  ;;  %v5071_v55 = vadd.f32 %v3450_v57, %v2002_v25 }
 0x5f8   : > { %v5081_v26 = vadd.f32 %v3452_v44, %v2004_v53 }
 0x5fa   : > { %v2008_v28 = vpop.f32.mrb[66].mxu1 }
 0x5fb   : > { %v2010_v32 = vpop.f32.mrb[67].mxu1  ;;  %v5095_v21 = vadd.f32 %v3454_v61, %v2008_v28 }
 0x5fc   : > { %v5105_v3 = vadd.f32 %v3456_v62, %v2010_v32 }
 0x5fe   : > { %v2014_v48 = vpop.f32.mrb[68].mxu1 }
 0x5ff   : > { %v5076_v9 = vadd.f32 %v3451_v1, %v2014_v48  ;;  %v2016_v15 = vpop.f32.mrb[69].mxu1  ;;  %v3460_v48 = vld [vmem:[%s5986_s2 + $0x50] sm:$0xff] }
 0x600   : > { %v5086_v6 = vadd.f32 %v3453_v19, %v2016_v15  ;;  %v3461_v15 = vld [vmem:[%s5986_s2 + $0x58] sm:$0xff] }
 0x601   : > { %v2193_v56 = vmax.f32 %v5071_v55, %v5076_v9 }
 0x602   : > { %v2230_v59 = vmax.f32 %v5081_v26, %v5086_v6  ;;  %v2020_v17 = vpop.f32.mrb[70].mxu1 }
 0x603   : > { %v5100_v35 = vadd.f32 %v3455_v13, %v2020_v17  ;;  %v2022_v45 = vpop.f32.mrb[71].mxu1 }
 0x604   : > { %v5110_v7 = vadd.f32 %v3457_v58, %v2022_v45  ;;  %v3463_v45 = vld [vmem:[%s5986_s2 + $0x68] sm:$0xff] }
 0x605   : > { %v2194_v20 = vmax.f32 %v5095_v21, %v5100_v35 }
 0x606   : > { %v2231_v51 = vmax.f32 %v5105_v3, %v5110_v7  ;;  %v2026_v50 = vpop.f32.mrb[72].mxu1 }
 0x607   : > { %v5119_v0 = vadd.f32 %v3458_v30, %v2026_v50  ;;  %v2028_v37 = vpop.f32.mrb[73].mxu1 }
 0x608   : > { %v5124_v25 = vadd.f32 %v3459_v12, %v2028_v37  ;;  %v3465_v12 = vld [vmem:[%s5986_s2 + $0x78] sm:$0xff] }
 0x609   : > { %v2195_v53 = vmax.f32 %v2193_v56, %v5119_v0 }
 0x60a   : > { %v2232_v28 = vmax.f32 %v2230_v59, %v5124_v25  ;;  %v2032_v32 = vpop.f32.mrb[74].mxu1  ;;  %v3462_v59 = vld [vmem:[%s5986_s2 + $0x60] sm:$0xff] }
 0x60b   : > { %v5131_v57 = vadd.f32 %v3460_v48, %v2032_v32  ;;  %v2034_v1 = vpop.f32.mrb[75].mxu1 }
 0x60c   : > { %v5136_v44 = vadd.f32 %v3461_v15, %v2034_v1 }
 0x60d   : > { %v2196_v19 = vmax.f32 %v2194_v20, %v5131_v57 }
 0x60e   : > { %v2233_v56 = vmax.f32 %v2231_v51, %v5136_v44  ;;  %v2038_v17 = vpop.f32.mrb[76].mxu1  ;;  %v3464_v51 = vld [vmem:[%s5986_s2 + $0x70] sm:$0xff] }
 0x60f   : > { %v5143_v61 = vadd.f32 %v3462_v59, %v2038_v17  ;;  %v2040_v13 = vpop.f32.mrb[77].mxu1  ;;  %v3467_v59 = vld [vmem:[%s5986_s2 + $0x88] sm:$0xff] }
 0x610   : > { %v5148_v62 = vadd.f32 %v3463_v45, %v2040_v13 }
 0x611   : > { %v2197_v58 = vmax.f32 %v2195_v53, %v5143_v61 }
 0x612   : > { %v2234_v20 = vmax.f32 %v2232_v28, %v5148_v62  ;;  %v2044_v50 = vpop.f32.mrb[78].mxu1  ;;  %v3466_v28 = vld [vmem:[%s5986_s2 + $0x80] sm:$0xff] }
 0x613   : > { %v5155_v30 = vadd.f32 %v3464_v51, %v2044_v50  ;;  %v2046_v37 = vpop.f32.mrb[79].mxu1 }
 0x614   : > { %v5160_v32 = vadd.f32 %v3465_v12, %v2046_v37  ;;  %v3469_v12 = vld [vmem:[%s5986_s2 + $0x98] sm:$0xff] }
 0x615   : > { %v2198_v48 = vmax.f32 %v2196_v19, %v5155_v30 }
 0x616   : > { %v2235_v53 = vmax.f32 %v2233_v56, %v5160_v32  ;;  %v2050_v1 = vpop.f32.mrb[80].mxu1  ;;  %v3468_v56 = vld [vmem:[%s5986_s2 + $0x90] sm:$0xff] }
 0x617   : > { %v5167_v15 = vadd.f32 %v3466_v28, %v2050_v1  ;;  %v2052_v17 = vpop.f32.mrb[81].mxu1 }
 0x618   : > { %v5172_v13 = vadd.f32 %v3467_v59, %v2052_v17 }
 0x619   : > { %v2199_v45 = vmax.f32 %v2197_v58, %v5167_v15 }
 0x61a   : > { %v2236_v19 = vmax.f32 %v2234_v20, %v5172_v13  ;;  %v2056_v50 = vpop.f32.mrb[82].mxu1  ;;  %v3470_v20 = vld [vmem:[%s5986_s2 + $0xa0] sm:$0xff] }
 0x61b   : > { %v5179_v51 = vadd.f32 %v3468_v56, %v2056_v50  ;;  %v2058_v37 = vpop.f32.mrb[83].mxu1  ;;  %v3471_v56 = vld [vmem:[%s5986_s2 + $0xa8] sm:$0xff] }
 0x61c   : > { %v5184_v1 = vadd.f32 %v3469_v12, %v2058_v37 }
 0x61d   : > { %v2200_v28 = vmax.f32 %v2198_v48, %v5179_v51 }
 0x61e   : > { %v2237_v58 = vmax.f32 %v2235_v53, %v5184_v1  ;;  %v2062_v17 = vpop.f32.mrb[84].mxu1  ;;  %v3472_v53 = vld [vmem:[%s5986_s2 + $0xb0] sm:$0xff] }
 0x61f   : > { %v5191_v59 = vadd.f32 %v3470_v20, %v2062_v17  ;;  %v2064_v50 = vpop.f32.mrb[85].mxu1  ;;  %v3473_v20 = vld [vmem:[%s5986_s2 + $0xb8] sm:$0xff] }
 0x620   : > { %v5196_v31 = vadd.f32 %v3471_v56, %v2064_v50 }
 0x621   : > { %v2201_v37 = vmax.f32 %v2199_v45, %v5191_v59 }
 0x622   : > { %6230 = vst [vmem:[#allocation16_spill] sm:$0xff] %v5196_v31  ;;  %v2238_v48 = vmax.f32 %v2236_v19, %v5196_v31  ;;  %v2068_v12 = vpop.f32.mrb[86].mxu1  ;;  %v3474_v19 = vld [vmem:[%s5986_s2 + $0xc0] sm:$0xff] }
 0x623   : > { %v5203_v14 = vadd.f32 %v3472_v53, %v2068_v12  ;;  %v2070_v17 = vpop.f32.mrb[87].mxu1  ;;  %v3475_v53 = vld [vmem:[%s5986_s2 + $0xc8] sm:$0xff] }
 0x624   : > { %v5208_v36 = vadd.f32 %v3473_v20, %v2070_v17 }
 0x625   : > { %v2202_v50 = vmax.f32 %v2200_v28, %v5203_v14 }
 0x626   : > { %6231 = vst [vmem:[#allocation15_spill] sm:$0xff] %v5208_v36  ;;  %v2239_v45 = vmax.f32 %v2237_v58, %v5208_v36  ;;  %v2074_v56 = vpop.f32.mrb[88].mxu1  ;;  %v3476_v58 = vld [vmem:[%s5986_s2 + $0xd0] sm:$0xff] }
 0x627   : > { %v5215_v38 = vadd.f32 %v3474_v19, %v2074_v56  ;;  %v2076_v12 = vpop.f32.mrb[89].mxu1  ;;  %v3477_v19 = vld [vmem:[%s5986_s2 + $0xd8] sm:$0xff] }
 0x628   : > { %v5220_v5 = vadd.f32 %v3475_v53, %v2076_v12 }
 0x629   : > { %v2203_v17 = vmax.f32 %v2201_v37, %v5215_v38 }
 0x62a   : > { %6232 = vst [vmem:[#allocation18_spill] sm:$0xff] %v5220_v5  ;;  %v2240_v28 = vmax.f32 %v2238_v48, %v5220_v5  ;;  %v2080_v20 = vpop.f32.mrb[90].mxu1  ;;  %v3478_v48 = vld [vmem:[%s5986_s2 + $0xe0] sm:$0xff] }
 0x62b   : > { %v5227_v24 = vadd.f32 %v3476_v58, %v2080_v20  ;;  %v2082_v56 = vpop.f32.mrb[91].mxu1  ;;  %v3479_v58 = vld [vmem:[%s5986_s2 + $0xe8] sm:$0xff] }
 0x62c   : > { %v5232_v10 = vadd.f32 %v3477_v19, %v2082_v56 }
 0x62d   : > { %v2204_v12 = vmax.f32 %v2202_v50, %v5227_v24 }
 0x62e   : > { %6233 = vst [vmem:[#allocation17_spill] sm:$0xff] %v5232_v10  ;;  %v2241_v37 = vmax.f32 %v2239_v45, %v5232_v10  ;;  %v2086_v53 = vpop.f32.mrb[92].mxu1  ;;  %v3480_v45 = vld [vmem:[%s5986_s2 + $0xf0] sm:$0xff] }
 0x62f   : > { %v5239_v63 = vadd.f32 %v3478_v48, %v2086_v53  ;;  %v2088_v20 = vpop.f32.mrb[93].mxu1  ;;  %v3481_v48 = vld [vmem:[%s5986_s2 + $0xf8] sm:$0xff] }
 0x630   : > { %v5244_v8 = vadd.f32 %v3479_v58, %v2088_v20 }
 0x631   : > { %v2205_v56 = vmax.f32 %v2203_v17, %v5239_v63 }
 0x632   : > { %6234 = vst [vmem:[#allocation20_spill] sm:$0xff] %v5244_v8  ;;  %v2242_v50 = vmax.f32 %v2240_v28, %v5244_v8  ;;  %v2092_v19 = vpop.f32.mrb[94].mxu1  ;;  %v3482_v28 = vld [vmem:[%s5986_s2 + $0x100] sm:$0xff] }
 0x633   : > { %v5251_v60 = vadd.f32 %v3480_v45, %v2092_v19  ;;  %v2094_v53 = vpop.f32.mrb[95].mxu1  ;;  %v3483_v45 = vld [vmem:[%s5986_s2 + $0x108] sm:$0xff] }
 0x634   : > { %v5256_v33 = vadd.f32 %v3481_v48, %v2094_v53 }
 0x635   : > { %v2206_v20 = vmax.f32 %v2204_v12, %v5251_v60 }
 0x636   : > { %6235 = vst [vmem:[#allocation19_spill] sm:$0xff] %v5256_v33  ;;  %v2243_v17 = vmax.f32 %v2241_v37, %v5256_v33  ;;  %v2098_v58 = vpop.f32.mrb[96].mxu1  ;;  %v3484_v37 = vld [vmem:[%s5986_s2 + $0x110] sm:$0xff] }
 0x637   : > { %v5263_v42 = vadd.f32 %v3482_v28, %v2098_v58  ;;  %v2100_v19 = vpop.f32.mrb[97].mxu1  ;;  %v3485_v28 = vld [vmem:[%s5986_s2 + $0x118] sm:$0xff] }
 0x638   : > { %v5268_v39 = vadd.f32 %v3483_v45, %v2100_v19 }
 0x639   : > { %v2207_v53 = vmax.f32 %v2205_v56, %v5263_v42 }
 0x63a   : > { %6236 = vst [vmem:[#allocation42_spill] sm:$0xff] %v5268_v39  ;;  %v2244_v12 = vmax.f32 %v2242_v50, %v5268_v39  ;;  %v2104_v48 = vpop.f32.mrb[98].mxu1  ;;  %v3486_v50 = vld [vmem:[%s5986_s2 + $0x120] sm:$0xff] }
 0x63b   : > { %v5275_v4 = vadd.f32 %v3484_v37, %v2104_v48  ;;  %v2106_v58 = vpop.f32.mrb[99].mxu1  ;;  %v3487_v37 = vld [vmem:[%s5986_s2 + $0x128] sm:$0xff] }
 0x63c   : > { %v5280_v2 = vadd.f32 %v3485_v28, %v2106_v58 }
 0x63d   : > { %v2208_v19 = vmax.f32 %v2206_v20, %v5275_v4 }
 0x63e   : > { %6237 = vst [vmem:[#allocation43_spill] sm:$0xff] %v5280_v2  ;;  %v2245_v56 = vmax.f32 %v2243_v17, %v5280_v2  ;;  %v2110_v45 = vpop.f32.mrb[100].mxu1  ;;  %v3488_v17 = vld [vmem:[%s5986_s2 + $0x130] sm:$0xff] }
 0x63f   : > { %v5287_v40 = vadd.f32 %v3486_v50, %v2110_v45  ;;  %v2112_v48 = vpop.f32.mrb[101].mxu1  ;;  %v3489_v50 = vld [vmem:[%s5986_s2 + $0x138] sm:$0xff] }
 0x640   : > { %v5292_v41 = vadd.f32 %v3487_v37, %v2112_v48 }
 0x641   : > { %v2209_v58 = vmax.f32 %v2207_v53, %v5287_v40 }
 0x642   : > { %6238 = vst [vmem:[#allocation44_spill] sm:$0xff] %v5292_v41  ;;  %v2246_v20 = vmax.f32 %v2244_v12, %v5292_v41  ;;  %v2116_v28 = vpop.f32.mrb[102].mxu1 }
 0x643   : > { %v5299_v23 = vadd.f32 %v3488_v17, %v2116_v28  ;;  %v2118_v45 = vpop.f32.mrb[103].mxu1 }
 0x644   : > { %v5304_v54 = vadd.f32 %v3489_v50, %v2118_v45  ;;  %v3491_v45 = vld [vmem:[%s5986_s2 + $0x140] sm:$0xff] }
 0x645   : > { %v2210_v48 = vmax.f32 %v2208_v19, %v5299_v23  ;;  %v3492_v19 = vld [vmem:[%s5986_s2 + $0x150] sm:$0xff] }
 0x646   : > { %6239 = vst [vmem:[#allocation45_spill] sm:$0xff] %v5304_v54  ;;  %v2247_v53 = vmax.f32 %v2245_v56, %v5304_v54  ;;  %v2122_v37 = vpop.f32.mrb[104].mxu1 }
 0x647   : > { %v2124_v12 = vpop.f32.mrb[105].mxu1  ;;  %v5317_v50 = vadd.f32 %v3491_v45, %v2122_v37  ;;  %v3494_v45 = vld [vmem:[%s5986_s2 + $0x160] sm:$0xff] }
 0x648   : > { %v5311_v43 = vadd.f32 %v3490_v34, %v2124_v12  ;;  %v3493_v34 = vld [vmem:[%s5986_s2 + $0x158] sm:$0xff] }
 0x649   : > { %v2211_v37 = vmax.f32 %v2209_v58, %v5317_v50 }
 0x64a   : > { %6240 = vst [vmem:[#allocation46_spill] sm:$0xff] %v5311_v43  ;;  %v2248_v28 = vmax.f32 %v2246_v20, %v5311_v43  ;;  %v2128_v17 = vpop.f32.mrb[106].mxu1 }
 0x64b   : > { %v5322_v56 = vadd.f32 %v3492_v19, %v2128_v17  ;;  %v2130_v49 = vpop.f32.mrb[107].mxu1 }
 0x64c   : > { %v5327_v12 = vadd.f32 %v3493_v34, %v2130_v49  ;;  %v3495_v49 = vld [vmem:[%s5986_s2 + $0x170] sm:$0xff] }
 0x64d   : > { %v2212_v20 = vmax.f32 %v2210_v48, %v5322_v56 }
 0x64e   : > { %6241 = vst [vmem:[#allocation47_spill] sm:$0xff] %v5327_v12  ;;  %v2249_v11 = vmax.f32 %v2247_v53, %v5327_v12  ;;  %v2134_v52 = vpop.f32.mrb[108].mxu1 }
 0x64f   : > { %v5335_v17 = vadd.f32 %v3494_v45, %v2134_v52  ;;  %v2136_v19 = vpop.f32.mrb[109].mxu1 }
 0x650   : > { %v5353_v22 = vadd.f32 %v3497_v16, %v2136_v19  ;;  %v3500_v16 = vld [vmem:[%s5986_s2 + $0x178] sm:$0xff] }
 0x651   : > { %v2213_v27 = vmax.f32 %v2211_v37, %v5335_v17 }
 0x652   : > { %v2140_v47 = vpop.f32.mrb[110].mxu1  ;;  %6242 = vst [vmem:[#allocation48_spill] sm:$0xff] %v5353_v22  ;;  %v2250_v46 = vmax.f32 %v2248_v28, %v5353_v22  ;;  %v3502_v28 = vld [vmem:[%s5986_s2 + $0x198] sm:$0xff] }
 0x653   : > { %v5341_v48 = vadd.f32 %v3495_v49, %v2140_v47  ;;  %v2142_v53 = vpop.f32.mrb[111].mxu1 }
 0x654   : > { %v5370_v19 = vadd.f32 %v3500_v16, %v2142_v53  ;;  %v3503_v53 = vld [vmem:[%s5986_s2 + $0x1a8] sm:$0xff] }
 0x655   : > { %v2214_v34 = vmax.f32 %v2212_v20, %v5341_v48  ;;  %v3498_v20 = vld [vmem:[%s5986_s2 + $0x190] sm:$0xff] }
 0x656   : > { %v2146_v58 = vpop.f32.mrb[112].mxu1  ;;  %6244 = vst [vmem:[#allocation50_spill] sm:$0xff] %v5370_v19 }
 0x657   : > { %v5347_v52 = vadd.f32 %v3496_v18, %v2146_v58  ;;  %v2148_v45 = vpop.f32.mrb[113].mxu1  ;;  %v3499_v18 = vld [vmem:[%s5986_s2 + $0x188] sm:$0xff] }
 0x658   : > { %v5363_v58 = vadd.f32 %v3499_v18, %v2148_v45 }
 0x659   : > { %v2215_v37 = vmax.f32 %v2213_v27, %v5347_v52 }
 0x65a   : > { %v2152_v47 = vpop.f32.mrb[114].mxu1  ;;  %6243 = vst [vmem:[#allocation49_spill] sm:$0xff] %v5363_v58  ;;  %v2252_v45 = vmax.f32 %v2250_v46, %v5363_v58  ;;  %v3504_v46 = vld [vmem:[%s5986_s2 + $0x1b0] sm:$0xff] }
 0x65b   : > { %v5358_v49 = vadd.f32 %v3498_v20, %v2152_v47  ;;  %v2154_v29 = vpop.f32.mrb[115].mxu1  ;;  %v3501_v47 = vld [vmem:[%s5986_s2 + $0x1a0] sm:$0xff] }
 0x65d   : > { %v2216_v27 = vmax.f32 %v2214_v34, %v5358_v49  ;;  %v5381_v34 = vadd.f32 %v3502_v28, %v2154_v29 }
 0x65e   : > { %v2158_v12 = vpop.f32.mrb[116].mxu1 }
 0x65f   : > { %v5375_v20 = vadd.f32 %v3501_v47, %v2158_v12  ;;  %v2160_v43 = vpop.f32.mrb[117].mxu1  ;;  %6245 = vst [vmem:[#allocation51_spill] sm:$0xff] %v5381_v34  ;;  %v2251_v12 = vmax.f32 %v2249_v11, %v5370_v19  ;;  %v3506_v19 = vld [vmem:[%s5986_s2 + $0x1c0] sm:$0xff] }
 0x660   : > { %v5386_v18 = vadd.f32 %v3503_v53, %v2160_v43  ;;  %v3505_v43 = vld [vmem:[%s5986_s2 + $0x1b8] sm:$0xff] }
 0x661   : > { %v2217_v16 = vmax.f32 %v2215_v37, %v5375_v20  ;;  %v2253_v28 = vmax.f32 %v2251_v12, %v5381_v34  ;;  %v3507_v12 = vld [vmem:[%s5986_s2 + $0x1c8] sm:$0xff] }
 0x662   : > { %6246 = vst [vmem:[#allocation52_spill] sm:$0xff] %v5386_v18  ;;  %v2254_v47 = vmax.f32 %v2252_v45, %v5386_v18  ;;  %v2164_v22 = vpop.f32.mrb[118].mxu1 }
 0x663   : > { %v5394_v58 = vadd.f32 %v3504_v46, %v2164_v22  ;;  %v2166_v29 = vpop.f32.mrb[119].mxu1 }
 0x664   : > { %v5400_v53 = vadd.f32 %v3505_v43, %v2166_v29 }
 0x665   : > { %v2218_v11 = vmax.f32 %v2216_v27, %v5394_v58 }
 0x666   : > { %6247 = vst [vmem:[#allocation53_spill] sm:$0xff] %v5400_v53  ;;  %v2255_v37 = vmax.f32 %v2253_v28, %v5400_v53  ;;  %v2170_v45 = vpop.f32.mrb[120].mxu1  ;;  %v3508_v28 = vld [vmem:[%s5986_s2 + $0x1d0] sm:$0xff] }
 0x667   : > { %v5407_v22 = vadd.f32 %v3506_v19, %v2170_v45  ;;  %v2172_v46 = vpop.f32.mrb[121].mxu1  ;;  %v3509_v45 = vld [vmem:[%s5986_s2 + $0x1d8] sm:$0xff] }
 0x668   : > { %v5412_v34 = vadd.f32 %v3507_v12, %v2172_v46 }
 0x669   : > { %v2219_v29 = vmax.f32 %v2217_v16, %v5407_v22 }
 0x66a   : > { %6248 = vst [vmem:[#allocation54_spill] sm:$0xff] %v5412_v34  ;;  %v2256_v27 = vmax.f32 %v2254_v47, %v5412_v34  ;;  %v2176_v43 = vpop.f32.mrb[122].mxu1  ;;  %v3510_v47 = vld [vmem:[%s5986_s2 + $0x1e0] sm:$0xff] }
 0x66b   : > { %v5419_v53 = vadd.f32 %v3508_v28, %v2176_v43  ;;  %v2178_v19 = vpop.f32.mrb[123].mxu1  ;;  %v3511_v28 = vld [vmem:[%s5986_s2 + $0x1e8] sm:$0xff] }
 0x66c   : > { %v5424_v18 = vadd.f32 %v3509_v45, %v2178_v19 }
 0x66d   : > { %v2220_v46 = vmax.f32 %v2218_v11, %v5419_v53 }
 0x66e   : > { %6249 = vst [vmem:[#allocation55_spill] sm:$0xff] %v5424_v18  ;;  %v2257_v16 = vmax.f32 %v2255_v37, %v5424_v18  ;;  %v2182_v12 = vpop.f32.mrb[124].mxu1  ;;  %v3512_v37 = vld [vmem:[%s5986_s2 + $0x1f0] sm:$0xff] }
 0x66f   : > { %v5431_v34 = vadd.f32 %v3510_v47, %v2182_v12  ;;  %v2184_v43 = vpop.f32.mrb[125].mxu1  ;;  %v3513_v47 = vld [vmem:[%s5986_s2 + $0x1f8] sm:$0xff] }
 0x670   : > { %v5436_v54 = vadd.f32 %v3511_v28, %v2184_v43 }
 0x671   : > { %v2221_v19 = vmax.f32 %v2219_v29, %v5431_v34 }
 0x672   : > { %6250 = vst [vmem:[#allocation56_spill] sm:$0xff] %v5436_v54  ;;  %v2258_v11 = vmax.f32 %v2256_v27, %v5436_v54  ;;  %v2188_v45 = vpop.f32.mrb[126].mxu1 }
 0x673   : > { %v5443_v18 = vadd.f32 %v3512_v37, %v2188_v45  ;;  %v2190_v12 = vpop.f32.mrb[127].mxu1 }
 0x674   : > { %v5448_v41 = vadd.f32 %v3513_v47, %v2190_v12 }
 0x675   : > { %v2222_v43 = vmax.f32 %v2220_v46, %v5443_v18 }
 0x676   : > { %v2259_v29 = vmax.f32 %v2257_v16, %v5448_v41 }
 0x677   : > { %v2223_v28 = vmax.f32 %v2221_v19, %v2222_v43 }
 0x678   : > { %v2260_v27 = vmax.f32 %v2258_v11, %v2259_v29 }
 0x679   : > { %v2224_v54 = vrot.slane %v2223_v28, 4 }
 0x67a   : > { %v2261_v2 = vrot.slane %v2260_v27, 4 }
 0x67b   : > { %v2225_v39 = vmax.f32 %v2223_v28, %v2224_v54 }
 0x67c   : > { %v2262_v33 = vmax.f32 %v2260_v27, %v2261_v2 }
 0x67d   : > { %v2226_v8 = vrot.slane %v2225_v39, 2 }
 0x67e   : > { %v2263_v45 = vrot.slane %v2262_v33, 2 }
 0x67f   : > { %v2227_v37 = vmax.f32 %v2225_v39, %v2226_v8 }
 0x680   : > { %v2264_v10 = vmax.f32 %v2262_v33, %v2263_v45 }
 0x681   : > { %v2228_v5 = vrot.slane %v2227_v37, 1 }
 0x682   : > { %v2265_v36 = vrot.slane %v2264_v10, 1 }
 0x683   : > { %v5452_v31 = vmax.f32 %v2227_v37, %v2228_v5 }
 0x684   : > { %v5454_v12 = vmax.f32 %v2264_v10, %v2265_v36 }
 0x685   : > { %v2267_v46 = vsub.f32 %v5071_v55, %v5452_v31  ;;  %v2269_v16 = vsub.f32 %v5095_v21, %v5452_v31  ;;  %v2271_v54 = vsub.f32 %v5076_v9, %v5452_v31  ;;  %v2273_v2 = vsub.f32 %v5100_v35, %v5452_v31 }
 0x686   : > { %v2275_v39 = vsub.f32 %v5119_v0, %v5452_v31  ;;  %v2277_v33 = vsub.f32 %v5131_v57, %v5452_v31  ;;  %v2279_v8 = vsub.f32 %v5143_v61, %v5452_v31  ;;  %v2281_v10 = vsub.f32 %v5155_v30, %v5452_v31 }
 0x687   : > { %v2283_v5 = vsub.f32 %v5167_v15, %v5452_v31  ;;  %v2285_v36 = vsub.f32 %v5179_v51, %v5452_v31  ;;  %v2287_v55 = vsub.f32 %v5191_v59, %v5452_v31  ;;  %v2289_v9 = vsub.f32 %v5203_v14, %v5452_v31 }
 0x688   : > { %v2291_v21 = vsub.f32 %v5215_v38, %v5452_v31  ;;  %v2293_v35 = vsub.f32 %v5227_v24, %v5452_v31  ;;  %v2295_v0 = vsub.f32 %v5239_v63, %v5452_v31  ;;  %v2297_v57 = vsub.f32 %v5251_v60, %v5452_v31 }
 0x689   : > { %v2299_v61 = vsub.f32 %v5263_v42, %v5452_v31  ;;  %v2301_v30 = vsub.f32 %v5275_v4, %v5452_v31  ;;  %v2303_v14 = vsub.f32 %v5287_v40, %v5452_v31  ;;  %v2305_v38 = vsub.f32 %v5299_v23, %v5452_v31 }
 0x68a   : > { %v2309_v24 = vsub.f32 %v5322_v56, %v5452_v31  ;;  %v2311_v63 = vsub.f32 %v5335_v17, %v5452_v31  ;;  %v2313_v60 = vsub.f32 %v5341_v48, %v5452_v31  ;;  %v2315_v42 = vsub.f32 %v5347_v52, %v5452_v31  ;;  %v6266_v48 = vld [vmem:[#allocation55_spill] sm:$0xff] }
 0x68b   : > { %v2317_v4 = vsub.f32 %v5358_v49, %v5452_v31  ;;  %v2319_v40 = vsub.f32 %v5375_v20, %v5452_v31  ;;  %v2331_v11 = vmul.f32 1.442695, %v2267_v46  ;;  %v2335_v47 = vmul.f32 1.442695, %v2269_v16 }
 0x68c   : > { %v2339_v43 = vmul.f32 1.442695, %v2271_v54  ;;  %v2343_v28 = vmul.f32 1.442695, %v2273_v2  ;;  %v2347_v45 = vmul.f32 1.442695, %v2275_v39  ;;  %v2307_v46 = vsub.f32 %v5317_v50, %v5452_v31 }
 0x68d   : > { %3302 = vpow2.f32 %v2331_v11  ;;  %v2351_v37 = vmul.f32 1.442695, %v2277_v33  ;;  %v2355_v51 = vmul.f32 1.442695, %v2279_v8  ;;  %v2359_v59 = vmul.f32 1.442695, %v2281_v10 }
 0x68e   : > { %3304 = vpow2.f32 %v2335_v47  ;;  %v2363_v16 = vmul.f32 1.442695, %v2283_v5  ;;  %v2367_v54 = vmul.f32 1.442695, %v2285_v36  ;;  %v2371_v29 = vmul.f32 1.442695, %v2287_v55 }
 0x68f   : > { %3306 = vpow2.f32 %v2339_v43  ;;  %v2375_v2 = vmul.f32 1.442695, %v2289_v9  ;;  %v2379_v19 = vmul.f32 1.442695, %v2291_v21  ;;  %v2383_v27 = vmul.f32 1.442695, %v2293_v35 }
 0x690   : > { %3308 = vpow2.f32 %v2343_v28  ;;  %v2387_v11 = vmul.f32 1.442695, %v2295_v0  ;;  %v2391_v39 = vmul.f32 1.442695, %v2297_v57  ;;  %v2395_v33 = vmul.f32 1.442695, %v2299_v61 }
 0x691   : > { %3310 = vpow2.f32 %v2347_v45  ;;  %v2399_v47 = vmul.f32 1.442695, %v2301_v30  ;;  %v2403_v8 = vmul.f32 1.442695, %v2303_v14  ;;  %v2407_v10 = vmul.f32 1.442695, %v2305_v38 }
 0x692   : > { %3312 = vpow2.f32 %v2351_v37  ;;  %v6251_v30 = vld [vmem:[#allocation16_spill] sm:$0xff]  ;;  %v6252_v38 = vld [vmem:[#allocation15_spill] sm:$0xff]  ;;  %v6254_v45 = vld [vmem:[#allocation17_spill] sm:$0xff]  ;;  %v2419_v61 = vmul.f32 1.442695, %v2311_v63  ;;  %v6269_v49 = vsub.f32 %v5407_v22, %v5452_v31 }
 0x693   : > { %3314 = vpow2.f32 %v2355_v51  ;;  %v6256_v51 = vld [vmem:[#allocation19_spill] sm:$0xff]  ;;  %v6259_v21 = vld [vmem:[#allocation44_spill] sm:$0xff]  ;;  %v6261_v36 = vld [vmem:[#allocation46_spill] sm:$0xff] }
 0x694   : > { %3316 = vpow2.f32 %v2359_v59  ;;  %v6258_v35 = vld [vmem:[#allocation43_spill] sm:$0xff] }
 0x695   : > { %3318 = vpow2.f32 %v2363_v16  ;;  %v6262_v5 = vld [vmem:[#allocation47_spill] sm:$0xff] }
 0x696   : > { %3320 = vpow2.f32 %v2367_v54  ;;  %v6255_v54 = vld [vmem:[#allocation20_spill] sm:$0xff] }
 0x697   : > { %v5532_v9 = vpop.eup %3302  ;;  %3322 = vpow2.f32 %v2371_v29  ;;  %v6253_v29 = vld [vmem:[#allocation18_spill] sm:$0xff] }
 0x698   : > { %v5540_v57 = vpop.eup %3304  ;;  %3324 = vpow2.f32 %v2375_v2  ;;  %v6260_v2 = vld [vmem:[#allocation45_spill] sm:$0xff] }
 0x699   : > { %v5548_v59 = vpop.eup %3306  ;;  %3326 = vpow2.f32 %v2379_v19  ;;  %v2459_v43 = vadd.f32 %v5540_v57, %v5532_v9  ;;  %v6257_v19 = vld [vmem:[#allocation42_spill] sm:$0xff] }
 0x69a   : > { %v5556_v16 = vpop.eup %3308  ;;  %3328 = vpow2.f32 %v2383_v27  ;;  %v2415_v27 = vmul.f32 1.442695, %v2309_v24  ;;  %v6264_v24 = vld [vmem:[#allocation53_spill] sm:$0xff] }
 0x69b   : > { %v5564_v0 = vpop.eup %3310  ;;  %3330 = vpow2.f32 %v2387_v11  ;;  %v2460_v28 = vadd.f32 %v5548_v59, %v2459_v43  ;;  %v2411_v43 = vmul.f32 1.442695, %v2307_v46  ;;  %v2423_v11 = vmul.f32 1.442695, %v2313_v60  ;;  %v6267_v60 = vld [vmem:[#allocation56_spill] sm:$0xff] }
 0x69c   : > { %v5571_v55 = vpop.eup %3312  ;;  %3332 = vpow2.f32 %v2391_v39 }
 0x69d   : > { %v5579_v50 = vpop.eup %3314  ;;  %3334 = vpow2.f32 %v2395_v33  ;;  %v2461_v37 = vadd.f32 %v5556_v16, %v2460_v28  ;;  %v6263_v33 = vld [vmem:[#allocation52_spill] sm:$0xff] }
 0x69e   : > { %v5585_v39 = vpop.eup %3316  ;;  %3336 = vpow2.f32 %v2399_v47  ;;  %v6265_v47 = vld [vmem:[#allocation54_spill] sm:$0xff] }
 0x69f   : > { %v5595_v14 = vpop.eup %3318  ;;  %3338 = vpow2.f32 %v2403_v8  ;;  %v2462_v56 = vadd.f32 %v5564_v0, %v2461_v37  ;;  %v2427_v37 = vmul.f32 1.442695, %v2315_v42  ;;  %v6268_v42 = vsub.f32 %v5394_v58, %v5452_v31 }
 0x6a0   : > { %v5602_v17 = vpop.eup %3320  ;;  %3340 = vpow2.f32 %v2407_v10  ;;  %v2431_v10 = vmul.f32 1.442695, %v2317_v4  ;;  %v2443_v4 = vmul.f32 1.442695, %v6269_v49  ;;  %v6271_v58 = vsub.f32 %v5431_v34, %v5452_v31 }
 0x6a1   : > { %v5610_v23 = vpop.eup %3322  ;;  %3342 = vpow2.f32 %v2411_v43  ;;  %v2463_v15 = vadd.f32 %v5571_v55, %v2462_v56  ;;  %v2435_v43 = vmul.f32 1.442695, %v2319_v40  ;;  %v6270_v40 = vsub.f32 %v5419_v53, %v5452_v31 }
 0x6a2   : > { %v5616_v28 = vpop.eup %3324  ;;  %3344 = vpow2.f32 %v2415_v27  ;;  %v2439_v27 = vmul.f32 1.442695, %v6268_v42 }
 0x6a3   : > { %v5621_v46 = vpop.eup %3326  ;;  %3346 = vpow2.f32 %v2419_v61  ;;  %v2464_v8 = vadd.f32 %v5579_v50, %v2463_v15  ;;  %v2447_v15 = vmul.f32 1.442695, %v6270_v40 }
 0x6a4   : > { %v5627_v52 = vpop.eup %3328  ;;  %3348 = vpow2.f32 %v2423_v11 }
 0x6a5   : > { %v5632_v56 = vpop.eup %3330  ;;  %3350 = vpow2.f32 %v2427_v37  ;;  %v2465_v61 = vadd.f32 %v5585_v39, %v2464_v8  ;;  %v2451_v37 = vmul.f32 1.442695, %v6271_v58  ;;  %v6272_v8 = vsub.f32 %v5443_v18, %v5452_v31 }
 0x6a6   : > { %v5638_v20 = vpop.eup %3332  ;;  %3352 = vpow2.f32 %v2431_v10  ;;  %v6275_v31 = vsub.f32 %v5086_v6, %v5454_v12  ;;  %v6278_v6 = vsub.f32 %v5136_v44, %v5454_v12  ;;  %v6282_v44 = vsub.f32 %v5184_v1, %v5454_v12 }
 0x6a7   : > { %v5643_v11 = vpop.eup %3334  ;;  %3354 = vpow2.f32 %v2435_v43  ;;  %v2466_v42 = vadd.f32 %v5595_v14, %v2465_v61  ;;  %v2455_v10 = vmul.f32 1.442695, %v6272_v8  ;;  %v6273_v43 = vsub.f32 %v5081_v26, %v5454_v12 }
 0x6a8   : > { %v5649_v22 = vpop.eup %3336  ;;  %3356 = vpow2.f32 %v2439_v27  ;;  %v6274_v61 = vsub.f32 %v5105_v3, %v5454_v12  ;;  %v2341_v18 = vmul.f32 1.442695, %v6275_v31  ;;  %v6276_v26 = vsub.f32 %v5110_v7, %v5454_v12 }
 0x6a9   : > { %v5654_v49 = vpop.eup %3338  ;;  %3358 = vpow2.f32 %v2443_v4  ;;  %v2467_v53 = vadd.f32 %v5602_v17, %v2466_v42  ;;  %v2333_v40 = vmul.f32 1.442695, %v6273_v43  ;;  %v2353_v3 = vmul.f32 1.442695, %v6278_v6 }
 0x6aa   : > { %v5660_v34 = vpop.eup %3340  ;;  %3360 = vpow2.f32 %v2447_v15  ;;  %v2337_v27 = vmul.f32 1.442695, %v6274_v61  ;;  %v2345_v42 = vmul.f32 1.442695, %v6276_v26  ;;  %v6277_v15 = vsub.f32 %v5124_v25, %v5454_v12 }
 0x6ab   : > { %v5668_v58 = vpop.eup %3342  ;;  %3362 = vpow2.f32 %v2451_v37  ;;  %v2468_v4 = vadd.f32 %v5610_v23, %v2467_v53  ;;  %v6279_v37 = vsub.f32 %v5148_v62, %v5454_v12  ;;  %v6280_v53 = vsub.f32 %v5160_v32, %v5454_v12 }
 0x6ac   : > { %v2349_v8 = vmul.f32 1.442695, %v6277_v15  ;;  %v5677_v43 = vpop.eup %3344  ;;  %3364 = vpow2.f32 %v2455_v10  ;;  %v6281_v10 = vsub.f32 %v5172_v13, %v5454_v12  ;;  %v2369_v15 = vmul.f32 1.442695, %v6282_v44 }
 0x6ad   : > { %v2357_v61 = vmul.f32 1.442695, %v6279_v37  ;;  %v2361_v7 = vmul.f32 1.442695, %v6280_v53  ;;  %v5688_v31 = vpop.eup %3346  ;;  %v2469_v25 = vadd.f32 %v5616_v28, %v2468_v4  ;;  %3366 = vpow2.f32 %v2333_v40 }
 0x6ae   : > { %v2365_v26 = vmul.f32 1.442695, %v6281_v10  ;;  %v5697_v6 = vpop.eup %3348  ;;  %3368 = vpow2.f32 %v2337_v27  ;;  %v6284_v44 = vsub.f32 %v6252_v38, %v5454_v12 }
 0x6af   : > { %v5705_v4 = vpop.eup %3350  ;;  %v2470_v13 = vadd.f32 %v5621_v46, %v2469_v25  ;;  %3370 = vpow2.f32 %v2341_v18 }
 0x6b0   : > { %v5712_v37 = vpop.eup %3352  ;;  %3372 = vpow2.f32 %v2345_v42  ;;  %v6283_v42 = vsub.f32 %v6251_v30, %v5454_v12  ;;  %v2377_v10 = vmul.f32 1.442695, %v6284_v44 }
 0x6b1   : > { %v5720_v25 = vpop.eup %3354  ;;  %v2471_v18 = vadd.f32 %v5627_v52, %v2470_v13  ;;  %3374 = vpow2.f32 %v2349_v8 }
 0x6b2   : > { %v5727_v1 = vpop.eup %3356  ;;  %3376 = vpow2.f32 %v2353_v3  ;;  %v2373_v27 = vmul.f32 1.442695, %v6283_v42 }
 0x6b3   : > { %v5735_v13 = vpop.eup %3358  ;;  %v2472_v8 = vadd.f32 %v5632_v56, %v2471_v18  ;;  %3378 = vpow2.f32 %v2357_v61  ;;  %v6285_v61 = vsub.f32 %v6253_v29, %v5454_v12  ;;  %v6290_v29 = vsub.f32 %v6258_v35, %v5454_v12 }
 0x6b4   : > { %v5743_v63 = vpop.eup %3360  ;;  %3380 = vpow2.f32 %v2361_v7  ;;  %v6286_v7 = vsub.f32 %v6254_v45, %v5454_v12  ;;  %v6289_v45 = vsub.f32 %v6257_v19, %v5454_v12  ;;  %v6293_v35 = vsub.f32 %v6261_v36, %v5454_v12 }
 0x6b5   : > { %v5748_v53 = vpop.eup %3362  ;;  %v2473_v40 = vadd.f32 %v5638_v20, %v2472_v8  ;;  %3382 = vpow2.f32 %v2365_v26  ;;  %v2381_v30 = vmul.f32 1.442695, %v6285_v61  ;;  %v6287_v26 = vsub.f32 %v6255_v54, %v5454_v12 }
 0x6b6   : > { %v5756_v42 = vpop.eup %3364  ;;  %3384 = vpow2.f32 %v2369_v15  ;;  %v2385_v38 = vmul.f32 1.442695, %v6286_v7  ;;  %v6288_v15 = vsub.f32 %v6256_v51, %v5454_v12  ;;  %v2397_v7 = vmul.f32 1.442695, %v6289_v45 }
 0x6b7   : > { %v3367_v44 = vpop.eup %3366  ;;  %v2474_v3 = vadd.f32 %v5643_v11, %v2473_v40  ;;  %3386 = vpow2.f32 %v2373_v27  ;;  %v2389_v8 = vmul.f32 1.442695, %v6287_v26  ;;  %v6291_v51 = vsub.f32 %v6259_v21, %v5454_v12 }
 0x6b8   : > { %v3369_v61 = vpop.eup %3368  ;;  %3388 = vpow2.f32 %v2377_v10  ;;  %v2393_v18 = vmul.f32 1.442695, %v6288_v15  ;;  %v2401_v10 = vmul.f32 1.442695, %v6290_v29  ;;  %v2413_v29 = vmul.f32 1.442695, %v6293_v35 }
 0x6b9   : > { %v3371_v32 = vpop.eup %3370  ;;  %v2475_v40 = vadd.f32 %v5649_v22, %v2474_v3  ;;  %3390 = vpow2.f32 %v2381_v30  ;;  %v2496_v27 = vadd.f32 %v3369_v61, %v3367_v44  ;;  %v3083_v54 = vpack.c.bf16 %v3369_v61, %v3367_v44 }
 0x6ba   : > { %v3373_v26 = vpop.eup %3372  ;;  %3392 = vpow2.f32 %v2385_v38  ;;  %v2405_v15 = vmul.f32 1.442695, %v6291_v51  ;;  %v6292_v38 = vsub.f32 %v6260_v2, %v5454_v12  ;;  %v6294_v21 = vpack.c.bf16 %v5540_v57, %v5532_v9 }
 0x6bb   : > { %v3375_v62 = vpop.eup %3374  ;;  %v2476_v19 = vadd.f32 %v5654_v49, %v2475_v40  ;;  %3394 = vpow2.f32 %v2389_v8  ;;  %v2497_v45 = vadd.f32 %v3371_v32, %v2496_v27  ;;  %3084 = vmatprep.subr.bf16.mxu0 %v3083_v54  ;;  %v3087_v3 = vpack.c.bf16 %v3373_v26, %v3371_v32 }
 0x6bc   : > { %v3377_v30 = vpop.eup %3376  ;;  %3396 = vpow2.f32 %v2393_v18  ;;  %v2409_v44 = vmul.f32 1.442695, %v6292_v38  ;;  %3086 = vmatpush1.bf16.msra.mxu0 %v6294_v21  ;;  %v6295_v2 = vsub.f32 %v6262_v5, %v5454_v12 }
 0x6bd   : > { %v3379_v61 = vpop.eup %3378  ;;  %v2477_v8 = vadd.f32 %v5660_v34, %v2476_v19  ;;  %3398 = vpow2.f32 %v2397_v7  ;;  %v2498_v40 = vadd.f32 %v3373_v26, %v2497_v45  ;;  %3088 = vmatprep.subr.bf16.mxu0 %v3087_v3  ;;  %v3091_v32 = vpack.c.bf16 %v3377_v30, %v3375_v62 }
 0x6be   : > { %v3381_v18 = vpop.eup %3380  ;;  %3400 = vpow2.f32 %v2401_v10  ;;  %v2417_v27 = vmul.f32 1.442695, %v6295_v2  ;;  %v6296_v7 = vpack.c.bf16 %v5556_v16, %v5548_v59  ;;  %v6298_v16 = vsub.f32 %v6264_v24, %v5454_v12 }
 0x6bf   : > { %v3383_v54 = vpop.eup %3382  ;;  %v2478_v36 = vadd.f32 %v5668_v58, %v2477_v8  ;;  %3402 = vpow2.f32 %v2405_v15  ;;  %v2499_v51 = vadd.f32 %v3375_v62, %v2498_v40  ;;  %v3095_v9 = vpack.c.bf16 %v3381_v18, %v3379_v61 }
 0x6c0   : > { %v3385_v57 = vpop.eup %3384  ;;  %3404 = vpow2.f32 %v2409_v44  ;;  %3090 = vmatpush1.bf16.msra.mxu0 %v6296_v7  ;;  %v6297_v62 = vsub.f32 %v6263_v33, %v5454_v12  ;;  %v2441_v21 = vmul.f32 1.442695, %v6298_v16  ;;  %v6300_v40 = vsub.f32 %v6265_v47, %v5454_v12 }
 0x6c1   : > { %v3387_v26 = vpop.eup %3386  ;;  %v2479_v19 = vadd.f32 %v5677_v43, %v2478_v36  ;;  %3406 = vpow2.f32 %v2413_v29  ;;  %v2500_v10 = vadd.f32 %v3377_v30, %v2499_v51  ;;  %3092 = vmatprep.subr.bf16.mxu0 %v3091_v32  ;;  %v3099_v5 = vpack.c.bf16 %v3385_v57, %v3383_v54 }
 0x6c2   : > { %v3389_v45 = vpop.eup %3388  ;;  %3408 = vpow2.f32 %v2417_v27  ;;  %v2437_v38 = vmul.f32 1.442695, %v6297_v62  ;;  %v6299_v30 = vpack.c.bf16 %v5571_v55, %v5564_v0  ;;  %v2445_v33 = vmul.f32 1.442695, %v6300_v40  ;;  %v6307_v40 = vld [vmem:[#allocation50_spill] sm:$0xff] }
 0x6c3   : > { %v3391_v3 = vpop.eup %3390  ;;  %v2480_v15 = vadd.f32 %v5688_v31, %v2479_v19  ;;  %v2501_v44 = vadd.f32 %v3379_v61, %v2500_v10  ;;  %v3103_v35 = vpack.c.bf16 %v3389_v45, %v3387_v26  ;;  %v6301_v24 = vsub.f32 %v6266_v48, %v5454_v12 }
 0x6c4   : > { %v3393_v59 = vpop.eup %3392  ;;  %3094 = vmatpush1.bf16.msra.mxu0 %v6299_v30  ;;  %v6302_v55 = vsub.f32 %v6267_v60, %v5454_v12  ;;  %3410 = vpow2.f32 %v2437_v38  ;;  %v6304_v48 = vpack.c.bf16 %v5585_v39, %v5579_v50  ;;  %v6305_v50 = vpack.c.bf16 %v5602_v17, %v5595_v14 }
 0x6c5   : > { %v5809_v29 = vpop.eup %3394  ;;  %v2481_v8 = vadd.f32 %v5697_v6, %v2480_v15  ;;  %v2502_v32 = vadd.f32 %v3381_v18, %v2501_v44  ;;  %3096 = vmatprep.subr.bf16.mxu0 %v3095_v9  ;;  %v3107_v61 = vpack.c.bf16 %v3393_v59, %v3391_v3  ;;  %v2449_v27 = vmul.f32 1.442695, %v6301_v24  ;;  %v6308_v24 = vld [vmem:[#allocation49_spill] sm:$0xff] }
 0x6c6   : > { %v3397_v2 = vpop.eup %3396  ;;  %v2453_v0 = vmul.f32 1.442695, %v6302_v55  ;;  %3412 = vpow2.f32 %v2441_v21  ;;  %v6303_v9 = vsub.f32 %v5448_v41, %v5454_v12  ;;  %v6309_v14 = vpack.c.bf16 %v5616_v28, %v5610_v23 }
 0x6c7   : > { %v5821_v36 = vpop.eup %3398  ;;  %v2482_v51 = vadd.f32 %v5705_v4, %v2481_v8  ;;  %v2503_v7 = vadd.f32 %v3383_v54, %v2502_v32  ;;  %v3111_v47 = vpack.c.bf16 %v3397_v2, %v5809_v29  ;;  %3414 = vpow2.f32 %v2445_v33 }
 0x6c8   : > { %v3401_v18 = vpop.eup %3400  ;;  %v2457_v19 = vmul.f32 1.442695, %v6303_v9  ;;  %3098 = vmatpush1.bf16.msra.mxu0 %v6304_v48  ;;  %3416 = vpow2.f32 %v2449_v27  ;;  %v2314_v33 = vsub.f32 %v6307_v40, %v5454_v12  ;;  %v2316_v27 = vsub.f32 %v6308_v24, %v5454_v12  ;;  %v1579_v24 = vpop.permute.xlu1 %1578 }
 0x6c9   : > { %v3403_v60 = vpop.eup %3402  ;;  %v2483_v10 = vadd.f32 %v5712_v37, %v2482_v51  ;;  %v2504_v15 = vadd.f32 %v3385_v57, %v2503_v7  ;;  %3100 = vmatprep.subr.bf16.mxu0 %v3099_v5  ;;  %v3115_v54 = vpack.c.bf16 %v3401_v18, %v5821_v36  ;;  %3418 = vpow2.f32 %v2453_v0  ;;  %v6306_v57 = vld [vmem:[#allocation48_spill] sm:$0xff]  ;;  %v6310_v51 = vld [vmem:[#allocation51_spill] sm:$0xff] }
 0x6ca   : > { %v3405_v62 = vpop.eup %3404  ;;  %3420 = vpow2.f32 %v2457_v19  ;;  %v2312_v5 = vsub.f32 %v6306_v57, %v5454_v12  ;;  %v2318_v7 = vsub.f32 %v6310_v51, %v5454_v12  ;;  %v2425_v9 = vmul.f32 1.442695, %v2314_v33 }
 0x6cb   : > { %v3407_v38 = vpop.eup %3406  ;;  %v2484_v44 = vadd.f32 %v5720_v25, %v2483_v10  ;;  %v2505_v41 = vadd.f32 %v3387_v26, %v2504_v15  ;;  %v3119_v16 = vpack.c.bf16 %v3405_v62, %v3403_v60  ;;  %v2429_v23 = vmul.f32 1.442695, %v2316_v27  ;;  %v6321_v27 = vld [vmem:[#allocation33_spill] sm:$0xff] }
 0x6cc   : > { %v3409_v21 = vpop.eup %3408  ;;  %3102 = vmatpush1.bf16.msra.mxu0 %v6305_v50  ;;  %v2421_v0 = vmul.f32 1.442695, %v2312_v5  ;;  %v6311_v28 = vpack.c.bf16 %v5627_v52, %v5621_v46  ;;  %v2433_v50 = vmul.f32 1.442695, %v2318_v7  ;;  %v6312_v57 = vpack.c.bf16 %v5638_v20, %v5632_v56 }
 0x6cd   : > { %v2485_v39 = vadd.f32 %v5727_v1, %v2484_v44  ;;  %v2506_v30 = vadd.f32 %v3389_v45, %v2505_v41  ;;  %3104 = vmatprep.subr.bf16.mxu0 %v3103_v35  ;;  %v3123_v8 = vpack.c.bf16 %v3409_v21, %v3407_v38 }
 0x6ce   : > { %v3411_v17 = vpop.eup %3410  ;;  %3422 = vpow2.f32 %v2421_v0  ;;  %v6324_v0 = vld [vmem:[#allocation34_spill] sm:$0xff] }
 0x6cf   : > { %v2486_v26 = vadd.f32 %v5735_v13, %v2485_v39  ;;  %v2507_v32 = vadd.f32 %v3391_v3, %v2506_v30  ;;  %3424 = vpow2.f32 %v2425_v9  ;;  %v6328_v9 = vld [vmem:[#allocation8_spill] sm:$0xff] }
 0x6d0   : > { %3106 = vmatpush1.bf16.msra.mxu0 %v6309_v14  ;;  %v3413_v35 = vpop.eup %3412  ;;  %3426 = vpow2.f32 %v2429_v23  ;;  %v1726_v14 = vadd.f32 %v6321_v27, %v1579_v24 }
 0x6d1   : > { %v2487_v55 = vadd.f32 %v5743_v63, %v2486_v26  ;;  %v2508_v45 = vadd.f32 %v3393_v59, %v2507_v32  ;;  %3108 = vmatprep.subr.bf16.mxu0 %v3107_v61  ;;  %v3415_v19 = vpop.eup %3414  ;;  %v3135_v10 = vpack.c.bf16 %v3413_v35, %v3411_v17  ;;  %3428 = vpow2.f32 %v2433_v50  ;;  %v6333_v50 = vld [vmem:[#allocation9_spill] sm:$0xff] }
 0x6d2   : > { %v3417_v15 = vpop.eup %3416 }
 0x6d3   : > { %v2488_v3 = vadd.f32 %v5748_v53, %v2487_v55  ;;  %v2509_v48 = vadd.f32 %v5809_v29, %v2508_v45  ;;  %v3419_v44 = vpop.eup %3418  ;;  %v3139_v12 = vpack.c.bf16 %v3417_v15, %v3415_v19 }
 0x6d4   : > { %3110 = vmatpush1.bf16.msra.mxu0 %v6311_v28  ;;  %v3421_v41 = vpop.eup %3420  ;;  %v6331_v28 = vld [vmem:[#allocation7_spill] sm:$0xff] }
 0x6d5   : > { %v5857_v59 = vadd.f32 %v5756_v42, %v2488_v3  ;;  %v2510_v61 = vadd.f32 %v3397_v2, %v2509_v48  ;;  %3112 = vmatprep.subr.bf16.mxu0 %v3111_v47  ;;  %v3143_v39 = vpack.c.bf16 %v3421_v41, %v3419_v44  ;;  %v6313_v2 = vpack.c.bf16 %v5649_v22, %v5643_v11  ;;  %v6329_v3 = vld [vmem:[#allocation6_spill] sm:$0xff] }
 0x6d7   : > { %v2511_v29 = vadd.f32 %v5821_v36, %v2510_v61  ;;  %v6314_v36 = vpack.c.bf16 %v5660_v34, %v5654_v49  ;;  %v6332_v61 = vld [vmem:[#allocation12_spill] sm:$0xff] }
 0x6d8   : > { %3114 = vmatpush1.bf16.msra.mxu0 %v6312_v57  ;;  %v3423_v5 = vpop.eup %3422 }
 0x6d9   : > { %v2512_v46 = vadd.f32 %v3401_v18, %v2511_v29  ;;  %3116 = vmatprep.subr.bf16.mxu0 %v3115_v54  ;;  %v3425_v40 = vpop.eup %3424 }
 0x6da   : > { %v3427_v20 = vpop.eup %3426  ;;  %v3127_v54 = vpack.c.bf16 %v3425_v40, %v3423_v5 }
 0x6db   : > { %v2513_v52 = vadd.f32 %v3403_v60, %v2512_v46  ;;  %v3429_v33 = vpop.eup %3428  ;;  %v6315_v60 = vpack.c.bf16 %v5677_v43, %v5668_v58  ;;  %v6318_v58 = vpack.c.bf16 %v5727_v1, %v5720_v25  ;;  %v1584_v43 = vpop.permute.xlu0 %1583  ;;  %v6322_v1 = vld [vmem:[#allocation13_spill] sm:$0xff]  ;;  %v6335_v46 = vld [vmem:[#allocation11_spill] sm:$0xff] }
 0x6dc   : > { %3118 = vmatpush1.bf16.msra.mxu0 %v6313_v2  ;;  %v6323_v25 = vld [vmem:[#allocation41_spill] sm:$0xff]  ;;  %v1732_v45 = vadd.f32 %v6324_v0, %v1584_v43  ;;  %v2490_v2 = vrot.slane %v5857_v59, 4 }
 0x6dd   : > { %v2514_v47 = vadd.f32 %v3405_v62, %v2513_v52  ;;  %3120 = vmatprep.subr.bf16.mxu0 %v3119_v16  ;;  %v3131_v62 = vpack.c.bf16 %v3429_v33, %v3427_v20  ;;  %v6317_v16 = vpack.c.bf16 %v5712_v37, %v5705_v4  ;;  %v6320_v37 = vpack.c.bf16 %v5756_v42, %v5748_v53  ;;  %v6327_v53 = vld [vmem:[#allocation36_spill] sm:$0xff] }
 0x6df   : > { %v2515_v30 = vadd.f32 %v3407_v38, %v2514_v47  ;;  %v6316_v38 = vpack.c.bf16 %v5697_v6, %v5688_v31  ;;  %v6319_v31 = vpack.c.bf16 %v5743_v63, %v5735_v13  ;;  %v1589_v4 = vpop.permute.xlu0 %1588  ;;  %v6325_v63 = vld [vmem:[#allocation35_spill] sm:$0xff] }
 0x6e0   : > { %3122 = vmatpush1.bf16.msra.mxu0 %v6314_v36  ;;  %v1730_v13 = vadd.f32 %v6325_v63, %v1584_v43  ;;  %v1736_v42 = vadd.f32 %v6327_v53, %v1589_v4 }
 0x6e1   : > { %v2516_v56 = vadd.f32 %v3409_v21, %v2515_v30  ;;  %3124 = vmatprep.subr.bf16.mxu0 %v3123_v8 }
 0x6e3   : > { %v2517_v18 = vadd.f32 %v3423_v5, %v2516_v56  ;;  %v1594_v55 = vpop.permute.xlu0 %1593  ;;  %v2491_v5 = vadd.f32 %v2490_v2, %v5857_v59 }
 0x6e4   : > { %3126 = vmatpush1.bf16.msra.mxu0 %v6315_v60  ;;  %v1742_v48 = vadd.f32 %v6329_v3, %v1594_v55 }
 0x6e5   : > { %v2518_v11 = vadd.f32 %v3425_v40, %v2517_v18  ;;  %3128 = vmatprep.subr.bf16.mxu0 %v3127_v54  ;;  %v2492_v40 = vrot.slane %v2491_v5, 2 }
 0x6e7   : > { %v2519_v22 = vadd.f32 %v3427_v20, %v2518_v11  ;;  %v1599_v7 = vpop.permute.xlu0 %1598  ;;  %v2493_v56 = vadd.f32 %v2492_v40, %v2491_v5  ;;  %v6345_v5 = vld [vmem:[#allocation30_spill] sm:$0xff] }
 0x6e8   : > { %3130 = vmatpush1.bf16.msra.mxu0 %v6316_v38 }
 0x6e9   : > { %v2520_v49 = vadd.f32 %v3429_v33, %v2519_v22  ;;  %3132 = vmatprep.subr.bf16.mxu0 %v3131_v62  ;;  %v2494_v18 = vrot.slane %v2493_v56, 1  ;;  %v5907_v62 = vstv %s2753_s19 }
 0x6eb   : > { %v2521_v34 = vadd.f32 %v3411_v17, %v2520_v49  ;;  %v1724_v17 = vadd.f32 %v6323_v25, %v1579_v24  ;;  %v2495_v33 = vadd.f32 %v2494_v18, %v2493_v56  ;;  %v6346_v18 = vld [vmem:[#allocation31_spill] sm:$0xff] }
 0x6ec   : > { %3134 = vmatpush1.bf16.msra.mxu0 %v6317_v16 }
 0x6ed   : > { %v2522_v21 = vadd.f32 %v3413_v35, %v2521_v34  ;;  %3136 = vmatprep.subr.bf16.mxu0 %v3135_v10  ;;  %v6326_v35 = vld [vmem:[#allocation5_spill] sm:$0xff]  ;;  %v1604_v10 = vpop.permute.xlu0 %1603  ;;  %3430 = vrcp.f32 %v2495_v33 }
 0x6ee   : > { %v1738_v51 = vadd.f32 %v6326_v35, %v1589_v4  ;;  %v1754_v29 = vadd.f32 %v6333_v50, %v1604_v10 }
 0x6ef   : > { %v2523_v8 = vadd.f32 %v3415_v19, %v2522_v21  ;;  %v1744_v19 = vadd.f32 %v6328_v9, %v1594_v55  ;;  %v6339_v55 = vld [vmem:[#allocation24_spill] sm:$0xff]  ;;  %v6341_v9 = vld [vmem:[#allocation26_spill] sm:$0xff] }
 0x6f0   : > { %3138 = vmatpush1.bf16.msra.mxu0 %v6318_v58  ;;  %v6336_v58 = vld [vmem:[#allocation21_spill] sm:$0xff] }
 0x6f1   : > { %v2524_v26 = vadd.f32 %v3417_v15, %v2523_v8  ;;  %3140 = vmatprep.subr.bf16.mxu0 %v3139_v12  ;;  %v6330_v15 = vld [vmem:[#allocation10_spill] sm:$0xff]  ;;  %v1756_v12 = vadd.f32 %v6332_v61, %v1604_v10 }
 0x6f2   : > { %v1750_v23 = vadd.f32 %v6330_v15, %v1599_v7 }
 0x6f3   : > { %v2525_v32 = vadd.f32 %v3419_v44, %v2524_v26  ;;  %v1748_v44 = vadd.f32 %v6331_v28, %v1599_v7 }
 0x6f4   : > { %3142 = vmatpush1.bf16.msra.mxu0 %v6319_v31  ;;  %v6337_v31 = vld [vmem:[#allocation22_spill] sm:$0xff] }
 0x6f5   : > { %v2526_v6 = vadd.f32 %v3421_v41, %v2525_v32  ;;  %3144 = vmatprep.subr.bf16.mxu0 %v3143_v39  ;;  %v1609_v41 = vpop.permute.xlu0 %1608  ;;  %v6334_v39 = vld [vmem:[#allocation14_spill] sm:$0xff] }
 0x6f6   : > { %v1762_v57 = vadd.f32 %v6334_v39, %v1609_v41  ;;  %v1760_v52 = vadd.f32 %v6335_v46, %v1609_v41  ;;  %v6344_v46 = vld [vmem:[#allocation29_spill] sm:$0xff] }
 0x6f7   : > { %v2527_v47 = vrot.slane %v2526_v6, 4  ;;  %v5905_v11 = vpop.eup %3430 }
 0x6f8   : > { %3146 = vmatpush1.bf16.msra.mxu0 %v6320_v37 }
 0x6f9   : > { %v2528_v30 = vadd.f32 %v2527_v47, %v2526_v6 }
 0x6fb   : > { %2600 = vmatmul.mubr.f32.vlgmr.msra.gmra.mrb[56].mxu0 %v6322_v1  ;;  %v2529_v36 = vrot.slane %v2528_v30, 2 }
 0x6fc   : > { %2605 = vmatprep.mubr.f32.mxu0 %v1726_v14  ;;  %v6338_v14 = vld [vmem:[#allocation23_spill] sm:$0xff] }
 0x6fd   : > { %v2530_v20 = vadd.f32 %v2529_v36, %v2528_v30 }
 0x6ff   : > { %2606 = vmatmul.mubr.f32.gmra.mrb[58].mxu0 %v1724_v17  ;;  %v2531_v54 = vrot.slane %v2530_v20, 1 }
 0x700   : > { %2611 = vmatprep.mubr.f32.mxu0 %v1732_v45 }
 0x701   : > { %v2532_v60 = vadd.f32 %v2531_v54, %v2530_v20 }
 0x703   : > { %2612 = vmatmul.mubr.f32.gmra.mrb[60].mxu0 %v1730_v13  ;;  %3432 = vrcp.f32 %v2532_v60 }
 0x704   : > { %2617 = vmatprep.mubr.f32.mxu0 %v1738_v51  ;;  %v6340_v51 = vld [vmem:[#allocation25_spill] sm:$0xff] }
 0x707   : > { %2618 = vmatmul.mubr.f32.gmra.mrb[62].mxu0 %v1736_v42 }
 0x708   : > { %2623 = vmatprep.mubr.f32.mxu0 %v1744_v19 }
 0x70b   : > { %2624 = vmatmul.mubr.f32.gmra.mrb[64].mxu0 %v1742_v48 }
 0x70c   : > { %2629 = vmatprep.mubr.f32.mxu0 %v1750_v23  ;;  %v6342_v23 = vld [vmem:[#allocation27_spill] sm:$0xff] }
 0x70d   : > { %v5909_v59 = vpop.eup %3432 }
 0x70f   : > { %2630 = vmatmul.mubr.f32.gmra.mrb[66].mxu0 %v1748_v44 }
 0x710   : > { %2635 = vmatprep.mubr.f32.mxu0 %v1756_v12  ;;  %v6343_v12 = vld [vmem:[#allocation28_spill] sm:$0xff] }
 0x713   : > { %2636 = vmatmul.mubr.f32.gmra.mrb[68].mxu0 %v1754_v29 }
 0x714   : > { %2641 = vmatprep.mubr.f32.mxu0 %v1762_v57 }
 0x717   : > { %2642 = vmatmul.mubr.f32.gmra.mrb[70].mxu0 %v1760_v52 }
 0x7ce   : > { %v2601_v22 = vpop.f32.mrb[56].mxu0 }
 0x7cf   : > { %v2648_v38 = vmul.f32 %v5905_v11, %v2601_v22  ;;  %v2603_v49 = vpop.f32.mrb[57].mxu0  ;;  %v6347_v22 = vld [vmem:[#allocation32_spill] sm:$0xff] }
 0x7d0   : > { %v2649_v34 = vmul.f32 %v5909_v59, %v2603_v49 }
 0x7d1   : > { %v2755_v16 = vmul.f32 %v5907_v62, %v2648_v38 }
 0x7d2   : > { %v2756_v21 = vmul.f32 %v5907_v62, %v2649_v34  ;;  %v2607_v8 = vpop.f32.mrb[58].mxu0 }
 0x7d3   : > { %v2771_v43 = vadd.f32 %v2755_v16, %v6336_v58  ;;  %v2650_v26 = vmul.f32 %v5905_v11, %v2607_v8  ;;  %v2609_v32 = vpop.f32.mrb[59].mxu0  ;;  %v6348_v8 = vld [vmem:[#allocation37_spill] sm:$0xff] }
 0x7d4   : > { %v2772_v6 = vadd.f32 %v2756_v21, %v6337_v31  ;;  %v2651_v24 = vmul.f32 %v5909_v59, %v2609_v32  ;;  %v6349_v32 = vld [vmem:[#allocation38_spill] sm:$0xff] }
 0x7d5   : > { %2787 = vst [vmem:[%s5918_s22] sm:$0xff] %v2771_v43  ;;  %v2757_v4 = vmul.f32 %v5907_v62, %v2650_v26 }
 0x7d6   : > { %2788 = vst [vmem:[%s5918_s22 + $0x8] sm:$0xff] %v2772_v6  ;;  %v2758_v37 = vmul.f32 %v5907_v62, %v2651_v24  ;;  %v2613_v27 = vpop.f32.mrb[60].mxu0 }
 0x7d7   : > { %v2773_v1 = vadd.f32 %v2757_v4, %v6338_v14  ;;  %v2652_v25 = vmul.f32 %v5905_v11, %v2613_v27  ;;  %v2615_v17 = vpop.f32.mrb[61].mxu0  ;;  %v6351_v14 = vld [vmem:[#allocation40_spill] sm:$0xff] }
 0x7d8   : > { %v2774_v0 = vadd.f32 %v2758_v37, %v6339_v55  ;;  %v2653_v45 = vmul.f32 %v5909_v59, %v2615_v17  ;;  %v6350_v37 = vld [vmem:[#allocation39_spill] sm:$0xff] }
 0x7d9   : > { %2789 = vst [vmem:[%s5918_s22 + $0x10] sm:$0xff] %v2773_v1  ;;  %v2759_v63 = vmul.f32 %v5907_v62, %v2652_v25 }
 0x7da   : > { %2790 = vst [vmem:[%s5918_s22 + $0x18] sm:$0xff] %v2774_v0  ;;  %v2760_v13 = vmul.f32 %v5907_v62, %v2653_v45  ;;  %v2619_v35 = vpop.f32.mrb[62].mxu0 }
 0x7db   : > { %v2775_v7 = vadd.f32 %v2759_v63, %v6340_v51  ;;  %v2654_v53 = vmul.f32 %v5905_v11, %v2619_v35  ;;  %v2621_v42 = vpop.f32.mrb[63].mxu0 }
 0x7dc   : > { %v2776_v19 = vadd.f32 %v2760_v13, %v6341_v9  ;;  %v2655_v3 = vmul.f32 %v5909_v59, %v2621_v42 }
 0x7dd   : > { %2791 = vst [vmem:[%s5918_s22 + $0x20] sm:$0xff] %v2775_v7  ;;  %v2761_v48 = vmul.f32 %v5907_v62, %v2654_v53 }
 0x7de   : > { %2792 = vst [vmem:[%s5918_s22 + $0x28] sm:$0xff] %v2776_v19  ;;  %v2762_v10 = vmul.f32 %v5907_v62, %v2655_v3  ;;  %v2625_v15 = vpop.f32.mrb[64].mxu0 }
 0x7df   : > { %v2777_v28 = vadd.f32 %v2761_v48, %v6342_v23  ;;  %v2656_v44 = vmul.f32 %v5905_v11, %v2625_v15  ;;  %v2627_v61 = vpop.f32.mrb[65].mxu0 }
 0x7e0   : > { %v2778_v41 = vadd.f32 %v2762_v10, %v6343_v12  ;;  %v2657_v50 = vmul.f32 %v5909_v59, %v2627_v61 }
 0x7e1   : > { %2793 = vst [vmem:[%s5918_s22 + $0x30] sm:$0xff] %v2777_v28  ;;  %v2763_v29 = vmul.f32 %v5907_v62, %v2656_v44 }
 0x7e2   : > { %2794 = vst [vmem:[%s5918_s22 + $0x38] sm:$0xff] %v2778_v41  ;;  %v2764_v39 = vmul.f32 %v5907_v62, %v2657_v50  ;;  %v2631_v57 = vpop.f32.mrb[66].mxu0 }
 0x7e3   : > { %v2779_v52 = vadd.f32 %v2763_v29, %v6344_v46  ;;  %v2658_v2 = vmul.f32 %v5905_v11, %v2631_v57  ;;  %v2633_v47 = vpop.f32.mrb[67].mxu0 }
 0x7e4   : > { %v2780_v30 = vadd.f32 %v2764_v39, %v6345_v5  ;;  %v2659_v40 = vmul.f32 %v5909_v59, %v2633_v47 }
 0x7e5   : > { %2795 = vst [vmem:[%s5918_s22 + $0x40] sm:$0xff] %v2779_v52  ;;  %v2765_v36 = vmul.f32 %v5907_v62, %v2658_v2 }
 0x7e6   : > { %2796 = vst [vmem:[%s5918_s22 + $0x48] sm:$0xff] %v2780_v30  ;;  %v2766_v56 = vmul.f32 %v5907_v62, %v2659_v40  ;;  %v2637_v20 = vpop.f32.mrb[68].mxu0 }
 0x7e7   : > { %v2781_v54 = vadd.f32 %v2765_v36, %v6346_v18  ;;  %v2660_v33 = vmul.f32 %v5905_v11, %v2637_v20  ;;  %v2639_v60 = vpop.f32.mrb[69].mxu0 }
 0x7e8   : > { %v2782_v38 = vadd.f32 %v2766_v56, %v6347_v22  ;;  %v2661_v49 = vmul.f32 %v5909_v59, %v2639_v60 }
 0x7e9   : > { %2797 = vst [vmem:[%s5918_s22 + $0x50] sm:$0xff] %v2781_v54  ;;  %v2767_v34 = vmul.f32 %v5907_v62, %v2660_v33 }
 0x7ea   : > { %2798 = vst [vmem:[%s5918_s22 + $0x58] sm:$0xff] %v2782_v38  ;;  %v2768_v16 = vmul.f32 %v5907_v62, %v2661_v49  ;;  %v2643_v21 = vpop.f32.mrb[70].mxu0 }
 0x7eb   : > { %v2783_v58 = vadd.f32 %v2767_v34, %v6348_v8  ;;  %v2662_v43 = vmul.f32 %v5905_v11, %v2643_v21  ;;  %v2645_v26 = vpop.f32.mrb[71].mxu0 }
 0x7ec   : > { %v2784_v31 = vadd.f32 %v2768_v16, %v6349_v32  ;;  %v2663_v6 = vmul.f32 %v5909_v59, %v2645_v26 }
 0x7ed   : > { %2799 = vst [vmem:[%s5918_s22 + $0x60] sm:$0xff] %v2783_v58  ;;  %v2769_v24 = vmul.f32 %v5907_v62, %v2662_v43 }
 0x7ee   : > { %2800 = vst [vmem:[%s5918_s22 + $0x68] sm:$0xff] %v2784_v31  ;;  %v2770_v4 = vmul.f32 %v5907_v62, %v2663_v6 }
 0x7ef   : > { %v2785_v27 = vadd.f32 %v2769_v24, %v6350_v37 }
 0x7f0   : > { %v2786_v1 = vadd.f32 %v2770_v4, %v6351_v14 }
 0x7f1   : > { %2801 = vst [vmem:[%s5918_s22 + $0x70] sm:$0xff] %v2785_v27 }
 0x7f2   : > { %2802 = vst [vmem:[%s5918_s22 + $0x78] sm:$0xff] %v2786_v1 }
 0x7f3 PF: > { %s19_s27 = sadd.s32 1, %s3539_s27  }
 0x7f4   : > { %p16_p1 = scmp.ge.s32.totalorder %s19_s27, 4  }
 0x7f6   :  { %18 = sbr.rel (!%p16_p1) target bundleno = 1 (0x1), region = 90 }
 0x7fd   :  { %2824 = vsyncpa [#allocation3], 1 }
 0x7fe   :  { %2826 = vsyncpa [#allocation3 + $0x1], 1 }

</bundles_post_ra>
